<compile_context>
chip_gen: v7x
topology: tpu7x:2x2x1
jax: 0.10.0
libtpu: 0.0.40
codegen_flags: <defaults>
</compile_context>

<pallas_src>
import math

import jax
import jax.numpy as jnp
from jax.experimental import pallas as pl
from jax.experimental.pallas import tpu as pltpu

# ----------------------------- hyperparameters (small synthetic config) -----
B = 2              # batch
C = 3              # image channels
IMG = 16           # image H = W
PATCH = 8          # patch size -> 2x2 = 4 patches
NUM_PATCHES = (IMG // PATCH) ** 2
PATCH_DIM = C * PATCH * PATCH
HIDDEN = 32        # shared hidden size (vision == language)
HEADS = 4
HEAD_DIM = HIDDEN // HEADS
MLP = 4 * HIDDEN
NUM_QUERIES = 4    # small-scale analogue of num_learnable_queries=24
VOCAB = 64
SEQ = 8            # text sequence length
NV = NUM_PATCHES + 1          # visual tokens (+CLS)
ENC_LEN = NUM_QUERIES + NV    # encoder states = [queries ; visual]

_NEG_INF = -1e9


# ----------------------------- in-kernel helpers -----------------------------
def _layer_norm(x, g, b, eps=1e-5):
    mu = jnp.mean(x, axis=-1, keepdims=True)
    xc = x - mu
    var = jnp.mean(xc * xc, axis=-1, keepdims=True)
    return xc * jax.lax.rsqrt(var + eps) * g + b


def _mha(xq, xkv, qw, qb, kw, kb, vw, vb, ow, ob, bias):
    """All-heads multi-head attention inside one kernel invocation.

    xq: [Tq, H], xkv: [Tk, H]
    qw/kw/vw: [HEADS, H, dh], qb/kb/vb: [HEADS, 1, dh]
    ow: [HEADS, dh, H], ob: [1, H]
    bias: [Tq, Tk] additive bias or None.
    """
    num_heads, _, dh = qw.shape
    scale = 1.0 / math.sqrt(dh)
    out = jnp.zeros((xq.shape[0], ow.shape[-1]), jnp.float32) + ob
    for h in range(num_heads):                      # static 4-iteration loop
        qh = jnp.dot(xq, qw[h], preferred_element_type=jnp.float32) + qb[h]
        kh = jnp.dot(xkv, kw[h], preferred_element_type=jnp.float32) + kb[h]
        vh = jnp.dot(xkv, vw[h], preferred_element_type=jnp.float32) + vb[h]
        s = jnp.dot(qh, kh.T, preferred_element_type=jnp.float32) * scale
        if bias is not None:
            s = s + bias
        m = jnp.max(s, axis=-1, keepdims=True)
        p = jnp.exp(s - m)
        l = jnp.sum(p, axis=-1, keepdims=True)
        inv_l = pl.reciprocal(l, approx=True)       # EUP slot, VALU stays free
        oh = jnp.dot(p, vh, preferred_element_type=jnp.float32) * inv_l
        # accumulate the output projection per head -> no head concat needed
        out = out + jnp.dot(oh, ow[h], preferred_element_type=jnp.float32)
    return out


def _mlp(x, w1, b1, w2, b2):
    h = jnp.dot(x, w1, preferred_element_type=jnp.float32) + b1
    # TODO(synk): PyTorch nn.GELU defaults to exact erf; tanh approximation kept here.
    h = jax.nn.gelu(h, approximate=True)
    return jnp.dot(h, w2, preferred_element_type=jnp.float32) + b2


# ----------------------------- fused whole-model kernel ----------------------
def _vlm_kernel(patch_ref, ids_ref, mask_ref,
                pw_ref, vadd_ref, encb_ref, sel_ref, wte_ref, wpe_ref,
                lng_ref, lnb_ref,
                qw_ref, qb_ref, kw_ref, kb_ref, vw_ref, vb_ref, ow_ref, ob_ref,
                fc1w_ref, fc1b_ref, fc2w_ref, fc2b_ref,
                o_ref):
    # ---------------- vision encoder (pre-LN block + final LN) --------------
    # patch embedding; CLS token / patch bias / positional embedding folded
    # into a single additive term (vadd).
    v = jnp.dot(patch_ref[0], pw_ref[...],
                preferred_element_type=jnp.float32) + vadd_ref[...]
    h = _layer_norm(v, lng_ref[0], lnb_ref[0])
    v = v + _mha(h, h, qw_ref[0], qb_ref[0], kw_ref[0], kb_ref[0],
                 vw_ref[0], vb_ref[0], ow_ref[0], ob_ref[0], None)
    h = _layer_norm(v, lng_ref[1], lnb_ref[1])
    v = v + _mlp(h, fc1w_ref[0], fc1b_ref[0], fc2w_ref[0], fc2b_ref[0])
    visual = _layer_norm(v, lng_ref[2], lnb_ref[2])          # [NV, H]

    # encoder hidden states = [learnable queries ; visual], built in VMEM with an
    # aligned scatter-matmul (enc_base holds the queries, SEL places the visual rows).
    enc = encb_ref[...] + jnp.dot(sel_ref[...], visual,
                                  preferred_element_type=jnp.float32)  # [ENC_LEN, H]

    # ---------------- token + positional embeddings (one-hot matmul) --------
    ids = ids_ref[0]                                          # [T, 1] int32
    T = ids.shape[0]
    vocab_col = jax.lax.broadcasted_iota(jnp.int32, (T, VOCAB), 1)
    onehot = (vocab_col == ids).astype(jnp.float32)           # [T, VOCAB]
    x = jnp.dot(onehot, wte_ref[...],
                preferred_element_type=jnp.float32) + wpe_ref[...]      # [T, H]

    # causal + padding bias built in-kernel from iota (no [B,T,T] HBM bias tensor)
    row = jax.lax.broadcasted_iota(jnp.int32, (T, T), 0)
    col = jax.lax.broadcasted_iota(jnp.int32, (T, T), 1)
    keep = (col <= row) & (mask_ref[0] > 0.5)
    self_bias = jnp.where(keep, 0.0, _NEG_INF).astype(jnp.float32)

    # ---------------- LM block: causal self-attn -> cross-attn -> MLP -------
    h = _layer_norm(x, lng_ref[3], lnb_ref[3])
    x = x + _mha(h, h, qw_ref[1], qb_ref[1], kw_ref[1], kb_ref[1],
                 vw_ref[1], vb_ref[1], ow_ref[1], ob_ref[1], self_bias)
    # encoder_attention_mask is all-ones -> cross-attn needs no bias
    h = _layer_norm(x, lng_ref[4], lnb_ref[4])
    x = x + _mha(h, enc, qw_ref[2], qb_ref[2], kw_ref[2], kb_ref[2],
                 vw_ref[2], vb_ref[2], ow_ref[2], ob_ref[2], None)
    h = _layer_norm(x, lng_ref[5], lnb_ref[5])
    x = x + _mlp(h, fc1w_ref[1], fc1b_ref[1], fc2w_ref[1], fc2b_ref[1])
    o_ref[0] = _layer_norm(x, lng_ref[6], lnb_ref[6])


# ----------------------------- BlockSpec helpers -----------------------------
def _rep_spec(arr):
    """Full-array block, same block index every grid step (DMA'd once)."""
    return pl.BlockSpec(arr.shape, lambda b, _nd=arr.ndim: (0,) * _nd)


def _batched_spec(arr):
    """Block = one batch element, indexed by the batch grid axis."""
    return pl.BlockSpec((1,) + arr.shape[1:],
                        lambda b, _nd=arr.ndim: (b,) + (0,) * (_nd - 1))


# ----------------------------- parameter packing -----------------------------
def _pack_attn(pa):
    """[H, H] projections -> per-head tensors usable without in-kernel lane slicing."""
    qw = pa["q"]["w"].reshape(HIDDEN, HEADS, HEAD_DIM).transpose(1, 0, 2)
    kw = pa["k"]["w"].reshape(HIDDEN, HEADS, HEAD_DIM).transpose(1, 0, 2)
    vw = pa["v"]["w"].reshape(HIDDEN, HEADS, HEAD_DIM).transpose(1, 0, 2)
    qb = pa["q"]["b"].reshape(HEADS, 1, HEAD_DIM)
    kb = pa["k"]["b"].reshape(HEADS, 1, HEAD_DIM)
    vb = pa["v"]["b"].reshape(HEADS, 1, HEAD_DIM)
    ow = pa["o"]["w"].reshape(HEADS, HEAD_DIM, HIDDEN)
    ob = pa["o"]["b"].reshape(1, HIDDEN)
    return qw, qb, kw, kb, vw, vb, ow, ob


# ----------------------------- model -----------------------------------------
def svad_vlm_forward(params, images, input_ids, attention_mask=None):
    Bx, T = input_ids.shape
    pv, plm = params["vision"], params["lm"]

    # ---- image -> patch rows (pure layout, done once in XLA) ----
    nh = nw = IMG // PATCH
    patches = images.reshape(Bx, C, nh, PATCH, nw, PATCH)
    patches = patches.transpose(0, 2, 4, 1, 3, 5).reshape(Bx, nh * nw, PATCH_DIM)
    # prepend an all-zero "CLS" patch row; CLS embedding / patch bias / pos-emb are
    # folded into a single additive term applied inside the kernel.
    patches = jnp.concatenate(
        [jnp.zeros((Bx, 1, PATCH_DIM), jnp.float32), patches], axis=1)   # [B, NV, PD]

    vis_add = jnp.concatenate(
        [pv["cls"] + pv["pos"][0:1],
         pv["patch"]["b"][None, :] + pv["pos"][1:]], axis=0)             # [NV, H]

    if attention_mask is None:
        attention_mask = jnp.ones((Bx, T), jnp.int32)
    mask_f = attention_mask.astype(jnp.float32).reshape(Bx, 1, T)
    ids3 = input_ids.astype(jnp.int32).reshape(Bx, T, 1)

    # learnable queries in rows [0, Q) of enc_base; SEL scatters visual into rows [Q, ENC_LEN)
    enc_base = jnp.zeros((ENC_LEN, HIDDEN), jnp.float32)
    enc_base = enc_base.at[:NUM_QUERIES].set(params["queries"])
    sel = (jnp.arange(ENC_LEN)[:, None]
           == (jnp.arange(NV)[None, :] + NUM_QUERIES)).astype(jnp.float32)  # [ENC_LEN, NV]

    # stacked LayerNorm / attention / MLP parameters -> a few replicated tensors
    # LN order : 0 vis.ln1, 1 vis.ln2, 2 vis.ln_f, 3 lm.ln1, 4 lm.ln_cross, 5 lm.ln2, 6 lm.ln_f
    lng = jnp.stack([pv["ln1"]["g"], pv["ln2"]["g"], pv["ln_f"]["g"],
                     plm["ln1"]["g"], plm["ln_cross"]["g"], plm["ln2"]["g"],
                     plm["ln_f"]["g"]])[:, None, :]
    lnb = jnp.stack([pv["ln1"]["b"], pv["ln2"]["b"], pv["ln_f"]["b"],
                     plm["ln1"]["b"], plm["ln_cross"]["b"], plm["ln2"]["b"],
                     plm["ln_f"]["b"]])[:, None, :]
    # attn order : 0 vision self-attn, 1 lm self-attn, 2 lm cross-attn
    packed = [_pack_attn(pv["attn"]), _pack_attn(plm["attn"]),
              _pack_attn(plm["cross_attn"])]
    qw, qb, kw, kb, vw, vb, ow, ob = [jnp.stack(t) for t in zip(*packed)]
    # mlp order : 0 vision, 1 lm
    fc1w = jnp.stack([pv["mlp"]["fc1"]["w"], plm["mlp"]["fc1"]["w"]])
    fc1b = jnp.stack([pv["mlp"]["fc1"]["b"], plm["mlp"]["fc1"]["b"]])[:, None, :]
    fc2w = jnp.stack([pv["mlp"]["fc2"]["w"], plm["mlp"]["fc2"]["w"]])
    fc2b = jnp.stack([pv["mlp"]["fc2"]["b"], plm["mlp"]["fc2"]["b"]])[:, None, :]

    args = (patches, ids3, mask_f,
            pv["patch"]["w"], vis_add, enc_base, sel,
            plm["wte"], plm["wpe"][:T],
            lng, lnb, qw, qb, kw, kb, vw, vb, ow, ob,
            fc1w, fc1b, fc2w, fc2b)
    in_specs = ([_batched_spec(patches), _batched_spec(ids3), _batched_spec(mask_f)]
                + [_rep_spec(a) for a in args[3:]])
    return pl.pallas_call(
        _vlm_kernel,
        out_shape=jax.ShapeDtypeStruct((Bx, T, HIDDEN), jnp.float32),
        grid=(Bx,),
        in_specs=in_specs,
        out_specs=pl.BlockSpec((1, T, HIDDEN), lambda b: (b, 0, 0)),
        compiler_params=pltpu.CompilerParams(dimension_semantics=("parallel",)),
    )(*args)


# ----------------------------- deterministic parameter init ------------------
def init_params(key):
    keys = iter(jax.random.split(key, 64))

    def lin(din, dout):
        return {"w": (jax.random.normal(next(keys), (din, dout), jnp.float32) * 0.02),
                "b": jnp.zeros((dout,), jnp.float32)}

    def ln():
        return {"g": jnp.ones((HIDDEN,), jnp.float32),
                "b": jnp.zeros((HIDDEN,), jnp.float32)}

    def attn():
        return {"q": lin(HIDDEN, HIDDEN), "k": lin(HIDDEN, HIDDEN),
                "v": lin(HIDDEN, HIDDEN), "o": lin(HIDDEN, HIDDEN)}

    def mlp_p():
        return {"fc1": lin(HIDDEN, MLP), "fc2": lin(MLP, HIDDEN)}

    return {
        "vision": {
            "patch": lin(PATCH_DIM, HIDDEN),
            "cls": jax.random.normal(next(keys), (1, HIDDEN), jnp.float32) * 0.02,
            "pos": jax.random.normal(next(keys), (NV, HIDDEN), jnp.float32) * 0.02,
            "ln1": ln(), "attn": attn(), "ln2": ln(), "mlp": mlp_p(), "ln_f": ln(),
        },
        "queries": jax.random.normal(next(keys), (NUM_QUERIES, HIDDEN), jnp.float32) * 0.02,
        "lm": {
            "wte": jax.random.normal(next(keys), (VOCAB, HIDDEN), jnp.float32) * 0.02,
            "wpe": jax.random.normal(next(keys), (SEQ, HIDDEN), jnp.float32) * 0.02,
            "ln1": ln(), "attn": attn(),
            "ln_cross": ln(), "cross_attn": attn(),
            "ln2": ln(), "mlp": mlp_p(), "ln_f": ln(),
        },
    }


# ----------------------------- main -------------------------------------------
if __name__ == "__main__":
    key = jax.random.PRNGKey(0)
    k_img, k_ids, k_params = jax.random.split(key, 3)

    images = jax.random.normal(k_img, (B, C, IMG, IMG), jnp.float32)      # NCHW
    input_ids = jax.random.randint(k_ids, (B, SEQ), 0, VOCAB)
    attention_mask = jnp.ones((B, SEQ), jnp.int32)

    params = init_params(k_params)

    fwd = jax.jit(svad_vlm_forward)
    out = fwd(params, images, input_ids, attention_mask)
    out = jax.block_until_ready(out)

    assert out.shape == (B, SEQ, HIDDEN), out.shape
    assert jnp.all(jnp.isfinite(out))
    print("KERNEL_OK")
</pallas_src>

<mosaic_0001>
module attributes {stable_mosaic.version = 11 : i64} {
  func.func @_vlm_kernel(%arg0: i32, %arg1: memref<1x5x192xf32, #tpu.memory_space<vmem>>, %arg2: memref<1x8x1xi32, #tpu.memory_space<vmem>>, %arg3: memref<1x1x8xf32, #tpu.memory_space<vmem>>, %arg4: memref<192x32xf32, #tpu.memory_space<vmem>>, %arg5: memref<5x32xf32, #tpu.memory_space<vmem>>, %arg6: memref<9x32xf32, #tpu.memory_space<vmem>>, %arg7: memref<9x5xf32, #tpu.memory_space<vmem>>, %arg8: memref<64x32xf32, #tpu.memory_space<vmem>>, %arg9: memref<8x32xf32, #tpu.memory_space<vmem>>, %arg10: memref<7x1x32xf32, #tpu.memory_space<vmem>>, %arg11: memref<7x1x32xf32, #tpu.memory_space<vmem>>, %arg12: memref<3x4x32x8xf32, #tpu.memory_space<vmem>>, %arg13: memref<3x4x1x8xf32, #tpu.memory_space<vmem>>, %arg14: memref<3x4x32x8xf32, #tpu.memory_space<vmem>>, %arg15: memref<3x4x1x8xf32, #tpu.memory_space<vmem>>, %arg16: memref<3x4x32x8xf32, #tpu.memory_space<vmem>>, %arg17: memref<3x4x1x8xf32, #tpu.memory_space<vmem>>, %arg18: memref<3x4x8x32xf32, #tpu.memory_space<vmem>>, %arg19: memref<3x1x32xf32, #tpu.memory_space<vmem>>, %arg20: memref<2x32x128xf32, #tpu.memory_space<vmem>>, %arg21: memref<2x1x128xf32, #tpu.memory_space<vmem>>, %arg22: memref<2x128x32xf32, #tpu.memory_space<vmem>>, %arg23: memref<2x1x32xf32, #tpu.memory_space<vmem>>, %arg24: memref<1x8x32xf32, #tpu.memory_space<vmem>>) attributes {dimension_semantics = [#tpu.dimension_semantics<parallel>], iteration_bounds = array<i64: 2>, scalar_prefetch = 0 : i64, scratch_operands = 0 : i64, tpu.core_type = #tpu.core_type<tc>, window_params = [{transform_indices = @transform_0, window_bounds = array<i64: 1, 5, 192>}, {transform_indices = @transform_1, window_bounds = array<i64: 1, 8, 1>}, {transform_indices = @transform_2, window_bounds = array<i64: 1, 1, 8>}, {pipeline_mode = #tpu.pipeline_mode<synchronous>, transform_indices = @transform_3, window_bounds = array<i64: 192, 32>}, {pipeline_mode = #tpu.pipeline_mode<synchronous>, transform_indices = @transform_4, window_bounds = array<i64: 5, 32>}, {pipeline_mode = #tpu.pipeline_mode<synchronous>, transform_indices = @transform_5, window_bounds = array<i64: 9, 32>}, {pipeline_mode = #tpu.pipeline_mode<synchronous>, transform_indices = @transform_6, window_bounds = array<i64: 9, 5>}, {pipeline_mode = #tpu.pipeline_mode<synchronous>, transform_indices = @transform_7, window_bounds = array<i64: 64, 32>}, {pipeline_mode = #tpu.pipeline_mode<synchronous>, transform_indices = @transform_8, window_bounds = array<i64: 8, 32>}, {pipeline_mode = #tpu.pipeline_mode<synchronous>, transform_indices = @transform_9, window_bounds = array<i64: 7, 1, 32>}, {pipeline_mode = #tpu.pipeline_mode<synchronous>, transform_indices = @transform_10, window_bounds = array<i64: 7, 1, 32>}, {pipeline_mode = #tpu.pipeline_mode<synchronous>, transform_indices = @transform_11, window_bounds = array<i64: 3, 4, 32, 8>}, {pipeline_mode = #tpu.pipeline_mode<synchronous>, transform_indices = @transform_12, window_bounds = array<i64: 3, 4, 1, 8>}, {pipeline_mode = #tpu.pipeline_mode<synchronous>, transform_indices = @transform_13, window_bounds = array<i64: 3, 4, 32, 8>}, {pipeline_mode = #tpu.pipeline_mode<synchronous>, transform_indices = @transform_14, window_bounds = array<i64: 3, 4, 1, 8>}, {pipeline_mode = #tpu.pipeline_mode<synchronous>, transform_indices = @transform_15, window_bounds = array<i64: 3, 4, 32, 8>}, {pipeline_mode = #tpu.pipeline_mode<synchronous>, transform_indices = @transform_16, window_bounds = array<i64: 3, 4, 1, 8>}, {pipeline_mode = #tpu.pipeline_mode<synchronous>, transform_indices = @transform_17, window_bounds = array<i64: 3, 4, 8, 32>}, {pipeline_mode = #tpu.pipeline_mode<synchronous>, transform_indices = @transform_18, window_bounds = array<i64: 3, 1, 32>}, {pipeline_mode = #tpu.pipeline_mode<synchronous>, transform_indices = @transform_19, window_bounds = array<i64: 2, 32, 128>}, {pipeline_mode = #tpu.pipeline_mode<synchronous>, transform_indices = @transform_20, window_bounds = array<i64: 2, 1, 128>}, {pipeline_mode = #tpu.pipeline_mode<synchronous>, transform_indices = @transform_21, window_bounds = array<i64: 2, 128, 32>}, {pipeline_mode = #tpu.pipeline_mode<synchronous>, transform_indices = @transform_22, window_bounds = array<i64: 2, 1, 32>}, {transform_indices = @transform_23, window_bounds = array<i64: 1, 8, 32>}]} {
    %c0 = arith.constant 0 : index
    %c0_0 = arith.constant 0 : index
    %c0_1 = arith.constant 0 : index
    %0 = vector.load %arg1[%c0, %c0_0, %c0_1] : memref<1x5x192xf32, #tpu.memory_space<vmem>>, vector<1x5x192xf32>
    %1 = vector.shape_cast %0 : vector<1x5x192xf32> to vector<5x192xf32>
    %c0_2 = arith.constant 0 : index
    %c0_3 = arith.constant 0 : index
    %2 = vector.load %arg4[%c0_2, %c0_3] : memref<192x32xf32, #tpu.memory_space<vmem>>, vector<192x32xf32>
    %cst = arith.constant dense<0.000000e+00> : vector<5x32xf32>
    %3 = tpu.matmul %1, %2, %cst {dimension_numbers = #tpu.dot_dimension_numbers<[1], [0], [0], [1], [0, 0, 1, 1], [], []>} : vector<5x192xf32>, vector<192x32xf32>, vector<5x32xf32> -> vector<5x32xf32>
    %c0_4 = arith.constant 0 : index
    %c0_5 = arith.constant 0 : index
    %4 = vector.load %arg5[%c0_4, %c0_5] : memref<5x32xf32, #tpu.memory_space<vmem>>, vector<5x32xf32>
    %5 = arith.addf %3, %4 : vector<5x32xf32>
    %c0_6 = arith.constant 0 : index
    %c0_7 = arith.constant 0 : index
    %c0_8 = arith.constant 0 : index
    %6 = vector.load %arg10[%c0_6, %c0_7, %c0_8] : memref<7x1x32xf32, #tpu.memory_space<vmem>>, vector<1x1x32xf32>
    %7 = vector.shape_cast %6 : vector<1x1x32xf32> to vector<1x32xf32>
    %c0_9 = arith.constant 0 : index
    %c0_10 = arith.constant 0 : index
    %c0_11 = arith.constant 0 : index
    %8 = vector.load %arg11[%c0_9, %c0_10, %c0_11] : memref<7x1x32xf32, #tpu.memory_space<vmem>>, vector<1x1x32xf32>
    %9 = vector.shape_cast %8 : vector<1x1x32xf32> to vector<1x32xf32>
    %cst_12 = arith.constant dense<0.000000e+00> : vector<5xf32>
    %10 = vector.multi_reduction <add>, %5, %cst_12 [1] : vector<5x32xf32> to vector<5xf32>
    %11 = vector.shape_cast %10 : vector<5xf32> to vector<5x1xf32>
    %cst_13 = arith.constant 3.200000e+01 : f32
    %12 = vector.broadcast %cst_13 : f32 to vector<5x1xf32>
    %13 = arith.divf %11, %12 : vector<5x1xf32>
    %14 = vector.broadcast %13 : vector<5x1xf32> to vector<5x32xf32>
    %15 = arith.subf %5, %14 : vector<5x32xf32>
    %16 = arith.mulf %15, %15 : vector<5x32xf32>
    %cst_14 = arith.constant dense<0.000000e+00> : vector<5xf32>
    %17 = vector.multi_reduction <add>, %16, %cst_14 [1] : vector<5x32xf32> to vector<5xf32>
    %18 = vector.shape_cast %17 : vector<5xf32> to vector<5x1xf32>
    %cst_15 = arith.constant 3.200000e+01 : f32
    %19 = vector.broadcast %cst_15 : f32 to vector<5x1xf32>
    %20 = arith.divf %18, %19 : vector<5x1xf32>
    %cst_16 = arith.constant 9.99999974E-6 : f32
    %21 = vector.broadcast %cst_16 : f32 to vector<5x1xf32>
    %22 = arith.addf %20, %21 : vector<5x1xf32>
    %23 = math.rsqrt %22 : vector<5x1xf32>
    %24 = vector.broadcast %23 : vector<5x1xf32> to vector<5x32xf32>
    %25 = arith.mulf %15, %24 : vector<5x32xf32>
    %26 = vector.broadcast %7 : vector<1x32xf32> to vector<5x32xf32>
    %27 = arith.mulf %25, %26 : vector<5x32xf32>
    %28 = vector.broadcast %9 : vector<1x32xf32> to vector<5x32xf32>
    %29 = arith.addf %27, %28 : vector<5x32xf32>
    %c0_17 = arith.constant 0 : index
    %c0_18 = arith.constant 0 : index
    %c0_19 = arith.constant 0 : index
    %c0_20 = arith.constant 0 : index
    %30 = vector.load %arg12[%c0_17, %c0_18, %c0_19, %c0_20] : memref<3x4x32x8xf32, #tpu.memory_space<vmem>>, vector<1x4x32x8xf32>
    %31 = vector.shape_cast %30 : vector<1x4x32x8xf32> to vector<4x32x8xf32>
    %c0_21 = arith.constant 0 : index
    %c0_22 = arith.constant 0 : index
    %c0_23 = arith.constant 0 : index
    %c0_24 = arith.constant 0 : index
    %32 = vector.load %arg13[%c0_21, %c0_22, %c0_23, %c0_24] : memref<3x4x1x8xf32, #tpu.memory_space<vmem>>, vector<1x4x1x8xf32>
    %33 = vector.shape_cast %32 : vector<1x4x1x8xf32> to vector<4x1x8xf32>
    %c0_25 = arith.constant 0 : index
    %c0_26 = arith.constant 0 : index
    %c0_27 = arith.constant 0 : index
    %c0_28 = arith.constant 0 : index
    %34 = vector.load %arg14[%c0_25, %c0_26, %c0_27, %c0_28] : memref<3x4x32x8xf32, #tpu.memory_space<vmem>>, vector<1x4x32x8xf32>
    %35 = vector.shape_cast %34 : vector<1x4x32x8xf32> to vector<4x32x8xf32>
    %c0_29 = arith.constant 0 : index
    %c0_30 = arith.constant 0 : index
    %c0_31 = arith.constant 0 : index
    %c0_32 = arith.constant 0 : index
    %36 = vector.load %arg15[%c0_29, %c0_30, %c0_31, %c0_32] : memref<3x4x1x8xf32, #tpu.memory_space<vmem>>, vector<1x4x1x8xf32>
    %37 = vector.shape_cast %36 : vector<1x4x1x8xf32> to vector<4x1x8xf32>
    %c0_33 = arith.constant 0 : index
    %c0_34 = arith.constant 0 : index
    %c0_35 = arith.constant 0 : index
    %c0_36 = arith.constant 0 : index
    %38 = vector.load %arg16[%c0_33, %c0_34, %c0_35, %c0_36] : memref<3x4x32x8xf32, #tpu.memory_space<vmem>>, vector<1x4x32x8xf32>
    %39 = vector.shape_cast %38 : vector<1x4x32x8xf32> to vector<4x32x8xf32>
    %c0_37 = arith.constant 0 : index
    %c0_38 = arith.constant 0 : index
    %c0_39 = arith.constant 0 : index
    %c0_40 = arith.constant 0 : index
    %40 = vector.load %arg17[%c0_37, %c0_38, %c0_39, %c0_40] : memref<3x4x1x8xf32, #tpu.memory_space<vmem>>, vector<1x4x1x8xf32>
    %41 = vector.shape_cast %40 : vector<1x4x1x8xf32> to vector<4x1x8xf32>
    %c0_41 = arith.constant 0 : index
    %c0_42 = arith.constant 0 : index
    %c0_43 = arith.constant 0 : index
    %c0_44 = arith.constant 0 : index
    %42 = vector.load %arg18[%c0_41, %c0_42, %c0_43, %c0_44] : memref<3x4x8x32xf32, #tpu.memory_space<vmem>>, vector<1x4x8x32xf32>
    %43 = vector.shape_cast %42 : vector<1x4x8x32xf32> to vector<4x8x32xf32>
    %c0_45 = arith.constant 0 : index
    %c0_46 = arith.constant 0 : index
    %c0_47 = arith.constant 0 : index
    %44 = vector.load %arg19[%c0_45, %c0_46, %c0_47] : memref<3x1x32xf32, #tpu.memory_space<vmem>>, vector<1x1x32xf32>
    %45 = vector.shape_cast %44 : vector<1x1x32xf32> to vector<1x32xf32>
    %cst_48 = arith.constant 0.000000e+00 : f32
    %46 = vector.broadcast %cst_48 : f32 to vector<5x32xf32>
    %47 = vector.broadcast %45 : vector<1x32xf32> to vector<5x32xf32>
    %48 = arith.addf %46, %47 : vector<5x32xf32>
    %49 = vector.extract_strided_slice %31 {offsets = [0, 0, 0], sizes = [1, 32, 8], strides = [1, 1, 1]} : vector<4x32x8xf32> to vector<1x32x8xf32>
    %50 = vector.shape_cast %49 : vector<1x32x8xf32> to vector<32x8xf32>
    %cst_49 = arith.constant dense<0.000000e+00> : vector<5x8xf32>
    %51 = tpu.matmul %29, %50, %cst_49 {dimension_numbers = #tpu.dot_dimension_numbers<[1], [0], [0], [1], [0, 0, 1, 1], [], []>} : vector<5x32xf32>, vector<32x8xf32>, vector<5x8xf32> -> vector<5x8xf32>
    %52 = vector.extract_strided_slice %33 {offsets = [0, 0, 0], sizes = [1, 1, 8], strides = [1, 1, 1]} : vector<4x1x8xf32> to vector<1x1x8xf32>
    %53 = vector.shape_cast %52 : vector<1x1x8xf32> to vector<1x8xf32>
    %54 = vector.broadcast %53 : vector<1x8xf32> to vector<5x8xf32>
    %55 = arith.addf %51, %54 : vector<5x8xf32>
    %56 = vector.extract_strided_slice %35 {offsets = [0, 0, 0], sizes = [1, 32, 8], strides = [1, 1, 1]} : vector<4x32x8xf32> to vector<1x32x8xf32>
    %57 = vector.shape_cast %56 : vector<1x32x8xf32> to vector<32x8xf32>
    %cst_50 = arith.constant dense<0.000000e+00> : vector<5x8xf32>
    %58 = tpu.matmul %29, %57, %cst_50 {dimension_numbers = #tpu.dot_dimension_numbers<[1], [0], [0], [1], [0, 0, 1, 1], [], []>} : vector<5x32xf32>, vector<32x8xf32>, vector<5x8xf32> -> vector<5x8xf32>
    %59 = vector.extract_strided_slice %37 {offsets = [0, 0, 0], sizes = [1, 1, 8], strides = [1, 1, 1]} : vector<4x1x8xf32> to vector<1x1x8xf32>
    %60 = vector.shape_cast %59 : vector<1x1x8xf32> to vector<1x8xf32>
    %61 = vector.broadcast %60 : vector<1x8xf32> to vector<5x8xf32>
    %62 = arith.addf %58, %61 : vector<5x8xf32>
    %63 = vector.extract_strided_slice %39 {offsets = [0, 0, 0], sizes = [1, 32, 8], strides = [1, 1, 1]} : vector<4x32x8xf32> to vector<1x32x8xf32>
    %64 = vector.shape_cast %63 : vector<1x32x8xf32> to vector<32x8xf32>
    %cst_51 = arith.constant dense<0.000000e+00> : vector<5x8xf32>
    %65 = tpu.matmul %29, %64, %cst_51 {dimension_numbers = #tpu.dot_dimension_numbers<[1], [0], [0], [1], [0, 0, 1, 1], [], []>} : vector<5x32xf32>, vector<32x8xf32>, vector<5x8xf32> -> vector<5x8xf32>
    %66 = vector.extract_strided_slice %41 {offsets = [0, 0, 0], sizes = [1, 1, 8], strides = [1, 1, 1]} : vector<4x1x8xf32> to vector<1x1x8xf32>
    %67 = vector.shape_cast %66 : vector<1x1x8xf32> to vector<1x8xf32>
    %68 = vector.broadcast %67 : vector<1x8xf32> to vector<5x8xf32>
    %69 = arith.addf %65, %68 : vector<5x8xf32>
    %70 = tpu.transpose %62, [1, 0] : vector<5x8xf32> -> vector<8x5xf32>
    %cst_52 = arith.constant dense<0.000000e+00> : vector<5x5xf32>
    %71 = tpu.matmul %55, %70, %cst_52 {dimension_numbers = #tpu.dot_dimension_numbers<[1], [0], [0], [1], [0, 0, 1, 1], [], []>} : vector<5x8xf32>, vector<8x5xf32>, vector<5x5xf32> -> vector<5x5xf32>
    %cst_53 = arith.constant 0.353553385 : f32
    %72 = vector.broadcast %cst_53 : f32 to vector<5x5xf32>
    %73 = arith.mulf %71, %72 : vector<5x5xf32>
    %cst_54 = arith.constant dense<0xFF800000> : vector<5xf32>
    %74 = vector.multi_reduction <maximumf>, %73, %cst_54 [1] : vector<5x5xf32> to vector<5xf32>
    %75 = vector.shape_cast %74 : vector<5xf32> to vector<5x1xf32>
    %76 = vector.broadcast %75 : vector<5x1xf32> to vector<5x5xf32>
    %77 = arith.subf %73, %76 : vector<5x5xf32>
    %78 = math.exp %77 : vector<5x5xf32>
    %cst_55 = arith.constant dense<0.000000e+00> : vector<5xf32>
    %79 = vector.multi_reduction <add>, %78, %cst_55 [1] : vector<5x5xf32> to vector<5xf32>
    %80 = vector.shape_cast %79 : vector<5xf32> to vector<5x1xf32>
    %81 = tpu.reciprocal %80 {approx = true} : vector<5x1xf32> -> vector<5x1xf32>
    %cst_56 = arith.constant dense<0.000000e+00> : vector<5x8xf32>
    %82 = tpu.matmul %78, %69, %cst_56 {dimension_numbers = #tpu.dot_dimension_numbers<[1], [0], [0], [1], [0, 0, 1, 1], [], []>} : vector<5x5xf32>, vector<5x8xf32>, vector<5x8xf32> -> vector<5x8xf32>
    %83 = vector.broadcast %81 : vector<5x1xf32> to vector<5x8xf32>
    %84 = arith.mulf %82, %83 : vector<5x8xf32>
    %85 = vector.extract_strided_slice %43 {offsets = [0, 0, 0], sizes = [1, 8, 32], strides = [1, 1, 1]} : vector<4x8x32xf32> to vector<1x8x32xf32>
    %86 = vector.shape_cast %85 : vector<1x8x32xf32> to vector<8x32xf32>
    %cst_57 = arith.constant dense<0.000000e+00> : vector<5x32xf32>
    %87 = tpu.matmul %84, %86, %cst_57 {dimension_numbers = #tpu.dot_dimension_numbers<[1], [0], [0], [1], [0, 0, 1, 1], [], []>} : vector<5x8xf32>, vector<8x32xf32>, vector<5x32xf32> -> vector<5x32xf32>
    %88 = arith.addf %48, %87 : vector<5x32xf32>
    %89 = vector.extract_strided_slice %31 {offsets = [1, 0, 0], sizes = [1, 32, 8], strides = [1, 1, 1]} : vector<4x32x8xf32> to vector<1x32x8xf32>
    %90 = vector.shape_cast %89 : vector<1x32x8xf32> to vector<32x8xf32>
    %cst_58 = arith.constant dense<0.000000e+00> : vector<5x8xf32>
    %91 = tpu.matmul %29, %90, %cst_58 {dimension_numbers = #tpu.dot_dimension_numbers<[1], [0], [0], [1], [0, 0, 1, 1], [], []>} : vector<5x32xf32>, vector<32x8xf32>, vector<5x8xf32> -> vector<5x8xf32>
    %92 = vector.extract_strided_slice %33 {offsets = [1, 0, 0], sizes = [1, 1, 8], strides = [1, 1, 1]} : vector<4x1x8xf32> to vector<1x1x8xf32>
    %93 = vector.shape_cast %92 : vector<1x1x8xf32> to vector<1x8xf32>
    %94 = vector.broadcast %93 : vector<1x8xf32> to vector<5x8xf32>
    %95 = arith.addf %91, %94 : vector<5x8xf32>
    %96 = vector.extract_strided_slice %35 {offsets = [1, 0, 0], sizes = [1, 32, 8], strides = [1, 1, 1]} : vector<4x32x8xf32> to vector<1x32x8xf32>
    %97 = vector.shape_cast %96 : vector<1x32x8xf32> to vector<32x8xf32>
    %cst_59 = arith.constant dense<0.000000e+00> : vector<5x8xf32>
    %98 = tpu.matmul %29, %97, %cst_59 {dimension_numbers = #tpu.dot_dimension_numbers<[1], [0], [0], [1], [0, 0, 1, 1], [], []>} : vector<5x32xf32>, vector<32x8xf32>, vector<5x8xf32> -> vector<5x8xf32>
    %99 = vector.extract_strided_slice %37 {offsets = [1, 0, 0], sizes = [1, 1, 8], strides = [1, 1, 1]} : vector<4x1x8xf32> to vector<1x1x8xf32>
    %100 = vector.shape_cast %99 : vector<1x1x8xf32> to vector<1x8xf32>
    %101 = vector.broadcast %100 : vector<1x8xf32> to vector<5x8xf32>
    %102 = arith.addf %98, %101 : vector<5x8xf32>
    %103 = vector.extract_strided_slice %39 {offsets = [1, 0, 0], sizes = [1, 32, 8], strides = [1, 1, 1]} : vector<4x32x8xf32> to vector<1x32x8xf32>
    %104 = vector.shape_cast %103 : vector<1x32x8xf32> to vector<32x8xf32>
    %cst_60 = arith.constant dense<0.000000e+00> : vector<5x8xf32>
    %105 = tpu.matmul %29, %104, %cst_60 {dimension_numbers = #tpu.dot_dimension_numbers<[1], [0], [0], [1], [0, 0, 1, 1], [], []>} : vector<5x32xf32>, vector<32x8xf32>, vector<5x8xf32> -> vector<5x8xf32>
    %106 = vector.extract_strided_slice %41 {offsets = [1, 0, 0], sizes = [1, 1, 8], strides = [1, 1, 1]} : vector<4x1x8xf32> to vector<1x1x8xf32>
    %107 = vector.shape_cast %106 : vector<1x1x8xf32> to vector<1x8xf32>
    %108 = vector.broadcast %107 : vector<1x8xf32> to vector<5x8xf32>
    %109 = arith.addf %105, %108 : vector<5x8xf32>
    %110 = tpu.transpose %102, [1, 0] : vector<5x8xf32> -> vector<8x5xf32>
    %cst_61 = arith.constant dense<0.000000e+00> : vector<5x5xf32>
    %111 = tpu.matmul %95, %110, %cst_61 {dimension_numbers = #tpu.dot_dimension_numbers<[1], [0], [0], [1], [0, 0, 1, 1], [], []>} : vector<5x8xf32>, vector<8x5xf32>, vector<5x5xf32> -> vector<5x5xf32>
    %cst_62 = arith.constant 0.353553385 : f32
    %112 = vector.broadcast %cst_62 : f32 to vector<5x5xf32>
    %113 = arith.mulf %111, %112 : vector<5x5xf32>
    %cst_63 = arith.constant dense<0xFF800000> : vector<5xf32>
    %114 = vector.multi_reduction <maximumf>, %113, %cst_63 [1] : vector<5x5xf32> to vector<5xf32>
    %115 = vector.shape_cast %114 : vector<5xf32> to vector<5x1xf32>
    %116 = vector.broadcast %115 : vector<5x1xf32> to vector<5x5xf32>
    %117 = arith.subf %113, %116 : vector<5x5xf32>
    %118 = math.exp %117 : vector<5x5xf32>
    %cst_64 = arith.constant dense<0.000000e+00> : vector<5xf32>
    %119 = vector.multi_reduction <add>, %118, %cst_64 [1] : vector<5x5xf32> to vector<5xf32>
    %120 = vector.shape_cast %119 : vector<5xf32> to vector<5x1xf32>
    %121 = tpu.reciprocal %120 {approx = true} : vector<5x1xf32> -> vector<5x1xf32>
    %cst_65 = arith.constant dense<0.000000e+00> : vector<5x8xf32>
    %122 = tpu.matmul %118, %109, %cst_65 {dimension_numbers = #tpu.dot_dimension_numbers<[1], [0], [0], [1], [0, 0, 1, 1], [], []>} : vector<5x5xf32>, vector<5x8xf32>, vector<5x8xf32> -> vector<5x8xf32>
    %123 = vector.broadcast %121 : vector<5x1xf32> to vector<5x8xf32>
    %124 = arith.mulf %122, %123 : vector<5x8xf32>
    %125 = vector.extract_strided_slice %43 {offsets = [1, 0, 0], sizes = [1, 8, 32], strides = [1, 1, 1]} : vector<4x8x32xf32> to vector<1x8x32xf32>
    %126 = vector.shape_cast %125 : vector<1x8x32xf32> to vector<8x32xf32>
    %cst_66 = arith.constant dense<0.000000e+00> : vector<5x32xf32>
    %127 = tpu.matmul %124, %126, %cst_66 {dimension_numbers = #tpu.dot_dimension_numbers<[1], [0], [0], [1], [0, 0, 1, 1], [], []>} : vector<5x8xf32>, vector<8x32xf32>, vector<5x32xf32> -> vector<5x32xf32>
    %128 = arith.addf %88, %127 : vector<5x32xf32>
    %129 = vector.extract_strided_slice %31 {offsets = [2, 0, 0], sizes = [1, 32, 8], strides = [1, 1, 1]} : vector<4x32x8xf32> to vector<1x32x8xf32>
    %130 = vector.shape_cast %129 : vector<1x32x8xf32> to vector<32x8xf32>
    %cst_67 = arith.constant dense<0.000000e+00> : vector<5x8xf32>
    %131 = tpu.matmul %29, %130, %cst_67 {dimension_numbers = #tpu.dot_dimension_numbers<[1], [0], [0], [1], [0, 0, 1, 1], [], []>} : vector<5x32xf32>, vector<32x8xf32>, vector<5x8xf32> -> vector<5x8xf32>
    %132 = vector.extract_strided_slice %33 {offsets = [2, 0, 0], sizes = [1, 1, 8], strides = [1, 1, 1]} : vector<4x1x8xf32> to vector<1x1x8xf32>
    %133 = vector.shape_cast %132 : vector<1x1x8xf32> to vector<1x8xf32>
    %134 = vector.broadcast %133 : vector<1x8xf32> to vector<5x8xf32>
    %135 = arith.addf %131, %134 : vector<5x8xf32>
    %136 = vector.extract_strided_slice %35 {offsets = [2, 0, 0], sizes = [1, 32, 8], strides = [1, 1, 1]} : vector<4x32x8xf32> to vector<1x32x8xf32>
    %137 = vector.shape_cast %136 : vector<1x32x8xf32> to vector<32x8xf32>
    %cst_68 = arith.constant dense<0.000000e+00> : vector<5x8xf32>
    %138 = tpu.matmul %29, %137, %cst_68 {dimension_numbers = #tpu.dot_dimension_numbers<[1], [0], [0], [1], [0, 0, 1, 1], [], []>} : vector<5x32xf32>, vector<32x8xf32>, vector<5x8xf32> -> vector<5x8xf32>
    %139 = vector.extract_strided_slice %37 {offsets = [2, 0, 0], sizes = [1, 1, 8], strides = [1, 1, 1]} : vector<4x1x8xf32> to vector<1x1x8xf32>
    %140 = vector.shape_cast %139 : vector<1x1x8xf32> to vector<1x8xf32>
    %141 = vector.broadcast %140 : vector<1x8xf32> to vector<5x8xf32>
    %142 = arith.addf %138, %141 : vector<5x8xf32>
    %143 = vector.extract_strided_slice %39 {offsets = [2, 0, 0], sizes = [1, 32, 8], strides = [1, 1, 1]} : vector<4x32x8xf32> to vector<1x32x8xf32>
    %144 = vector.shape_cast %143 : vector<1x32x8xf32> to vector<32x8xf32>
    %cst_69 = arith.constant dense<0.000000e+00> : vector<5x8xf32>
    %145 = tpu.matmul %29, %144, %cst_69 {dimension_numbers = #tpu.dot_dimension_numbers<[1], [0], [0], [1], [0, 0, 1, 1], [], []>} : vector<5x32xf32>, vector<32x8xf32>, vector<5x8xf32> -> vector<5x8xf32>
    %146 = vector.extract_strided_slice %41 {offsets = [2, 0, 0], sizes = [1, 1, 8], strides = [1, 1, 1]} : vector<4x1x8xf32> to vector<1x1x8xf32>
    %147 = vector.shape_cast %146 : vector<1x1x8xf32> to vector<1x8xf32>
    %148 = vector.broadcast %147 : vector<1x8xf32> to vector<5x8xf32>
    %149 = arith.addf %145, %148 : vector<5x8xf32>
    %150 = tpu.transpose %142, [1, 0] : vector<5x8xf32> -> vector<8x5xf32>
    %cst_70 = arith.constant dense<0.000000e+00> : vector<5x5xf32>
    %151 = tpu.matmul %135, %150, %cst_70 {dimension_numbers = #tpu.dot_dimension_numbers<[1], [0], [0], [1], [0, 0, 1, 1], [], []>} : vector<5x8xf32>, vector<8x5xf32>, vector<5x5xf32> -> vector<5x5xf32>
    %cst_71 = arith.constant 0.353553385 : f32
    %152 = vector.broadcast %cst_71 : f32 to vector<5x5xf32>
    %153 = arith.mulf %151, %152 : vector<5x5xf32>
    %cst_72 = arith.constant dense<0xFF800000> : vector<5xf32>
    %154 = vector.multi_reduction <maximumf>, %153, %cst_72 [1] : vector<5x5xf32> to vector<5xf32>
    %155 = vector.shape_cast %154 : vector<5xf32> to vector<5x1xf32>
    %156 = vector.broadcast %155 : vector<5x1xf32> to vector<5x5xf32>
    %157 = arith.subf %153, %156 : vector<5x5xf32>
    %158 = math.exp %157 : vector<5x5xf32>
    %cst_73 = arith.constant dense<0.000000e+00> : vector<5xf32>
    %159 = vector.multi_reduction <add>, %158, %cst_73 [1] : vector<5x5xf32> to vector<5xf32>
    %160 = vector.shape_cast %159 : vector<5xf32> to vector<5x1xf32>
    %161 = tpu.reciprocal %160 {approx = true} : vector<5x1xf32> -> vector<5x1xf32>
    %cst_74 = arith.constant dense<0.000000e+00> : vector<5x8xf32>
    %162 = tpu.matmul %158, %149, %cst_74 {dimension_numbers = #tpu.dot_dimension_numbers<[1], [0], [0], [1], [0, 0, 1, 1], [], []>} : vector<5x5xf32>, vector<5x8xf32>, vector<5x8xf32> -> vector<5x8xf32>
    %163 = vector.broadcast %161 : vector<5x1xf32> to vector<5x8xf32>
    %164 = arith.mulf %162, %163 : vector<5x8xf32>
    %165 = vector.extract_strided_slice %43 {offsets = [2, 0, 0], sizes = [1, 8, 32], strides = [1, 1, 1]} : vector<4x8x32xf32> to vector<1x8x32xf32>
    %166 = vector.shape_cast %165 : vector<1x8x32xf32> to vector<8x32xf32>
    %cst_75 = arith.constant dense<0.000000e+00> : vector<5x32xf32>
    %167 = tpu.matmul %164, %166, %cst_75 {dimension_numbers = #tpu.dot_dimension_numbers<[1], [0], [0], [1], [0, 0, 1, 1], [], []>} : vector<5x8xf32>, vector<8x32xf32>, vector<5x32xf32> -> vector<5x32xf32>
    %168 = arith.addf %128, %167 : vector<5x32xf32>
    %169 = vector.extract_strided_slice %31 {offsets = [3, 0, 0], sizes = [1, 32, 8], strides = [1, 1, 1]} : vector<4x32x8xf32> to vector<1x32x8xf32>
    %170 = vector.shape_cast %169 : vector<1x32x8xf32> to vector<32x8xf32>
    %cst_76 = arith.constant dense<0.000000e+00> : vector<5x8xf32>
    %171 = tpu.matmul %29, %170, %cst_76 {dimension_numbers = #tpu.dot_dimension_numbers<[1], [0], [0], [1], [0, 0, 1, 1], [], []>} : vector<5x32xf32>, vector<32x8xf32>, vector<5x8xf32> -> vector<5x8xf32>
    %172 = vector.extract_strided_slice %33 {offsets = [3, 0, 0], sizes = [1, 1, 8], strides = [1, 1, 1]} : vector<4x1x8xf32> to vector<1x1x8xf32>
    %173 = vector.shape_cast %172 : vector<1x1x8xf32> to vector<1x8xf32>
    %174 = vector.broadcast %173 : vector<1x8xf32> to vector<5x8xf32>
    %175 = arith.addf %171, %174 : vector<5x8xf32>
    %176 = vector.extract_strided_slice %35 {offsets = [3, 0, 0], sizes = [1, 32, 8], strides = [1, 1, 1]} : vector<4x32x8xf32> to vector<1x32x8xf32>
    %177 = vector.shape_cast %176 : vector<1x32x8xf32> to vector<32x8xf32>
    %cst_77 = arith.constant dense<0.000000e+00> : vector<5x8xf32>
    %178 = tpu.matmul %29, %177, %cst_77 {dimension_numbers = #tpu.dot_dimension_numbers<[1], [0], [0], [1], [0, 0, 1, 1], [], []>} : vector<5x32xf32>, vector<32x8xf32>, vector<5x8xf32> -> vector<5x8xf32>
    %179 = vector.extract_strided_slice %37 {offsets = [3, 0, 0], sizes = [1, 1, 8], strides = [1, 1, 1]} : vector<4x1x8xf32> to vector<1x1x8xf32>
    %180 = vector.shape_cast %179 : vector<1x1x8xf32> to vector<1x8xf32>
    %181 = vector.broadcast %180 : vector<1x8xf32> to vector<5x8xf32>
    %182 = arith.addf %178, %181 : vector<5x8xf32>
    %183 = vector.extract_strided_slice %39 {offsets = [3, 0, 0], sizes = [1, 32, 8], strides = [1, 1, 1]} : vector<4x32x8xf32> to vector<1x32x8xf32>
    %184 = vector.shape_cast %183 : vector<1x32x8xf32> to vector<32x8xf32>
    %cst_78 = arith.constant dense<0.000000e+00> : vector<5x8xf32>
    %185 = tpu.matmul %29, %184, %cst_78 {dimension_numbers = #tpu.dot_dimension_numbers<[1], [0], [0], [1], [0, 0, 1, 1], [], []>} : vector<5x32xf32>, vector<32x8xf32>, vector<5x8xf32> -> vector<5x8xf32>
    %186 = vector.extract_strided_slice %41 {offsets = [3, 0, 0], sizes = [1, 1, 8], strides = [1, 1, 1]} : vector<4x1x8xf32> to vector<1x1x8xf32>
    %187 = vector.shape_cast %186 : vector<1x1x8xf32> to vector<1x8xf32>
    %188 = vector.broadcast %187 : vector<1x8xf32> to vector<5x8xf32>
    %189 = arith.addf %185, %188 : vector<5x8xf32>
    %190 = tpu.transpose %182, [1, 0] : vector<5x8xf32> -> vector<8x5xf32>
    %cst_79 = arith.constant dense<0.000000e+00> : vector<5x5xf32>
    %191 = tpu.matmul %175, %190, %cst_79 {dimension_numbers = #tpu.dot_dimension_numbers<[1], [0], [0], [1], [0, 0, 1, 1], [], []>} : vector<5x8xf32>, vector<8x5xf32>, vector<5x5xf32> -> vector<5x5xf32>
    %cst_80 = arith.constant 0.353553385 : f32
    %192 = vector.broadcast %cst_80 : f32 to vector<5x5xf32>
    %193 = arith.mulf %191, %192 : vector<5x5xf32>
    %cst_81 = arith.constant dense<0xFF800000> : vector<5xf32>
    %194 = vector.multi_reduction <maximumf>, %193, %cst_81 [1] : vector<5x5xf32> to vector<5xf32>
    %195 = vector.shape_cast %194 : vector<5xf32> to vector<5x1xf32>
    %196 = vector.broadcast %195 : vector<5x1xf32> to vector<5x5xf32>
    %197 = arith.subf %193, %196 : vector<5x5xf32>
    %198 = math.exp %197 : vector<5x5xf32>
    %cst_82 = arith.constant dense<0.000000e+00> : vector<5xf32>
    %199 = vector.multi_reduction <add>, %198, %cst_82 [1] : vector<5x5xf32> to vector<5xf32>
    %200 = vector.shape_cast %199 : vector<5xf32> to vector<5x1xf32>
    %201 = tpu.reciprocal %200 {approx = true} : vector<5x1xf32> -> vector<5x1xf32>
    %cst_83 = arith.constant dense<0.000000e+00> : vector<5x8xf32>
    %202 = tpu.matmul %198, %189, %cst_83 {dimension_numbers = #tpu.dot_dimension_numbers<[1], [0], [0], [1], [0, 0, 1, 1], [], []>} : vector<5x5xf32>, vector<5x8xf32>, vector<5x8xf32> -> vector<5x8xf32>
    %203 = vector.broadcast %201 : vector<5x1xf32> to vector<5x8xf32>
    %204 = arith.mulf %202, %203 : vector<5x8xf32>
    %205 = vector.extract_strided_slice %43 {offsets = [3, 0, 0], sizes = [1, 8, 32], strides = [1, 1, 1]} : vector<4x8x32xf32> to vector<1x8x32xf32>
    %206 = vector.shape_cast %205 : vector<1x8x32xf32> to vector<8x32xf32>
    %cst_84 = arith.constant dense<0.000000e+00> : vector<5x32xf32>
    %207 = tpu.matmul %204, %206, %cst_84 {dimension_numbers = #tpu.dot_dimension_numbers<[1], [0], [0], [1], [0, 0, 1, 1], [], []>} : vector<5x8xf32>, vector<8x32xf32>, vector<5x32xf32> -> vector<5x32xf32>
    %208 = arith.addf %168, %207 : vector<5x32xf32>
    %209 = arith.addf %5, %208 : vector<5x32xf32>
    %c1 = arith.constant 1 : index
    %c0_85 = arith.constant 0 : index
    %c0_86 = arith.constant 0 : index
    %210 = vector.load %arg10[%c1, %c0_85, %c0_86] : memref<7x1x32xf32, #tpu.memory_space<vmem>>, vector<1x1x32xf32>
    %211 = vector.shape_cast %210 : vector<1x1x32xf32> to vector<1x32xf32>
    %c1_87 = arith.constant 1 : index
    %c0_88 = arith.constant 0 : index
    %c0_89 = arith.constant 0 : index
    %212 = vector.load %arg11[%c1_87, %c0_88, %c0_89] : memref<7x1x32xf32, #tpu.memory_space<vmem>>, vector<1x1x32xf32>
    %213 = vector.shape_cast %212 : vector<1x1x32xf32> to vector<1x32xf32>
    %cst_90 = arith.constant dense<0.000000e+00> : vector<5xf32>
    %214 = vector.multi_reduction <add>, %209, %cst_90 [1] : vector<5x32xf32> to vector<5xf32>
    %215 = vector.shape_cast %214 : vector<5xf32> to vector<5x1xf32>
    %cst_91 = arith.constant 3.200000e+01 : f32
    %216 = vector.broadcast %cst_91 : f32 to vector<5x1xf32>
    %217 = arith.divf %215, %216 : vector<5x1xf32>
    %218 = vector.broadcast %217 : vector<5x1xf32> to vector<5x32xf32>
    %219 = arith.subf %209, %218 : vector<5x32xf32>
    %220 = arith.mulf %219, %219 : vector<5x32xf32>
    %cst_92 = arith.constant dense<0.000000e+00> : vector<5xf32>
    %221 = vector.multi_reduction <add>, %220, %cst_92 [1] : vector<5x32xf32> to vector<5xf32>
    %222 = vector.shape_cast %221 : vector<5xf32> to vector<5x1xf32>
    %cst_93 = arith.constant 3.200000e+01 : f32
    %223 = vector.broadcast %cst_93 : f32 to vector<5x1xf32>
    %224 = arith.divf %222, %223 : vector<5x1xf32>
    %cst_94 = arith.constant 9.99999974E-6 : f32
    %225 = vector.broadcast %cst_94 : f32 to vector<5x1xf32>
    %226 = arith.addf %224, %225 : vector<5x1xf32>
    %227 = math.rsqrt %226 : vector<5x1xf32>
    %228 = vector.broadcast %227 : vector<5x1xf32> to vector<5x32xf32>
    %229 = arith.mulf %219, %228 : vector<5x32xf32>
    %230 = vector.broadcast %211 : vector<1x32xf32> to vector<5x32xf32>
    %231 = arith.mulf %229, %230 : vector<5x32xf32>
    %232 = vector.broadcast %213 : vector<1x32xf32> to vector<5x32xf32>
    %233 = arith.addf %231, %232 : vector<5x32xf32>
    %c0_95 = arith.constant 0 : index
    %c0_96 = arith.constant 0 : index
    %c0_97 = arith.constant 0 : index
    %234 = vector.load %arg20[%c0_95, %c0_96, %c0_97] : memref<2x32x128xf32, #tpu.memory_space<vmem>>, vector<1x32x128xf32>
    %235 = vector.shape_cast %234 : vector<1x32x128xf32> to vector<32x128xf32>
    %c0_98 = arith.constant 0 : index
    %c0_99 = arith.constant 0 : index
    %c0_100 = arith.constant 0 : index
    %236 = vector.load %arg21[%c0_98, %c0_99, %c0_100] : memref<2x1x128xf32, #tpu.memory_space<vmem>>, vector<1x1x128xf32>
    %237 = vector.shape_cast %236 : vector<1x1x128xf32> to vector<1x128xf32>
    %c0_101 = arith.constant 0 : index
    %c0_102 = arith.constant 0 : index
    %c0_103 = arith.constant 0 : index
    %238 = vector.load %arg22[%c0_101, %c0_102, %c0_103] : memref<2x128x32xf32, #tpu.memory_space<vmem>>, vector<1x128x32xf32>
    %239 = vector.shape_cast %238 : vector<1x128x32xf32> to vector<128x32xf32>
    %c0_104 = arith.constant 0 : index
    %c0_105 = arith.constant 0 : index
    %c0_106 = arith.constant 0 : index
    %240 = vector.load %arg23[%c0_104, %c0_105, %c0_106] : memref<2x1x32xf32, #tpu.memory_space<vmem>>, vector<1x1x32xf32>
    %241 = vector.shape_cast %240 : vector<1x1x32xf32> to vector<1x32xf32>
    %cst_107 = arith.constant dense<0.000000e+00> : vector<5x128xf32>
    %242 = tpu.matmul %233, %235, %cst_107 {dimension_numbers = #tpu.dot_dimension_numbers<[1], [0], [0], [1], [0, 0, 1, 1], [], []>} : vector<5x32xf32>, vector<32x128xf32>, vector<5x128xf32> -> vector<5x128xf32>
    %243 = vector.broadcast %237 : vector<1x128xf32> to vector<5x128xf32>
    %244 = arith.addf %242, %243 : vector<5x128xf32>
    %245 = arith.mulf %244, %244 : vector<5x128xf32>
    %246 = arith.mulf %244, %245 : vector<5x128xf32>
    %cst_108 = arith.constant 4.471500e-02 : f32
    %247 = vector.broadcast %cst_108 : f32 to vector<5x128xf32>
    %248 = arith.mulf %247, %246 : vector<5x128xf32>
    %249 = arith.addf %244, %248 : vector<5x128xf32>
    %cst_109 = arith.constant 0.797884583 : f32
    %250 = vector.broadcast %cst_109 : f32 to vector<5x128xf32>
    %251 = arith.mulf %250, %249 : vector<5x128xf32>
    %252 = math.tanh %251 : vector<5x128xf32>
    %cst_110 = arith.constant 1.000000e+00 : f32
    %253 = vector.broadcast %cst_110 : f32 to vector<5x128xf32>
    %254 = arith.addf %253, %252 : vector<5x128xf32>
    %cst_111 = arith.constant 5.000000e-01 : f32
    %255 = vector.broadcast %cst_111 : f32 to vector<5x128xf32>
    %256 = arith.mulf %255, %254 : vector<5x128xf32>
    %257 = arith.mulf %244, %256 : vector<5x128xf32>
    %cst_112 = arith.constant dense<0.000000e+00> : vector<5x32xf32>
    %258 = tpu.matmul %257, %239, %cst_112 {dimension_numbers = #tpu.dot_dimension_numbers<[1], [0], [0], [1], [0, 0, 1, 1], [], []>} : vector<5x128xf32>, vector<128x32xf32>, vector<5x32xf32> -> vector<5x32xf32>
    %259 = vector.broadcast %241 : vector<1x32xf32> to vector<5x32xf32>
    %260 = arith.addf %258, %259 : vector<5x32xf32>
    %261 = arith.addf %209, %260 : vector<5x32xf32>
    %c2 = arith.constant 2 : index
    %c0_113 = arith.constant 0 : index
    %c0_114 = arith.constant 0 : index
    %262 = vector.load %arg10[%c2, %c0_113, %c0_114] : memref<7x1x32xf32, #tpu.memory_space<vmem>>, vector<1x1x32xf32>
    %263 = vector.shape_cast %262 : vector<1x1x32xf32> to vector<1x32xf32>
    %c2_115 = arith.constant 2 : index
    %c0_116 = arith.constant 0 : index
    %c0_117 = arith.constant 0 : index
    %264 = vector.load %arg11[%c2_115, %c0_116, %c0_117] : memref<7x1x32xf32, #tpu.memory_space<vmem>>, vector<1x1x32xf32>
    %265 = vector.shape_cast %264 : vector<1x1x32xf32> to vector<1x32xf32>
    %cst_118 = arith.constant dense<0.000000e+00> : vector<5xf32>
    %266 = vector.multi_reduction <add>, %261, %cst_118 [1] : vector<5x32xf32> to vector<5xf32>
    %267 = vector.shape_cast %266 : vector<5xf32> to vector<5x1xf32>
    %cst_119 = arith.constant 3.200000e+01 : f32
    %268 = vector.broadcast %cst_119 : f32 to vector<5x1xf32>
    %269 = arith.divf %267, %268 : vector<5x1xf32>
    %270 = vector.broadcast %269 : vector<5x1xf32> to vector<5x32xf32>
    %271 = arith.subf %261, %270 : vector<5x32xf32>
    %272 = arith.mulf %271, %271 : vector<5x32xf32>
    %cst_120 = arith.constant dense<0.000000e+00> : vector<5xf32>
    %273 = vector.multi_reduction <add>, %272, %cst_120 [1] : vector<5x32xf32> to vector<5xf32>
    %274 = vector.shape_cast %273 : vector<5xf32> to vector<5x1xf32>
    %cst_121 = arith.constant 3.200000e+01 : f32
    %275 = vector.broadcast %cst_121 : f32 to vector<5x1xf32>
    %276 = arith.divf %274, %275 : vector<5x1xf32>
    %cst_122 = arith.constant 9.99999974E-6 : f32
    %277 = vector.broadcast %cst_122 : f32 to vector<5x1xf32>
    %278 = arith.addf %276, %277 : vector<5x1xf32>
    %279 = math.rsqrt %278 : vector<5x1xf32>
    %280 = vector.broadcast %279 : vector<5x1xf32> to vector<5x32xf32>
    %281 = arith.mulf %271, %280 : vector<5x32xf32>
    %282 = vector.broadcast %263 : vector<1x32xf32> to vector<5x32xf32>
    %283 = arith.mulf %281, %282 : vector<5x32xf32>
    %284 = vector.broadcast %265 : vector<1x32xf32> to vector<5x32xf32>
    %285 = arith.addf %283, %284 : vector<5x32xf32>
    %c0_123 = arith.constant 0 : index
    %c0_124 = arith.constant 0 : index
    %286 = vector.load %arg6[%c0_123, %c0_124] : memref<9x32xf32, #tpu.memory_space<vmem>>, vector<9x32xf32>
    %c0_125 = arith.constant 0 : index
    %c0_126 = arith.constant 0 : index
    %287 = vector.load %arg7[%c0_125, %c0_126] : memref<9x5xf32, #tpu.memory_space<vmem>>, vector<9x5xf32>
    %cst_127 = arith.constant dense<0.000000e+00> : vector<9x32xf32>
    %288 = tpu.matmul %287, %285, %cst_127 {dimension_numbers = #tpu.dot_dimension_numbers<[1], [0], [0], [1], [0, 0, 1, 1], [], []>} : vector<9x5xf32>, vector<5x32xf32>, vector<9x32xf32> -> vector<9x32xf32>
    %289 = arith.addf %286, %288 : vector<9x32xf32>
    %c0_128 = arith.constant 0 : index
    %c0_129 = arith.constant 0 : index
    %c0_130 = arith.constant 0 : index
    %290 = vector.load %arg2[%c0_128, %c0_129, %c0_130] : memref<1x8x1xi32, #tpu.memory_space<vmem>>, vector<1x8x1xi32>
    %291 = vector.shape_cast %290 : vector<1x8x1xi32> to vector<8x1xi32>
    %292 = tpu.iota {dimensions = array<i32: 1>} : vector<8x64xi32>
    %293 = vector.broadcast %291 : vector<8x1xi32> to vector<8x64xi32>
    %294 = arith.cmpi eq, %292, %293 : vector<8x64xi32>
    %295 = arith.extui %294 : vector<8x64xi1> to vector<8x64xi32>
    %296 = arith.sitofp %295 : vector<8x64xi32> to vector<8x64xf32>
    %c0_131 = arith.constant 0 : index
    %c0_132 = arith.constant 0 : index
    %297 = vector.load %arg8[%c0_131, %c0_132] : memref<64x32xf32, #tpu.memory_space<vmem>>, vector<64x32xf32>
    %cst_133 = arith.constant dense<0.000000e+00> : vector<8x32xf32>
    %298 = tpu.matmul %296, %297, %cst_133 {dimension_numbers = #tpu.dot_dimension_numbers<[1], [0], [0], [1], [0, 0, 1, 1], [], []>} : vector<8x64xf32>, vector<64x32xf32>, vector<8x32xf32> -> vector<8x32xf32>
    %c0_134 = arith.constant 0 : index
    %c0_135 = arith.constant 0 : index
    %299 = vector.load %arg9[%c0_134, %c0_135] : memref<8x32xf32, #tpu.memory_space<vmem>>, vector<8x32xf32>
    %300 = arith.addf %298, %299 : vector<8x32xf32>
    %301 = tpu.iota {dimensions = array<i32: 0>} : vector<8x8xi32>
    %302 = tpu.iota {dimensions = array<i32: 1>} : vector<8x8xi32>
    %303 = arith.cmpi sle, %302, %301 : vector<8x8xi32>
    %c0_136 = arith.constant 0 : index
    %c0_137 = arith.constant 0 : index
    %c0_138 = arith.constant 0 : index
    %304 = vector.load %arg3[%c0_136, %c0_137, %c0_138] : memref<1x1x8xf32, #tpu.memory_space<vmem>>, vector<1x1x8xf32>
    %305 = vector.shape_cast %304 : vector<1x1x8xf32> to vector<1x8xf32>
    %cst_139 = arith.constant 5.000000e-01 : f32
    %306 = vector.broadcast %cst_139 : f32 to vector<1x8xf32>
    %307 = arith.cmpf ogt, %305, %306 : vector<1x8xf32>
    %308 = vector.broadcast %307 : vector<1x8xi1> to vector<8x8xi1>
    %309 = arith.andi %303, %308 : vector<8x8xi1>
    %cst_140 = arith.constant 0.000000e+00 : f32
    %cst_141 = arith.constant -1.000000e+09 : f32
    %310 = vector.broadcast %cst_140 : f32 to vector<8x8xf32>
    %311 = vector.broadcast %cst_141 : f32 to vector<8x8xf32>
    %312 = arith.select %309, %310, %311 : vector<8x8xi1>, vector<8x8xf32>
    %c3 = arith.constant 3 : index
    %c0_142 = arith.constant 0 : index
    %c0_143 = arith.constant 0 : index
    %313 = vector.load %arg10[%c3, %c0_142, %c0_143] : memref<7x1x32xf32, #tpu.memory_space<vmem>>, vector<1x1x32xf32>
    %314 = vector.shape_cast %313 : vector<1x1x32xf32> to vector<1x32xf32>
    %c3_144 = arith.constant 3 : index
    %c0_145 = arith.constant 0 : index
    %c0_146 = arith.constant 0 : index
    %315 = vector.load %arg11[%c3_144, %c0_145, %c0_146] : memref<7x1x32xf32, #tpu.memory_space<vmem>>, vector<1x1x32xf32>
    %316 = vector.shape_cast %315 : vector<1x1x32xf32> to vector<1x32xf32>
    %cst_147 = arith.constant dense<0.000000e+00> : vector<8xf32>
    %317 = vector.multi_reduction <add>, %300, %cst_147 [1] : vector<8x32xf32> to vector<8xf32>
    %318 = vector.shape_cast %317 : vector<8xf32> to vector<8x1xf32>
    %cst_148 = arith.constant 3.200000e+01 : f32
    %319 = vector.broadcast %cst_148 : f32 to vector<8x1xf32>
    %320 = arith.divf %318, %319 : vector<8x1xf32>
    %321 = vector.broadcast %320 : vector<8x1xf32> to vector<8x32xf32>
    %322 = arith.subf %300, %321 : vector<8x32xf32>
    %323 = arith.mulf %322, %322 : vector<8x32xf32>
    %cst_149 = arith.constant dense<0.000000e+00> : vector<8xf32>
    %324 = vector.multi_reduction <add>, %323, %cst_149 [1] : vector<8x32xf32> to vector<8xf32>
    %325 = vector.shape_cast %324 : vector<8xf32> to vector<8x1xf32>
    %cst_150 = arith.constant 3.200000e+01 : f32
    %326 = vector.broadcast %cst_150 : f32 to vector<8x1xf32>
    %327 = arith.divf %325, %326 : vector<8x1xf32>
    %cst_151 = arith.constant 9.99999974E-6 : f32
    %328 = vector.broadcast %cst_151 : f32 to vector<8x1xf32>
    %329 = arith.addf %327, %328 : vector<8x1xf32>
    %330 = math.rsqrt %329 : vector<8x1xf32>
    %331 = vector.broadcast %330 : vector<8x1xf32> to vector<8x32xf32>
    %332 = arith.mulf %322, %331 : vector<8x32xf32>
    %333 = vector.broadcast %314 : vector<1x32xf32> to vector<8x32xf32>
    %334 = arith.mulf %332, %333 : vector<8x32xf32>
    %335 = vector.broadcast %316 : vector<1x32xf32> to vector<8x32xf32>
    %336 = arith.addf %334, %335 : vector<8x32xf32>
    %c1_152 = arith.constant 1 : index
    %c0_153 = arith.constant 0 : index
    %c0_154 = arith.constant 0 : index
    %c0_155 = arith.constant 0 : index
    %337 = vector.load %arg12[%c1_152, %c0_153, %c0_154, %c0_155] : memref<3x4x32x8xf32, #tpu.memory_space<vmem>>, vector<1x4x32x8xf32>
    %338 = vector.shape_cast %337 : vector<1x4x32x8xf32> to vector<4x32x8xf32>
    %c1_156 = arith.constant 1 : index
    %c0_157 = arith.constant 0 : index
    %c0_158 = arith.constant 0 : index
    %c0_159 = arith.constant 0 : index
    %339 = vector.load %arg13[%c1_156, %c0_157, %c0_158, %c0_159] : memref<3x4x1x8xf32, #tpu.memory_space<vmem>>, vector<1x4x1x8xf32>
    %340 = vector.shape_cast %339 : vector<1x4x1x8xf32> to vector<4x1x8xf32>
    %c1_160 = arith.constant 1 : index
    %c0_161 = arith.constant 0 : index
    %c0_162 = arith.constant 0 : index
    %c0_163 = arith.constant 0 : index
    %341 = vector.load %arg14[%c1_160, %c0_161, %c0_162, %c0_163] : memref<3x4x32x8xf32, #tpu.memory_space<vmem>>, vector<1x4x32x8xf32>
    %342 = vector.shape_cast %341 : vector<1x4x32x8xf32> to vector<4x32x8xf32>
    %c1_164 = arith.constant 1 : index
    %c0_165 = arith.constant 0 : index
    %c0_166 = arith.constant 0 : index
    %c0_167 = arith.constant 0 : index
    %343 = vector.load %arg15[%c1_164, %c0_165, %c0_166, %c0_167] : memref<3x4x1x8xf32, #tpu.memory_space<vmem>>, vector<1x4x1x8xf32>
    %344 = vector.shape_cast %343 : vector<1x4x1x8xf32> to vector<4x1x8xf32>
    %c1_168 = arith.constant 1 : index
    %c0_169 = arith.constant 0 : index
    %c0_170 = arith.constant 0 : index
    %c0_171 = arith.constant 0 : index
    %345 = vector.load %arg16[%c1_168, %c0_169, %c0_170, %c0_171] : memref<3x4x32x8xf32, #tpu.memory_space<vmem>>, vector<1x4x32x8xf32>
    %346 = vector.shape_cast %345 : vector<1x4x32x8xf32> to vector<4x32x8xf32>
    %c1_172 = arith.constant 1 : index
    %c0_173 = arith.constant 0 : index
    %c0_174 = arith.constant 0 : index
    %c0_175 = arith.constant 0 : index
    %347 = vector.load %arg17[%c1_172, %c0_173, %c0_174, %c0_175] : memref<3x4x1x8xf32, #tpu.memory_space<vmem>>, vector<1x4x1x8xf32>
    %348 = vector.shape_cast %347 : vector<1x4x1x8xf32> to vector<4x1x8xf32>
    %c1_176 = arith.constant 1 : index
    %c0_177 = arith.constant 0 : index
    %c0_178 = arith.constant 0 : index
    %c0_179 = arith.constant 0 : index
    %349 = vector.load %arg18[%c1_176, %c0_177, %c0_178, %c0_179] : memref<3x4x8x32xf32, #tpu.memory_space<vmem>>, vector<1x4x8x32xf32>
    %350 = vector.shape_cast %349 : vector<1x4x8x32xf32> to vector<4x8x32xf32>
    %c1_180 = arith.constant 1 : index
    %c0_181 = arith.constant 0 : index
    %c0_182 = arith.constant 0 : index
    %351 = vector.load %arg19[%c1_180, %c0_181, %c0_182] : memref<3x1x32xf32, #tpu.memory_space<vmem>>, vector<1x1x32xf32>
    %352 = vector.shape_cast %351 : vector<1x1x32xf32> to vector<1x32xf32>
    %cst_183 = arith.constant 0.000000e+00 : f32
    %353 = vector.broadcast %cst_183 : f32 to vector<8x32xf32>
    %354 = vector.broadcast %352 : vector<1x32xf32> to vector<8x32xf32>
    %355 = arith.addf %353, %354 : vector<8x32xf32>
    %356 = vector.extract_strided_slice %338 {offsets = [0, 0, 0], sizes = [1, 32, 8], strides = [1, 1, 1]} : vector<4x32x8xf32> to vector<1x32x8xf32>
    %357 = vector.shape_cast %356 : vector<1x32x8xf32> to vector<32x8xf32>
    %cst_184 = arith.constant dense<0.000000e+00> : vector<8x8xf32>
    %358 = tpu.matmul %336, %357, %cst_184 {dimension_numbers = #tpu.dot_dimension_numbers<[1], [0], [0], [1], [0, 0, 1, 1], [], []>} : vector<8x32xf32>, vector<32x8xf32>, vector<8x8xf32> -> vector<8x8xf32>
    %359 = vector.extract_strided_slice %340 {offsets = [0, 0, 0], sizes = [1, 1, 8], strides = [1, 1, 1]} : vector<4x1x8xf32> to vector<1x1x8xf32>
    %360 = vector.shape_cast %359 : vector<1x1x8xf32> to vector<1x8xf32>
    %361 = vector.broadcast %360 : vector<1x8xf32> to vector<8x8xf32>
    %362 = arith.addf %358, %361 : vector<8x8xf32>
    %363 = vector.extract_strided_slice %342 {offsets = [0, 0, 0], sizes = [1, 32, 8], strides = [1, 1, 1]} : vector<4x32x8xf32> to vector<1x32x8xf32>
    %364 = vector.shape_cast %363 : vector<1x32x8xf32> to vector<32x8xf32>
    %cst_185 = arith.constant dense<0.000000e+00> : vector<8x8xf32>
    %365 = tpu.matmul %336, %364, %cst_185 {dimension_numbers = #tpu.dot_dimension_numbers<[1], [0], [0], [1], [0, 0, 1, 1], [], []>} : vector<8x32xf32>, vector<32x8xf32>, vector<8x8xf32> -> vector<8x8xf32>
    %366 = vector.extract_strided_slice %344 {offsets = [0, 0, 0], sizes = [1, 1, 8], strides = [1, 1, 1]} : vector<4x1x8xf32> to vector<1x1x8xf32>
    %367 = vector.shape_cast %366 : vector<1x1x8xf32> to vector<1x8xf32>
    %368 = vector.broadcast %367 : vector<1x8xf32> to vector<8x8xf32>
    %369 = arith.addf %365, %368 : vector<8x8xf32>
    %370 = vector.extract_strided_slice %346 {offsets = [0, 0, 0], sizes = [1, 32, 8], strides = [1, 1, 1]} : vector<4x32x8xf32> to vector<1x32x8xf32>
    %371 = vector.shape_cast %370 : vector<1x32x8xf32> to vector<32x8xf32>
    %cst_186 = arith.constant dense<0.000000e+00> : vector<8x8xf32>
    %372 = tpu.matmul %336, %371, %cst_186 {dimension_numbers = #tpu.dot_dimension_numbers<[1], [0], [0], [1], [0, 0, 1, 1], [], []>} : vector<8x32xf32>, vector<32x8xf32>, vector<8x8xf32> -> vector<8x8xf32>
    %373 = vector.extract_strided_slice %348 {offsets = [0, 0, 0], sizes = [1, 1, 8], strides = [1, 1, 1]} : vector<4x1x8xf32> to vector<1x1x8xf32>
    %374 = vector.shape_cast %373 : vector<1x1x8xf32> to vector<1x8xf32>
    %375 = vector.broadcast %374 : vector<1x8xf32> to vector<8x8xf32>
    %376 = arith.addf %372, %375 : vector<8x8xf32>
    %377 = tpu.transpose %369, [1, 0] : vector<8x8xf32> -> vector<8x8xf32>
    %cst_187 = arith.constant dense<0.000000e+00> : vector<8x8xf32>
    %378 = tpu.matmul %362, %377, %cst_187 {dimension_numbers = #tpu.dot_dimension_numbers<[1], [0], [0], [1], [0, 0, 1, 1], [], []>} : vector<8x8xf32>, vector<8x8xf32>, vector<8x8xf32> -> vector<8x8xf32>
    %cst_188 = arith.constant 0.353553385 : f32
    %379 = vector.broadcast %cst_188 : f32 to vector<8x8xf32>
    %380 = arith.mulf %378, %379 : vector<8x8xf32>
    %381 = arith.addf %380, %312 : vector<8x8xf32>
    %cst_189 = arith.constant dense<0xFF800000> : vector<8xf32>
    %382 = vector.multi_reduction <maximumf>, %381, %cst_189 [1] : vector<8x8xf32> to vector<8xf32>
    %383 = vector.shape_cast %382 : vector<8xf32> to vector<8x1xf32>
    %384 = vector.broadcast %383 : vector<8x1xf32> to vector<8x8xf32>
    %385 = arith.subf %381, %384 : vector<8x8xf32>
    %386 = math.exp %385 : vector<8x8xf32>
    %cst_190 = arith.constant dense<0.000000e+00> : vector<8xf32>
    %387 = vector.multi_reduction <add>, %386, %cst_190 [1] : vector<8x8xf32> to vector<8xf32>
    %388 = vector.shape_cast %387 : vector<8xf32> to vector<8x1xf32>
    %389 = tpu.reciprocal %388 {approx = true} : vector<8x1xf32> -> vector<8x1xf32>
    %cst_191 = arith.constant dense<0.000000e+00> : vector<8x8xf32>
    %390 = tpu.matmul %386, %376, %cst_191 {dimension_numbers = #tpu.dot_dimension_numbers<[1], [0], [0], [1], [0, 0, 1, 1], [], []>} : vector<8x8xf32>, vector<8x8xf32>, vector<8x8xf32> -> vector<8x8xf32>
    %391 = vector.broadcast %389 : vector<8x1xf32> to vector<8x8xf32>
    %392 = arith.mulf %390, %391 : vector<8x8xf32>
    %393 = vector.extract_strided_slice %350 {offsets = [0, 0, 0], sizes = [1, 8, 32], strides = [1, 1, 1]} : vector<4x8x32xf32> to vector<1x8x32xf32>
    %394 = vector.shape_cast %393 : vector<1x8x32xf32> to vector<8x32xf32>
    %cst_192 = arith.constant dense<0.000000e+00> : vector<8x32xf32>
    %395 = tpu.matmul %392, %394, %cst_192 {dimension_numbers = #tpu.dot_dimension_numbers<[1], [0], [0], [1], [0, 0, 1, 1], [], []>} : vector<8x8xf32>, vector<8x32xf32>, vector<8x32xf32> -> vector<8x32xf32>
    %396 = arith.addf %355, %395 : vector<8x32xf32>
    %397 = vector.extract_strided_slice %338 {offsets = [1, 0, 0], sizes = [1, 32, 8], strides = [1, 1, 1]} : vector<4x32x8xf32> to vector<1x32x8xf32>
    %398 = vector.shape_cast %397 : vector<1x32x8xf32> to vector<32x8xf32>
    %cst_193 = arith.constant dense<0.000000e+00> : vector<8x8xf32>
    %399 = tpu.matmul %336, %398, %cst_193 {dimension_numbers = #tpu.dot_dimension_numbers<[1], [0], [0], [1], [0, 0, 1, 1], [], []>} : vector<8x32xf32>, vector<32x8xf32>, vector<8x8xf32> -> vector<8x8xf32>
    %400 = vector.extract_strided_slice %340 {offsets = [1, 0, 0], sizes = [1, 1, 8], strides = [1, 1, 1]} : vector<4x1x8xf32> to vector<1x1x8xf32>
    %401 = vector.shape_cast %400 : vector<1x1x8xf32> to vector<1x8xf32>
    %402 = vector.broadcast %401 : vector<1x8xf32> to vector<8x8xf32>
    %403 = arith.addf %399, %402 : vector<8x8xf32>
    %404 = vector.extract_strided_slice %342 {offsets = [1, 0, 0], sizes = [1, 32, 8], strides = [1, 1, 1]} : vector<4x32x8xf32> to vector<1x32x8xf32>
    %405 = vector.shape_cast %404 : vector<1x32x8xf32> to vector<32x8xf32>
    %cst_194 = arith.constant dense<0.000000e+00> : vector<8x8xf32>
    %406 = tpu.matmul %336, %405, %cst_194 {dimension_numbers = #tpu.dot_dimension_numbers<[1], [0], [0], [1], [0, 0, 1, 1], [], []>} : vector<8x32xf32>, vector<32x8xf32>, vector<8x8xf32> -> vector<8x8xf32>
    %407 = vector.extract_strided_slice %344 {offsets = [1, 0, 0], sizes = [1, 1, 8], strides = [1, 1, 1]} : vector<4x1x8xf32> to vector<1x1x8xf32>
    %408 = vector.shape_cast %407 : vector<1x1x8xf32> to vector<1x8xf32>
    %409 = vector.broadcast %408 : vector<1x8xf32> to vector<8x8xf32>
    %410 = arith.addf %406, %409 : vector<8x8xf32>
    %411 = vector.extract_strided_slice %346 {offsets = [1, 0, 0], sizes = [1, 32, 8], strides = [1, 1, 1]} : vector<4x32x8xf32> to vector<1x32x8xf32>
    %412 = vector.shape_cast %411 : vector<1x32x8xf32> to vector<32x8xf32>
    %cst_195 = arith.constant dense<0.000000e+00> : vector<8x8xf32>
    %413 = tpu.matmul %336, %412, %cst_195 {dimension_numbers = #tpu.dot_dimension_numbers<[1], [0], [0], [1], [0, 0, 1, 1], [], []>} : vector<8x32xf32>, vector<32x8xf32>, vector<8x8xf32> -> vector<8x8xf32>
    %414 = vector.extract_strided_slice %348 {offsets = [1, 0, 0], sizes = [1, 1, 8], strides = [1, 1, 1]} : vector<4x1x8xf32> to vector<1x1x8xf32>
    %415 = vector.shape_cast %414 : vector<1x1x8xf32> to vector<1x8xf32>
    %416 = vector.broadcast %415 : vector<1x8xf32> to vector<8x8xf32>
    %417 = arith.addf %413, %416 : vector<8x8xf32>
    %418 = tpu.transpose %410, [1, 0] : vector<8x8xf32> -> vector<8x8xf32>
    %cst_196 = arith.constant dense<0.000000e+00> : vector<8x8xf32>
    %419 = tpu.matmul %403, %418, %cst_196 {dimension_numbers = #tpu.dot_dimension_numbers<[1], [0], [0], [1], [0, 0, 1, 1], [], []>} : vector<8x8xf32>, vector<8x8xf32>, vector<8x8xf32> -> vector<8x8xf32>
    %cst_197 = arith.constant 0.353553385 : f32
    %420 = vector.broadcast %cst_197 : f32 to vector<8x8xf32>
    %421 = arith.mulf %419, %420 : vector<8x8xf32>
    %422 = arith.addf %421, %312 : vector<8x8xf32>
    %cst_198 = arith.constant dense<0xFF800000> : vector<8xf32>
    %423 = vector.multi_reduction <maximumf>, %422, %cst_198 [1] : vector<8x8xf32> to vector<8xf32>
    %424 = vector.shape_cast %423 : vector<8xf32> to vector<8x1xf32>
    %425 = vector.broadcast %424 : vector<8x1xf32> to vector<8x8xf32>
    %426 = arith.subf %422, %425 : vector<8x8xf32>
    %427 = math.exp %426 : vector<8x8xf32>
    %cst_199 = arith.constant dense<0.000000e+00> : vector<8xf32>
    %428 = vector.multi_reduction <add>, %427, %cst_199 [1] : vector<8x8xf32> to vector<8xf32>
    %429 = vector.shape_cast %428 : vector<8xf32> to vector<8x1xf32>
    %430 = tpu.reciprocal %429 {approx = true} : vector<8x1xf32> -> vector<8x1xf32>
    %cst_200 = arith.constant dense<0.000000e+00> : vector<8x8xf32>
    %431 = tpu.matmul %427, %417, %cst_200 {dimension_numbers = #tpu.dot_dimension_numbers<[1], [0], [0], [1], [0, 0, 1, 1], [], []>} : vector<8x8xf32>, vector<8x8xf32>, vector<8x8xf32> -> vector<8x8xf32>
    %432 = vector.broadcast %430 : vector<8x1xf32> to vector<8x8xf32>
    %433 = arith.mulf %431, %432 : vector<8x8xf32>
    %434 = vector.extract_strided_slice %350 {offsets = [1, 0, 0], sizes = [1, 8, 32], strides = [1, 1, 1]} : vector<4x8x32xf32> to vector<1x8x32xf32>
    %435 = vector.shape_cast %434 : vector<1x8x32xf32> to vector<8x32xf32>
    %cst_201 = arith.constant dense<0.000000e+00> : vector<8x32xf32>
    %436 = tpu.matmul %433, %435, %cst_201 {dimension_numbers = #tpu.dot_dimension_numbers<[1], [0], [0], [1], [0, 0, 1, 1], [], []>} : vector<8x8xf32>, vector<8x32xf32>, vector<8x32xf32> -> vector<8x32xf32>
    %437 = arith.addf %396, %436 : vector<8x32xf32>
    %438 = vector.extract_strided_slice %338 {offsets = [2, 0, 0], sizes = [1, 32, 8], strides = [1, 1, 1]} : vector<4x32x8xf32> to vector<1x32x8xf32>
    %439 = vector.shape_cast %438 : vector<1x32x8xf32> to vector<32x8xf32>
    %cst_202 = arith.constant dense<0.000000e+00> : vector<8x8xf32>
    %440 = tpu.matmul %336, %439, %cst_202 {dimension_numbers = #tpu.dot_dimension_numbers<[1], [0], [0], [1], [0, 0, 1, 1], [], []>} : vector<8x32xf32>, vector<32x8xf32>, vector<8x8xf32> -> vector<8x8xf32>
    %441 = vector.extract_strided_slice %340 {offsets = [2, 0, 0], sizes = [1, 1, 8], strides = [1, 1, 1]} : vector<4x1x8xf32> to vector<1x1x8xf32>
    %442 = vector.shape_cast %441 : vector<1x1x8xf32> to vector<1x8xf32>
    %443 = vector.broadcast %442 : vector<1x8xf32> to vector<8x8xf32>
    %444 = arith.addf %440, %443 : vector<8x8xf32>
    %445 = vector.extract_strided_slice %342 {offsets = [2, 0, 0], sizes = [1, 32, 8], strides = [1, 1, 1]} : vector<4x32x8xf32> to vector<1x32x8xf32>
    %446 = vector.shape_cast %445 : vector<1x32x8xf32> to vector<32x8xf32>
    %cst_203 = arith.constant dense<0.000000e+00> : vector<8x8xf32>
    %447 = tpu.matmul %336, %446, %cst_203 {dimension_numbers = #tpu.dot_dimension_numbers<[1], [0], [0], [1], [0, 0, 1, 1], [], []>} : vector<8x32xf32>, vector<32x8xf32>, vector<8x8xf32> -> vector<8x8xf32>
    %448 = vector.extract_strided_slice %344 {offsets = [2, 0, 0], sizes = [1, 1, 8], strides = [1, 1, 1]} : vector<4x1x8xf32> to vector<1x1x8xf32>
    %449 = vector.shape_cast %448 : vector<1x1x8xf32> to vector<1x8xf32>
    %450 = vector.broadcast %449 : vector<1x8xf32> to vector<8x8xf32>
    %451 = arith.addf %447, %450 : vector<8x8xf32>
    %452 = vector.extract_strided_slice %346 {offsets = [2, 0, 0], sizes = [1, 32, 8], strides = [1, 1, 1]} : vector<4x32x8xf32> to vector<1x32x8xf32>
    %453 = vector.shape_cast %452 : vector<1x32x8xf32> to vector<32x8xf32>
    %cst_204 = arith.constant dense<0.000000e+00> : vector<8x8xf32>
    %454 = tpu.matmul %336, %453, %cst_204 {dimension_numbers = #tpu.dot_dimension_numbers<[1], [0], [0], [1], [0, 0, 1, 1], [], []>} : vector<8x32xf32>, vector<32x8xf32>, vector<8x8xf32> -> vector<8x8xf32>
    %455 = vector.extract_strided_slice %348 {offsets = [2, 0, 0], sizes = [1, 1, 8], strides = [1, 1, 1]} : vector<4x1x8xf32> to vector<1x1x8xf32>
    %456 = vector.shape_cast %455 : vector<1x1x8xf32> to vector<1x8xf32>
    %457 = vector.broadcast %456 : vector<1x8xf32> to vector<8x8xf32>
    %458 = arith.addf %454, %457 : vector<8x8xf32>
    %459 = tpu.transpose %451, [1, 0] : vector<8x8xf32> -> vector<8x8xf32>
    %cst_205 = arith.constant dense<0.000000e+00> : vector<8x8xf32>
    %460 = tpu.matmul %444, %459, %cst_205 {dimension_numbers = #tpu.dot_dimension_numbers<[1], [0], [0], [1], [0, 0, 1, 1], [], []>} : vector<8x8xf32>, vector<8x8xf32>, vector<8x8xf32> -> vector<8x8xf32>
    %cst_206 = arith.constant 0.353553385 : f32
    %461 = vector.broadcast %cst_206 : f32 to vector<8x8xf32>
    %462 = arith.mulf %460, %461 : vector<8x8xf32>
    %463 = arith.addf %462, %312 : vector<8x8xf32>
    %cst_207 = arith.constant dense<0xFF800000> : vector<8xf32>
    %464 = vector.multi_reduction <maximumf>, %463, %cst_207 [1] : vector<8x8xf32> to vector<8xf32>
    %465 = vector.shape_cast %464 : vector<8xf32> to vector<8x1xf32>
    %466 = vector.broadcast %465 : vector<8x1xf32> to vector<8x8xf32>
    %467 = arith.subf %463, %466 : vector<8x8xf32>
    %468 = math.exp %467 : vector<8x8xf32>
    %cst_208 = arith.constant dense<0.000000e+00> : vector<8xf32>
    %469 = vector.multi_reduction <add>, %468, %cst_208 [1] : vector<8x8xf32> to vector<8xf32>
    %470 = vector.shape_cast %469 : vector<8xf32> to vector<8x1xf32>
    %471 = tpu.reciprocal %470 {approx = true} : vector<8x1xf32> -> vector<8x1xf32>
    %cst_209 = arith.constant dense<0.000000e+00> : vector<8x8xf32>
    %472 = tpu.matmul %468, %458, %cst_209 {dimension_numbers = #tpu.dot_dimension_numbers<[1], [0], [0], [1], [0, 0, 1, 1], [], []>} : vector<8x8xf32>, vector<8x8xf32>, vector<8x8xf32> -> vector<8x8xf32>
    %473 = vector.broadcast %471 : vector<8x1xf32> to vector<8x8xf32>
    %474 = arith.mulf %472, %473 : vector<8x8xf32>
    %475 = vector.extract_strided_slice %350 {offsets = [2, 0, 0], sizes = [1, 8, 32], strides = [1, 1, 1]} : vector<4x8x32xf32> to vector<1x8x32xf32>
    %476 = vector.shape_cast %475 : vector<1x8x32xf32> to vector<8x32xf32>
    %cst_210 = arith.constant dense<0.000000e+00> : vector<8x32xf32>
    %477 = tpu.matmul %474, %476, %cst_210 {dimension_numbers = #tpu.dot_dimension_numbers<[1], [0], [0], [1], [0, 0, 1, 1], [], []>} : vector<8x8xf32>, vector<8x32xf32>, vector<8x32xf32> -> vector<8x32xf32>
    %478 = arith.addf %437, %477 : vector<8x32xf32>
    %479 = vector.extract_strided_slice %338 {offsets = [3, 0, 0], sizes = [1, 32, 8], strides = [1, 1, 1]} : vector<4x32x8xf32> to vector<1x32x8xf32>
    %480 = vector.shape_cast %479 : vector<1x32x8xf32> to vector<32x8xf32>
    %cst_211 = arith.constant dense<0.000000e+00> : vector<8x8xf32>
    %481 = tpu.matmul %336, %480, %cst_211 {dimension_numbers = #tpu.dot_dimension_numbers<[1], [0], [0], [1], [0, 0, 1, 1], [], []>} : vector<8x32xf32>, vector<32x8xf32>, vector<8x8xf32> -> vector<8x8xf32>
    %482 = vector.extract_strided_slice %340 {offsets = [3, 0, 0], sizes = [1, 1, 8], strides = [1, 1, 1]} : vector<4x1x8xf32> to vector<1x1x8xf32>
    %483 = vector.shape_cast %482 : vector<1x1x8xf32> to vector<1x8xf32>
    %484 = vector.broadcast %483 : vector<1x8xf32> to vector<8x8xf32>
    %485 = arith.addf %481, %484 : vector<8x8xf32>
    %486 = vector.extract_strided_slice %342 {offsets = [3, 0, 0], sizes = [1, 32, 8], strides = [1, 1, 1]} : vector<4x32x8xf32> to vector<1x32x8xf32>
    %487 = vector.shape_cast %486 : vector<1x32x8xf32> to vector<32x8xf32>
    %cst_212 = arith.constant dense<0.000000e+00> : vector<8x8xf32>
    %488 = tpu.matmul %336, %487, %cst_212 {dimension_numbers = #tpu.dot_dimension_numbers<[1], [0], [0], [1], [0, 0, 1, 1], [], []>} : vector<8x32xf32>, vector<32x8xf32>, vector<8x8xf32> -> vector<8x8xf32>
    %489 = vector.extract_strided_slice %344 {offsets = [3, 0, 0], sizes = [1, 1, 8], strides = [1, 1, 1]} : vector<4x1x8xf32> to vector<1x1x8xf32>
    %490 = vector.shape_cast %489 : vector<1x1x8xf32> to vector<1x8xf32>
    %491 = vector.broadcast %490 : vector<1x8xf32> to vector<8x8xf32>
    %492 = arith.addf %488, %491 : vector<8x8xf32>
    %493 = vector.extract_strided_slice %346 {offsets = [3, 0, 0], sizes = [1, 32, 8], strides = [1, 1, 1]} : vector<4x32x8xf32> to vector<1x32x8xf32>
    %494 = vector.shape_cast %493 : vector<1x32x8xf32> to vector<32x8xf32>
    %cst_213 = arith.constant dense<0.000000e+00> : vector<8x8xf32>
    %495 = tpu.matmul %336, %494, %cst_213 {dimension_numbers = #tpu.dot_dimension_numbers<[1], [0], [0], [1], [0, 0, 1, 1], [], []>} : vector<8x32xf32>, vector<32x8xf32>, vector<8x8xf32> -> vector<8x8xf32>
    %496 = vector.extract_strided_slice %348 {offsets = [3, 0, 0], sizes = [1, 1, 8], strides = [1, 1, 1]} : vector<4x1x8xf32> to vector<1x1x8xf32>
    %497 = vector.shape_cast %496 : vector<1x1x8xf32> to vector<1x8xf32>
    %498 = vector.broadcast %497 : vector<1x8xf32> to vector<8x8xf32>
    %499 = arith.addf %495, %498 : vector<8x8xf32>
    %500 = tpu.transpose %492, [1, 0] : vector<8x8xf32> -> vector<8x8xf32>
    %cst_214 = arith.constant dense<0.000000e+00> : vector<8x8xf32>
    %501 = tpu.matmul %485, %500, %cst_214 {dimension_numbers = #tpu.dot_dimension_numbers<[1], [0], [0], [1], [0, 0, 1, 1], [], []>} : vector<8x8xf32>, vector<8x8xf32>, vector<8x8xf32> -> vector<8x8xf32>
    %cst_215 = arith.constant 0.353553385 : f32
    %502 = vector.broadcast %cst_215 : f32 to vector<8x8xf32>
    %503 = arith.mulf %501, %502 : vector<8x8xf32>
    %504 = arith.addf %503, %312 : vector<8x8xf32>
    %cst_216 = arith.constant dense<0xFF800000> : vector<8xf32>
    %505 = vector.multi_reduction <maximumf>, %504, %cst_216 [1] : vector<8x8xf32> to vector<8xf32>
    %506 = vector.shape_cast %505 : vector<8xf32> to vector<8x1xf32>
    %507 = vector.broadcast %506 : vector<8x1xf32> to vector<8x8xf32>
    %508 = arith.subf %504, %507 : vector<8x8xf32>
    %509 = math.exp %508 : vector<8x8xf32>
    %cst_217 = arith.constant dense<0.000000e+00> : vector<8xf32>
    %510 = vector.multi_reduction <add>, %509, %cst_217 [1] : vector<8x8xf32> to vector<8xf32>
    %511 = vector.shape_cast %510 : vector<8xf32> to vector<8x1xf32>
    %512 = tpu.reciprocal %511 {approx = true} : vector<8x1xf32> -> vector<8x1xf32>
    %cst_218 = arith.constant dense<0.000000e+00> : vector<8x8xf32>
    %513 = tpu.matmul %509, %499, %cst_218 {dimension_numbers = #tpu.dot_dimension_numbers<[1], [0], [0], [1], [0, 0, 1, 1], [], []>} : vector<8x8xf32>, vector<8x8xf32>, vector<8x8xf32> -> vector<8x8xf32>
    %514 = vector.broadcast %512 : vector<8x1xf32> to vector<8x8xf32>
    %515 = arith.mulf %513, %514 : vector<8x8xf32>
    %516 = vector.extract_strided_slice %350 {offsets = [3, 0, 0], sizes = [1, 8, 32], strides = [1, 1, 1]} : vector<4x8x32xf32> to vector<1x8x32xf32>
    %517 = vector.shape_cast %516 : vector<1x8x32xf32> to vector<8x32xf32>
    %cst_219 = arith.constant dense<0.000000e+00> : vector<8x32xf32>
    %518 = tpu.matmul %515, %517, %cst_219 {dimension_numbers = #tpu.dot_dimension_numbers<[1], [0], [0], [1], [0, 0, 1, 1], [], []>} : vector<8x8xf32>, vector<8x32xf32>, vector<8x32xf32> -> vector<8x32xf32>
    %519 = arith.addf %478, %518 : vector<8x32xf32>
    %520 = arith.addf %300, %519 : vector<8x32xf32>
    %c4 = arith.constant 4 : index
    %c0_220 = arith.constant 0 : index
    %c0_221 = arith.constant 0 : index
    %521 = vector.load %arg10[%c4, %c0_220, %c0_221] : memref<7x1x32xf32, #tpu.memory_space<vmem>>, vector<1x1x32xf32>
    %522 = vector.shape_cast %521 : vector<1x1x32xf32> to vector<1x32xf32>
    %c4_222 = arith.constant 4 : index
    %c0_223 = arith.constant 0 : index
    %c0_224 = arith.constant 0 : index
    %523 = vector.load %arg11[%c4_222, %c0_223, %c0_224] : memref<7x1x32xf32, #tpu.memory_space<vmem>>, vector<1x1x32xf32>
    %524 = vector.shape_cast %523 : vector<1x1x32xf32> to vector<1x32xf32>
    %cst_225 = arith.constant dense<0.000000e+00> : vector<8xf32>
    %525 = vector.multi_reduction <add>, %520, %cst_225 [1] : vector<8x32xf32> to vector<8xf32>
    %526 = vector.shape_cast %525 : vector<8xf32> to vector<8x1xf32>
    %cst_226 = arith.constant 3.200000e+01 : f32
    %527 = vector.broadcast %cst_226 : f32 to vector<8x1xf32>
    %528 = arith.divf %526, %527 : vector<8x1xf32>
    %529 = vector.broadcast %528 : vector<8x1xf32> to vector<8x32xf32>
    %530 = arith.subf %520, %529 : vector<8x32xf32>
    %531 = arith.mulf %530, %530 : vector<8x32xf32>
    %cst_227 = arith.constant dense<0.000000e+00> : vector<8xf32>
    %532 = vector.multi_reduction <add>, %531, %cst_227 [1] : vector<8x32xf32> to vector<8xf32>
    %533 = vector.shape_cast %532 : vector<8xf32> to vector<8x1xf32>
    %cst_228 = arith.constant 3.200000e+01 : f32
    %534 = vector.broadcast %cst_228 : f32 to vector<8x1xf32>
    %535 = arith.divf %533, %534 : vector<8x1xf32>
    %cst_229 = arith.constant 9.99999974E-6 : f32
    %536 = vector.broadcast %cst_229 : f32 to vector<8x1xf32>
    %537 = arith.addf %535, %536 : vector<8x1xf32>
    %538 = math.rsqrt %537 : vector<8x1xf32>
    %539 = vector.broadcast %538 : vector<8x1xf32> to vector<8x32xf32>
    %540 = arith.mulf %530, %539 : vector<8x32xf32>
    %541 = vector.broadcast %522 : vector<1x32xf32> to vector<8x32xf32>
    %542 = arith.mulf %540, %541 : vector<8x32xf32>
    %543 = vector.broadcast %524 : vector<1x32xf32> to vector<8x32xf32>
    %544 = arith.addf %542, %543 : vector<8x32xf32>
    %c2_230 = arith.constant 2 : index
    %c0_231 = arith.constant 0 : index
    %c0_232 = arith.constant 0 : index
    %c0_233 = arith.constant 0 : index
    %545 = vector.load %arg12[%c2_230, %c0_231, %c0_232, %c0_233] : memref<3x4x32x8xf32, #tpu.memory_space<vmem>>, vector<1x4x32x8xf32>
    %546 = vector.shape_cast %545 : vector<1x4x32x8xf32> to vector<4x32x8xf32>
    %c2_234 = arith.constant 2 : index
    %c0_235 = arith.constant 0 : index
    %c0_236 = arith.constant 0 : index
    %c0_237 = arith.constant 0 : index
    %547 = vector.load %arg13[%c2_234, %c0_235, %c0_236, %c0_237] : memref<3x4x1x8xf32, #tpu.memory_space<vmem>>, vector<1x4x1x8xf32>
    %548 = vector.shape_cast %547 : vector<1x4x1x8xf32> to vector<4x1x8xf32>
    %c2_238 = arith.constant 2 : index
    %c0_239 = arith.constant 0 : index
    %c0_240 = arith.constant 0 : index
    %c0_241 = arith.constant 0 : index
    %549 = vector.load %arg14[%c2_238, %c0_239, %c0_240, %c0_241] : memref<3x4x32x8xf32, #tpu.memory_space<vmem>>, vector<1x4x32x8xf32>
    %550 = vector.shape_cast %549 : vector<1x4x32x8xf32> to vector<4x32x8xf32>
    %c2_242 = arith.constant 2 : index
    %c0_243 = arith.constant 0 : index
    %c0_244 = arith.constant 0 : index
    %c0_245 = arith.constant 0 : index
    %551 = vector.load %arg15[%c2_242, %c0_243, %c0_244, %c0_245] : memref<3x4x1x8xf32, #tpu.memory_space<vmem>>, vector<1x4x1x8xf32>
    %552 = vector.shape_cast %551 : vector<1x4x1x8xf32> to vector<4x1x8xf32>
    %c2_246 = arith.constant 2 : index
    %c0_247 = arith.constant 0 : index
    %c0_248 = arith.constant 0 : index
    %c0_249 = arith.constant 0 : index
    %553 = vector.load %arg16[%c2_246, %c0_247, %c0_248, %c0_249] : memref<3x4x32x8xf32, #tpu.memory_space<vmem>>, vector<1x4x32x8xf32>
    %554 = vector.shape_cast %553 : vector<1x4x32x8xf32> to vector<4x32x8xf32>
    %c2_250 = arith.constant 2 : index
    %c0_251 = arith.constant 0 : index
    %c0_252 = arith.constant 0 : index
    %c0_253 = arith.constant 0 : index
    %555 = vector.load %arg17[%c2_250, %c0_251, %c0_252, %c0_253] : memref<3x4x1x8xf32, #tpu.memory_space<vmem>>, vector<1x4x1x8xf32>
    %556 = vector.shape_cast %555 : vector<1x4x1x8xf32> to vector<4x1x8xf32>
    %c2_254 = arith.constant 2 : index
    %c0_255 = arith.constant 0 : index
    %c0_256 = arith.constant 0 : index
    %c0_257 = arith.constant 0 : index
    %557 = vector.load %arg18[%c2_254, %c0_255, %c0_256, %c0_257] : memref<3x4x8x32xf32, #tpu.memory_space<vmem>>, vector<1x4x8x32xf32>
    %558 = vector.shape_cast %557 : vector<1x4x8x32xf32> to vector<4x8x32xf32>
    %c2_258 = arith.constant 2 : index
    %c0_259 = arith.constant 0 : index
    %c0_260 = arith.constant 0 : index
    %559 = vector.load %arg19[%c2_258, %c0_259, %c0_260] : memref<3x1x32xf32, #tpu.memory_space<vmem>>, vector<1x1x32xf32>
    %560 = vector.shape_cast %559 : vector<1x1x32xf32> to vector<1x32xf32>
    %cst_261 = arith.constant 0.000000e+00 : f32
    %561 = vector.broadcast %cst_261 : f32 to vector<8x32xf32>
    %562 = vector.broadcast %560 : vector<1x32xf32> to vector<8x32xf32>
    %563 = arith.addf %561, %562 : vector<8x32xf32>
    %564 = vector.extract_strided_slice %546 {offsets = [0, 0, 0], sizes = [1, 32, 8], strides = [1, 1, 1]} : vector<4x32x8xf32> to vector<1x32x8xf32>
    %565 = vector.shape_cast %564 : vector<1x32x8xf32> to vector<32x8xf32>
    %cst_262 = arith.constant dense<0.000000e+00> : vector<8x8xf32>
    %566 = tpu.matmul %544, %565, %cst_262 {dimension_numbers = #tpu.dot_dimension_numbers<[1], [0], [0], [1], [0, 0, 1, 1], [], []>} : vector<8x32xf32>, vector<32x8xf32>, vector<8x8xf32> -> vector<8x8xf32>
    %567 = vector.extract_strided_slice %548 {offsets = [0, 0, 0], sizes = [1, 1, 8], strides = [1, 1, 1]} : vector<4x1x8xf32> to vector<1x1x8xf32>
    %568 = vector.shape_cast %567 : vector<1x1x8xf32> to vector<1x8xf32>
    %569 = vector.broadcast %568 : vector<1x8xf32> to vector<8x8xf32>
    %570 = arith.addf %566, %569 : vector<8x8xf32>
    %571 = vector.extract_strided_slice %550 {offsets = [0, 0, 0], sizes = [1, 32, 8], strides = [1, 1, 1]} : vector<4x32x8xf32> to vector<1x32x8xf32>
    %572 = vector.shape_cast %571 : vector<1x32x8xf32> to vector<32x8xf32>
    %cst_263 = arith.constant dense<0.000000e+00> : vector<9x8xf32>
    %573 = tpu.matmul %289, %572, %cst_263 {dimension_numbers = #tpu.dot_dimension_numbers<[1], [0], [0], [1], [0, 0, 1, 1], [], []>} : vector<9x32xf32>, vector<32x8xf32>, vector<9x8xf32> -> vector<9x8xf32>
    %574 = vector.extract_strided_slice %552 {offsets = [0, 0, 0], sizes = [1, 1, 8], strides = [1, 1, 1]} : vector<4x1x8xf32> to vector<1x1x8xf32>
    %575 = vector.shape_cast %574 : vector<1x1x8xf32> to vector<1x8xf32>
    %576 = vector.broadcast %575 : vector<1x8xf32> to vector<9x8xf32>
    %577 = arith.addf %573, %576 : vector<9x8xf32>
    %578 = vector.extract_strided_slice %554 {offsets = [0, 0, 0], sizes = [1, 32, 8], strides = [1, 1, 1]} : vector<4x32x8xf32> to vector<1x32x8xf32>
    %579 = vector.shape_cast %578 : vector<1x32x8xf32> to vector<32x8xf32>
    %cst_264 = arith.constant dense<0.000000e+00> : vector<9x8xf32>
    %580 = tpu.matmul %289, %579, %cst_264 {dimension_numbers = #tpu.dot_dimension_numbers<[1], [0], [0], [1], [0, 0, 1, 1], [], []>} : vector<9x32xf32>, vector<32x8xf32>, vector<9x8xf32> -> vector<9x8xf32>
    %581 = vector.extract_strided_slice %556 {offsets = [0, 0, 0], sizes = [1, 1, 8], strides = [1, 1, 1]} : vector<4x1x8xf32> to vector<1x1x8xf32>
    %582 = vector.shape_cast %581 : vector<1x1x8xf32> to vector<1x8xf32>
    %583 = vector.broadcast %582 : vector<1x8xf32> to vector<9x8xf32>
    %584 = arith.addf %580, %583 : vector<9x8xf32>
    %585 = tpu.transpose %577, [1, 0] : vector<9x8xf32> -> vector<8x9xf32>
    %cst_265 = arith.constant dense<0.000000e+00> : vector<8x9xf32>
    %586 = tpu.matmul %570, %585, %cst_265 {dimension_numbers = #tpu.dot_dimension_numbers<[1], [0], [0], [1], [0, 0, 1, 1], [], []>} : vector<8x8xf32>, vector<8x9xf32>, vector<8x9xf32> -> vector<8x9xf32>
    %cst_266 = arith.constant 0.353553385 : f32
    %587 = vector.broadcast %cst_266 : f32 to vector<8x9xf32>
    %588 = arith.mulf %586, %587 : vector<8x9xf32>
    %cst_267 = arith.constant dense<0xFF800000> : vector<8xf32>
    %589 = vector.multi_reduction <maximumf>, %588, %cst_267 [1] : vector<8x9xf32> to vector<8xf32>
    %590 = vector.shape_cast %589 : vector<8xf32> to vector<8x1xf32>
    %591 = vector.broadcast %590 : vector<8x1xf32> to vector<8x9xf32>
    %592 = arith.subf %588, %591 : vector<8x9xf32>
    %593 = math.exp %592 : vector<8x9xf32>
    %cst_268 = arith.constant dense<0.000000e+00> : vector<8xf32>
    %594 = vector.multi_reduction <add>, %593, %cst_268 [1] : vector<8x9xf32> to vector<8xf32>
    %595 = vector.shape_cast %594 : vector<8xf32> to vector<8x1xf32>
    %596 = tpu.reciprocal %595 {approx = true} : vector<8x1xf32> -> vector<8x1xf32>
    %cst_269 = arith.constant dense<0.000000e+00> : vector<8x8xf32>
    %597 = tpu.matmul %593, %584, %cst_269 {dimension_numbers = #tpu.dot_dimension_numbers<[1], [0], [0], [1], [0, 0, 1, 1], [], []>} : vector<8x9xf32>, vector<9x8xf32>, vector<8x8xf32> -> vector<8x8xf32>
    %598 = vector.broadcast %596 : vector<8x1xf32> to vector<8x8xf32>
    %599 = arith.mulf %597, %598 : vector<8x8xf32>
    %600 = vector.extract_strided_slice %558 {offsets = [0, 0, 0], sizes = [1, 8, 32], strides = [1, 1, 1]} : vector<4x8x32xf32> to vector<1x8x32xf32>
    %601 = vector.shape_cast %600 : vector<1x8x32xf32> to vector<8x32xf32>
    %cst_270 = arith.constant dense<0.000000e+00> : vector<8x32xf32>
    %602 = tpu.matmul %599, %601, %cst_270 {dimension_numbers = #tpu.dot_dimension_numbers<[1], [0], [0], [1], [0, 0, 1, 1], [], []>} : vector<8x8xf32>, vector<8x32xf32>, vector<8x32xf32> -> vector<8x32xf32>
    %603 = arith.addf %563, %602 : vector<8x32xf32>
    %604 = vector.extract_strided_slice %546 {offsets = [1, 0, 0], sizes = [1, 32, 8], strides = [1, 1, 1]} : vector<4x32x8xf32> to vector<1x32x8xf32>
    %605 = vector.shape_cast %604 : vector<1x32x8xf32> to vector<32x8xf32>
    %cst_271 = arith.constant dense<0.000000e+00> : vector<8x8xf32>
    %606 = tpu.matmul %544, %605, %cst_271 {dimension_numbers = #tpu.dot_dimension_numbers<[1], [0], [0], [1], [0, 0, 1, 1], [], []>} : vector<8x32xf32>, vector<32x8xf32>, vector<8x8xf32> -> vector<8x8xf32>
    %607 = vector.extract_strided_slice %548 {offsets = [1, 0, 0], sizes = [1, 1, 8], strides = [1, 1, 1]} : vector<4x1x8xf32> to vector<1x1x8xf32>
    %608 = vector.shape_cast %607 : vector<1x1x8xf32> to vector<1x8xf32>
    %609 = vector.broadcast %608 : vector<1x8xf32> to vector<8x8xf32>
    %610 = arith.addf %606, %609 : vector<8x8xf32>
    %611 = vector.extract_strided_slice %550 {offsets = [1, 0, 0], sizes = [1, 32, 8], strides = [1, 1, 1]} : vector<4x32x8xf32> to vector<1x32x8xf32>
    %612 = vector.shape_cast %611 : vector<1x32x8xf32> to vector<32x8xf32>
    %cst_272 = arith.constant dense<0.000000e+00> : vector<9x8xf32>
    %613 = tpu.matmul %289, %612, %cst_272 {dimension_numbers = #tpu.dot_dimension_numbers<[1], [0], [0], [1], [0, 0, 1, 1], [], []>} : vector<9x32xf32>, vector<32x8xf32>, vector<9x8xf32> -> vector<9x8xf32>
    %614 = vector.extract_strided_slice %552 {offsets = [1, 0, 0], sizes = [1, 1, 8], strides = [1, 1, 1]} : vector<4x1x8xf32> to vector<1x1x8xf32>
    %615 = vector.shape_cast %614 : vector<1x1x8xf32> to vector<1x8xf32>
    %616 = vector.broadcast %615 : vector<1x8xf32> to vector<9x8xf32>
    %617 = arith.addf %613, %616 : vector<9x8xf32>
    %618 = vector.extract_strided_slice %554 {offsets = [1, 0, 0], sizes = [1, 32, 8], strides = [1, 1, 1]} : vector<4x32x8xf32> to vector<1x32x8xf32>
    %619 = vector.shape_cast %618 : vector<1x32x8xf32> to vector<32x8xf32>
    %cst_273 = arith.constant dense<0.000000e+00> : vector<9x8xf32>
    %620 = tpu.matmul %289, %619, %cst_273 {dimension_numbers = #tpu.dot_dimension_numbers<[1], [0], [0], [1], [0, 0, 1, 1], [], []>} : vector<9x32xf32>, vector<32x8xf32>, vector<9x8xf32> -> vector<9x8xf32>
    %621 = vector.extract_strided_slice %556 {offsets = [1, 0, 0], sizes = [1, 1, 8], strides = [1, 1, 1]} : vector<4x1x8xf32> to vector<1x1x8xf32>
    %622 = vector.shape_cast %621 : vector<1x1x8xf32> to vector<1x8xf32>
    %623 = vector.broadcast %622 : vector<1x8xf32> to vector<9x8xf32>
    %624 = arith.addf %620, %623 : vector<9x8xf32>
    %625 = tpu.transpose %617, [1, 0] : vector<9x8xf32> -> vector<8x9xf32>
    %cst_274 = arith.constant dense<0.000000e+00> : vector<8x9xf32>
    %626 = tpu.matmul %610, %625, %cst_274 {dimension_numbers = #tpu.dot_dimension_numbers<[1], [0], [0], [1], [0, 0, 1, 1], [], []>} : vector<8x8xf32>, vector<8x9xf32>, vector<8x9xf32> -> vector<8x9xf32>
    %cst_275 = arith.constant 0.353553385 : f32
    %627 = vector.broadcast %cst_275 : f32 to vector<8x9xf32>
    %628 = arith.mulf %626, %627 : vector<8x9xf32>
    %cst_276 = arith.constant dense<0xFF800000> : vector<8xf32>
    %629 = vector.multi_reduction <maximumf>, %628, %cst_276 [1] : vector<8x9xf32> to vector<8xf32>
    %630 = vector.shape_cast %629 : vector<8xf32> to vector<8x1xf32>
    %631 = vector.broadcast %630 : vector<8x1xf32> to vector<8x9xf32>
    %632 = arith.subf %628, %631 : vector<8x9xf32>
    %633 = math.exp %632 : vector<8x9xf32>
    %cst_277 = arith.constant dense<0.000000e+00> : vector<8xf32>
    %634 = vector.multi_reduction <add>, %633, %cst_277 [1] : vector<8x9xf32> to vector<8xf32>
    %635 = vector.shape_cast %634 : vector<8xf32> to vector<8x1xf32>
    %636 = tpu.reciprocal %635 {approx = true} : vector<8x1xf32> -> vector<8x1xf32>
    %cst_278 = arith.constant dense<0.000000e+00> : vector<8x8xf32>
    %637 = tpu.matmul %633, %624, %cst_278 {dimension_numbers = #tpu.dot_dimension_numbers<[1], [0], [0], [1], [0, 0, 1, 1], [], []>} : vector<8x9xf32>, vector<9x8xf32>, vector<8x8xf32> -> vector<8x8xf32>
    %638 = vector.broadcast %636 : vector<8x1xf32> to vector<8x8xf32>
    %639 = arith.mulf %637, %638 : vector<8x8xf32>
    %640 = vector.extract_strided_slice %558 {offsets = [1, 0, 0], sizes = [1, 8, 32], strides = [1, 1, 1]} : vector<4x8x32xf32> to vector<1x8x32xf32>
    %641 = vector.shape_cast %640 : vector<1x8x32xf32> to vector<8x32xf32>
    %cst_279 = arith.constant dense<0.000000e+00> : vector<8x32xf32>
    %642 = tpu.matmul %639, %641, %cst_279 {dimension_numbers = #tpu.dot_dimension_numbers<[1], [0], [0], [1], [0, 0, 1, 1], [], []>} : vector<8x8xf32>, vector<8x32xf32>, vector<8x32xf32> -> vector<8x32xf32>
    %643 = arith.addf %603, %642 : vector<8x32xf32>
    %644 = vector.extract_strided_slice %546 {offsets = [2, 0, 0], sizes = [1, 32, 8], strides = [1, 1, 1]} : vector<4x32x8xf32> to vector<1x32x8xf32>
    %645 = vector.shape_cast %644 : vector<1x32x8xf32> to vector<32x8xf32>
    %cst_280 = arith.constant dense<0.000000e+00> : vector<8x8xf32>
    %646 = tpu.matmul %544, %645, %cst_280 {dimension_numbers = #tpu.dot_dimension_numbers<[1], [0], [0], [1], [0, 0, 1, 1], [], []>} : vector<8x32xf32>, vector<32x8xf32>, vector<8x8xf32> -> vector<8x8xf32>
    %647 = vector.extract_strided_slice %548 {offsets = [2, 0, 0], sizes = [1, 1, 8], strides = [1, 1, 1]} : vector<4x1x8xf32> to vector<1x1x8xf32>
    %648 = vector.shape_cast %647 : vector<1x1x8xf32> to vector<1x8xf32>
    %649 = vector.broadcast %648 : vector<1x8xf32> to vector<8x8xf32>
    %650 = arith.addf %646, %649 : vector<8x8xf32>
    %651 = vector.extract_strided_slice %550 {offsets = [2, 0, 0], sizes = [1, 32, 8], strides = [1, 1, 1]} : vector<4x32x8xf32> to vector<1x32x8xf32>
    %652 = vector.shape_cast %651 : vector<1x32x8xf32> to vector<32x8xf32>
    %cst_281 = arith.constant dense<0.000000e+00> : vector<9x8xf32>
    %653 = tpu.matmul %289, %652, %cst_281 {dimension_numbers = #tpu.dot_dimension_numbers<[1], [0], [0], [1], [0, 0, 1, 1], [], []>} : vector<9x32xf32>, vector<32x8xf32>, vector<9x8xf32> -> vector<9x8xf32>
    %654 = vector.extract_strided_slice %552 {offsets = [2, 0, 0], sizes = [1, 1, 8], strides = [1, 1, 1]} : vector<4x1x8xf32> to vector<1x1x8xf32>
    %655 = vector.shape_cast %654 : vector<1x1x8xf32> to vector<1x8xf32>
    %656 = vector.broadcast %655 : vector<1x8xf32> to vector<9x8xf32>
    %657 = arith.addf %653, %656 : vector<9x8xf32>
    %658 = vector.extract_strided_slice %554 {offsets = [2, 0, 0], sizes = [1, 32, 8], strides = [1, 1, 1]} : vector<4x32x8xf32> to vector<1x32x8xf32>
    %659 = vector.shape_cast %658 : vector<1x32x8xf32> to vector<32x8xf32>
    %cst_282 = arith.constant dense<0.000000e+00> : vector<9x8xf32>
    %660 = tpu.matmul %289, %659, %cst_282 {dimension_numbers = #tpu.dot_dimension_numbers<[1], [0], [0], [1], [0, 0, 1, 1], [], []>} : vector<9x32xf32>, vector<32x8xf32>, vector<9x8xf32> -> vector<9x8xf32>
    %661 = vector.extract_strided_slice %556 {offsets = [2, 0, 0], sizes = [1, 1, 8], strides = [1, 1, 1]} : vector<4x1x8xf32> to vector<1x1x8xf32>
    %662 = vector.shape_cast %661 : vector<1x1x8xf32> to vector<1x8xf32>
    %663 = vector.broadcast %662 : vector<1x8xf32> to vector<9x8xf32>
    %664 = arith.addf %660, %663 : vector<9x8xf32>
    %665 = tpu.transpose %657, [1, 0] : vector<9x8xf32> -> vector<8x9xf32>
    %cst_283 = arith.constant dense<0.000000e+00> : vector<8x9xf32>
    %666 = tpu.matmul %650, %665, %cst_283 {dimension_numbers = #tpu.dot_dimension_numbers<[1], [0], [0], [1], [0, 0, 1, 1], [], []>} : vector<8x8xf32>, vector<8x9xf32>, vector<8x9xf32> -> vector<8x9xf32>
    %cst_284 = arith.constant 0.353553385 : f32
    %667 = vector.broadcast %cst_284 : f32 to vector<8x9xf32>
    %668 = arith.mulf %666, %667 : vector<8x9xf32>
    %cst_285 = arith.constant dense<0xFF800000> : vector<8xf32>
    %669 = vector.multi_reduction <maximumf>, %668, %cst_285 [1] : vector<8x9xf32> to vector<8xf32>
    %670 = vector.shape_cast %669 : vector<8xf32> to vector<8x1xf32>
    %671 = vector.broadcast %670 : vector<8x1xf32> to vector<8x9xf32>
    %672 = arith.subf %668, %671 : vector<8x9xf32>
    %673 = math.exp %672 : vector<8x9xf32>
    %cst_286 = arith.constant dense<0.000000e+00> : vector<8xf32>
    %674 = vector.multi_reduction <add>, %673, %cst_286 [1] : vector<8x9xf32> to vector<8xf32>
    %675 = vector.shape_cast %674 : vector<8xf32> to vector<8x1xf32>
    %676 = tpu.reciprocal %675 {approx = true} : vector<8x1xf32> -> vector<8x1xf32>
    %cst_287 = arith.constant dense<0.000000e+00> : vector<8x8xf32>
    %677 = tpu.matmul %673, %664, %cst_287 {dimension_numbers = #tpu.dot_dimension_numbers<[1], [0], [0], [1], [0, 0, 1, 1], [], []>} : vector<8x9xf32>, vector<9x8xf32>, vector<8x8xf32> -> vector<8x8xf32>
    %678 = vector.broadcast %676 : vector<8x1xf32> to vector<8x8xf32>
    %679 = arith.mulf %677, %678 : vector<8x8xf32>
    %680 = vector.extract_strided_slice %558 {offsets = [2, 0, 0], sizes = [1, 8, 32], strides = [1, 1, 1]} : vector<4x8x32xf32> to vector<1x8x32xf32>
    %681 = vector.shape_cast %680 : vector<1x8x32xf32> to vector<8x32xf32>
    %cst_288 = arith.constant dense<0.000000e+00> : vector<8x32xf32>
    %682 = tpu.matmul %679, %681, %cst_288 {dimension_numbers = #tpu.dot_dimension_numbers<[1], [0], [0], [1], [0, 0, 1, 1], [], []>} : vector<8x8xf32>, vector<8x32xf32>, vector<8x32xf32> -> vector<8x32xf32>
    %683 = arith.addf %643, %682 : vector<8x32xf32>
    %684 = vector.extract_strided_slice %546 {offsets = [3, 0, 0], sizes = [1, 32, 8], strides = [1, 1, 1]} : vector<4x32x8xf32> to vector<1x32x8xf32>
    %685 = vector.shape_cast %684 : vector<1x32x8xf32> to vector<32x8xf32>
    %cst_289 = arith.constant dense<0.000000e+00> : vector<8x8xf32>
    %686 = tpu.matmul %544, %685, %cst_289 {dimension_numbers = #tpu.dot_dimension_numbers<[1], [0], [0], [1], [0, 0, 1, 1], [], []>} : vector<8x32xf32>, vector<32x8xf32>, vector<8x8xf32> -> vector<8x8xf32>
    %687 = vector.extract_strided_slice %548 {offsets = [3, 0, 0], sizes = [1, 1, 8], strides = [1, 1, 1]} : vector<4x1x8xf32> to vector<1x1x8xf32>
    %688 = vector.shape_cast %687 : vector<1x1x8xf32> to vector<1x8xf32>
    %689 = vector.broadcast %688 : vector<1x8xf32> to vector<8x8xf32>
    %690 = arith.addf %686, %689 : vector<8x8xf32>
    %691 = vector.extract_strided_slice %550 {offsets = [3, 0, 0], sizes = [1, 32, 8], strides = [1, 1, 1]} : vector<4x32x8xf32> to vector<1x32x8xf32>
    %692 = vector.shape_cast %691 : vector<1x32x8xf32> to vector<32x8xf32>
    %cst_290 = arith.constant dense<0.000000e+00> : vector<9x8xf32>
    %693 = tpu.matmul %289, %692, %cst_290 {dimension_numbers = #tpu.dot_dimension_numbers<[1], [0], [0], [1], [0, 0, 1, 1], [], []>} : vector<9x32xf32>, vector<32x8xf32>, vector<9x8xf32> -> vector<9x8xf32>
    %694 = vector.extract_strided_slice %552 {offsets = [3, 0, 0], sizes = [1, 1, 8], strides = [1, 1, 1]} : vector<4x1x8xf32> to vector<1x1x8xf32>
    %695 = vector.shape_cast %694 : vector<1x1x8xf32> to vector<1x8xf32>
    %696 = vector.broadcast %695 : vector<1x8xf32> to vector<9x8xf32>
    %697 = arith.addf %693, %696 : vector<9x8xf32>
    %698 = vector.extract_strided_slice %554 {offsets = [3, 0, 0], sizes = [1, 32, 8], strides = [1, 1, 1]} : vector<4x32x8xf32> to vector<1x32x8xf32>
    %699 = vector.shape_cast %698 : vector<1x32x8xf32> to vector<32x8xf32>
    %cst_291 = arith.constant dense<0.000000e+00> : vector<9x8xf32>
    %700 = tpu.matmul %289, %699, %cst_291 {dimension_numbers = #tpu.dot_dimension_numbers<[1], [0], [0], [1], [0, 0, 1, 1], [], []>} : vector<9x32xf32>, vector<32x8xf32>, vector<9x8xf32> -> vector<9x8xf32>
    %701 = vector.extract_strided_slice %556 {offsets = [3, 0, 0], sizes = [1, 1, 8], strides = [1, 1, 1]} : vector<4x1x8xf32> to vector<1x1x8xf32>
    %702 = vector.shape_cast %701 : vector<1x1x8xf32> to vector<1x8xf32>
    %703 = vector.broadcast %702 : vector<1x8xf32> to vector<9x8xf32>
    %704 = arith.addf %700, %703 : vector<9x8xf32>
    %705 = tpu.transpose %697, [1, 0] : vector<9x8xf32> -> vector<8x9xf32>
    %cst_292 = arith.constant dense<0.000000e+00> : vector<8x9xf32>
    %706 = tpu.matmul %690, %705, %cst_292 {dimension_numbers = #tpu.dot_dimension_numbers<[1], [0], [0], [1], [0, 0, 1, 1], [], []>} : vector<8x8xf32>, vector<8x9xf32>, vector<8x9xf32> -> vector<8x9xf32>
    %cst_293 = arith.constant 0.353553385 : f32
    %707 = vector.broadcast %cst_293 : f32 to vector<8x9xf32>
    %708 = arith.mulf %706, %707 : vector<8x9xf32>
    %cst_294 = arith.constant dense<0xFF800000> : vector<8xf32>
    %709 = vector.multi_reduction <maximumf>, %708, %cst_294 [1] : vector<8x9xf32> to vector<8xf32>
    %710 = vector.shape_cast %709 : vector<8xf32> to vector<8x1xf32>
    %711 = vector.broadcast %710 : vector<8x1xf32> to vector<8x9xf32>
    %712 = arith.subf %708, %711 : vector<8x9xf32>
    %713 = math.exp %712 : vector<8x9xf32>
    %cst_295 = arith.constant dense<0.000000e+00> : vector<8xf32>
    %714 = vector.multi_reduction <add>, %713, %cst_295 [1] : vector<8x9xf32> to vector<8xf32>
    %715 = vector.shape_cast %714 : vector<8xf32> to vector<8x1xf32>
    %716 = tpu.reciprocal %715 {approx = true} : vector<8x1xf32> -> vector<8x1xf32>
    %cst_296 = arith.constant dense<0.000000e+00> : vector<8x8xf32>
    %717 = tpu.matmul %713, %704, %cst_296 {dimension_numbers = #tpu.dot_dimension_numbers<[1], [0], [0], [1], [0, 0, 1, 1], [], []>} : vector<8x9xf32>, vector<9x8xf32>, vector<8x8xf32> -> vector<8x8xf32>
    %718 = vector.broadcast %716 : vector<8x1xf32> to vector<8x8xf32>
    %719 = arith.mulf %717, %718 : vector<8x8xf32>
    %720 = vector.extract_strided_slice %558 {offsets = [3, 0, 0], sizes = [1, 8, 32], strides = [1, 1, 1]} : vector<4x8x32xf32> to vector<1x8x32xf32>
    %721 = vector.shape_cast %720 : vector<1x8x32xf32> to vector<8x32xf32>
    %cst_297 = arith.constant dense<0.000000e+00> : vector<8x32xf32>
    %722 = tpu.matmul %719, %721, %cst_297 {dimension_numbers = #tpu.dot_dimension_numbers<[1], [0], [0], [1], [0, 0, 1, 1], [], []>} : vector<8x8xf32>, vector<8x32xf32>, vector<8x32xf32> -> vector<8x32xf32>
    %723 = arith.addf %683, %722 : vector<8x32xf32>
    %724 = arith.addf %520, %723 : vector<8x32xf32>
    %c5 = arith.constant 5 : index
    %c0_298 = arith.constant 0 : index
    %c0_299 = arith.constant 0 : index
    %725 = vector.load %arg10[%c5, %c0_298, %c0_299] : memref<7x1x32xf32, #tpu.memory_space<vmem>>, vector<1x1x32xf32>
    %726 = vector.shape_cast %725 : vector<1x1x32xf32> to vector<1x32xf32>
    %c5_300 = arith.constant 5 : index
    %c0_301 = arith.constant 0 : index
    %c0_302 = arith.constant 0 : index
    %727 = vector.load %arg11[%c5_300, %c0_301, %c0_302] : memref<7x1x32xf32, #tpu.memory_space<vmem>>, vector<1x1x32xf32>
    %728 = vector.shape_cast %727 : vector<1x1x32xf32> to vector<1x32xf32>
    %cst_303 = arith.constant dense<0.000000e+00> : vector<8xf32>
    %729 = vector.multi_reduction <add>, %724, %cst_303 [1] : vector<8x32xf32> to vector<8xf32>
    %730 = vector.shape_cast %729 : vector<8xf32> to vector<8x1xf32>
    %cst_304 = arith.constant 3.200000e+01 : f32
    %731 = vector.broadcast %cst_304 : f32 to vector<8x1xf32>
    %732 = arith.divf %730, %731 : vector<8x1xf32>
    %733 = vector.broadcast %732 : vector<8x1xf32> to vector<8x32xf32>
    %734 = arith.subf %724, %733 : vector<8x32xf32>
    %735 = arith.mulf %734, %734 : vector<8x32xf32>
    %cst_305 = arith.constant dense<0.000000e+00> : vector<8xf32>
    %736 = vector.multi_reduction <add>, %735, %cst_305 [1] : vector<8x32xf32> to vector<8xf32>
    %737 = vector.shape_cast %736 : vector<8xf32> to vector<8x1xf32>
    %cst_306 = arith.constant 3.200000e+01 : f32
    %738 = vector.broadcast %cst_306 : f32 to vector<8x1xf32>
    %739 = arith.divf %737, %738 : vector<8x1xf32>
    %cst_307 = arith.constant 9.99999974E-6 : f32
    %740 = vector.broadcast %cst_307 : f32 to vector<8x1xf32>
    %741 = arith.addf %739, %740 : vector<8x1xf32>
    %742 = math.rsqrt %741 : vector<8x1xf32>
    %743 = vector.broadcast %742 : vector<8x1xf32> to vector<8x32xf32>
    %744 = arith.mulf %734, %743 : vector<8x32xf32>
    %745 = vector.broadcast %726 : vector<1x32xf32> to vector<8x32xf32>
    %746 = arith.mulf %744, %745 : vector<8x32xf32>
    %747 = vector.broadcast %728 : vector<1x32xf32> to vector<8x32xf32>
    %748 = arith.addf %746, %747 : vector<8x32xf32>
    %c1_308 = arith.constant 1 : index
    %c0_309 = arith.constant 0 : index
    %c0_310 = arith.constant 0 : index
    %749 = vector.load %arg20[%c1_308, %c0_309, %c0_310] : memref<2x32x128xf32, #tpu.memory_space<vmem>>, vector<1x32x128xf32>
    %750 = vector.shape_cast %749 : vector<1x32x128xf32> to vector<32x128xf32>
    %c1_311 = arith.constant 1 : index
    %c0_312 = arith.constant 0 : index
    %c0_313 = arith.constant 0 : index
    %751 = vector.load %arg21[%c1_311, %c0_312, %c0_313] : memref<2x1x128xf32, #tpu.memory_space<vmem>>, vector<1x1x128xf32>
    %752 = vector.shape_cast %751 : vector<1x1x128xf32> to vector<1x128xf32>
    %c1_314 = arith.constant 1 : index
    %c0_315 = arith.constant 0 : index
    %c0_316 = arith.constant 0 : index
    %753 = vector.load %arg22[%c1_314, %c0_315, %c0_316] : memref<2x128x32xf32, #tpu.memory_space<vmem>>, vector<1x128x32xf32>
    %754 = vector.shape_cast %753 : vector<1x128x32xf32> to vector<128x32xf32>
    %c1_317 = arith.constant 1 : index
    %c0_318 = arith.constant 0 : index
    %c0_319 = arith.constant 0 : index
    %755 = vector.load %arg23[%c1_317, %c0_318, %c0_319] : memref<2x1x32xf32, #tpu.memory_space<vmem>>, vector<1x1x32xf32>
    %756 = vector.shape_cast %755 : vector<1x1x32xf32> to vector<1x32xf32>
    %cst_320 = arith.constant dense<0.000000e+00> : vector<8x128xf32>
    %757 = tpu.matmul %748, %750, %cst_320 {dimension_numbers = #tpu.dot_dimension_numbers<[1], [0], [0], [1], [0, 0, 1, 1], [], []>} : vector<8x32xf32>, vector<32x128xf32>, vector<8x128xf32> -> vector<8x128xf32>
    %758 = vector.broadcast %752 : vector<1x128xf32> to vector<8x128xf32>
    %759 = arith.addf %757, %758 : vector<8x128xf32>
    %760 = arith.mulf %759, %759 : vector<8x128xf32>
    %761 = arith.mulf %759, %760 : vector<8x128xf32>
    %cst_321 = arith.constant 4.471500e-02 : f32
    %762 = vector.broadcast %cst_321 : f32 to vector<8x128xf32>
    %763 = arith.mulf %762, %761 : vector<8x128xf32>
    %764 = arith.addf %759, %763 : vector<8x128xf32>
    %cst_322 = arith.constant 0.797884583 : f32
    %765 = vector.broadcast %cst_322 : f32 to vector<8x128xf32>
    %766 = arith.mulf %765, %764 : vector<8x128xf32>
    %767 = math.tanh %766 : vector<8x128xf32>
    %cst_323 = arith.constant 1.000000e+00 : f32
    %768 = vector.broadcast %cst_323 : f32 to vector<8x128xf32>
    %769 = arith.addf %768, %767 : vector<8x128xf32>
    %cst_324 = arith.constant 5.000000e-01 : f32
    %770 = vector.broadcast %cst_324 : f32 to vector<8x128xf32>
    %771 = arith.mulf %770, %769 : vector<8x128xf32>
    %772 = arith.mulf %759, %771 : vector<8x128xf32>
    %cst_325 = arith.constant dense<0.000000e+00> : vector<8x32xf32>
    %773 = tpu.matmul %772, %754, %cst_325 {dimension_numbers = #tpu.dot_dimension_numbers<[1], [0], [0], [1], [0, 0, 1, 1], [], []>} : vector<8x128xf32>, vector<128x32xf32>, vector<8x32xf32> -> vector<8x32xf32>
    %774 = vector.broadcast %756 : vector<1x32xf32> to vector<8x32xf32>
    %775 = arith.addf %773, %774 : vector<8x32xf32>
    %776 = arith.addf %724, %775 : vector<8x32xf32>
    %c6 = arith.constant 6 : index
    %c0_326 = arith.constant 0 : index
    %c0_327 = arith.constant 0 : index
    %777 = vector.load %arg10[%c6, %c0_326, %c0_327] : memref<7x1x32xf32, #tpu.memory_space<vmem>>, vector<1x1x32xf32>
    %778 = vector.shape_cast %777 : vector<1x1x32xf32> to vector<1x32xf32>
    %c6_328 = arith.constant 6 : index
    %c0_329 = arith.constant 0 : index
    %c0_330 = arith.constant 0 : index
    %779 = vector.load %arg11[%c6_328, %c0_329, %c0_330] : memref<7x1x32xf32, #tpu.memory_space<vmem>>, vector<1x1x32xf32>
    %780 = vector.shape_cast %779 : vector<1x1x32xf32> to vector<1x32xf32>
    %cst_331 = arith.constant dense<0.000000e+00> : vector<8xf32>
    %781 = vector.multi_reduction <add>, %776, %cst_331 [1] : vector<8x32xf32> to vector<8xf32>
    %782 = vector.shape_cast %781 : vector<8xf32> to vector<8x1xf32>
    %cst_332 = arith.constant 3.200000e+01 : f32
    %783 = vector.broadcast %cst_332 : f32 to vector<8x1xf32>
    %784 = arith.divf %782, %783 : vector<8x1xf32>
    %785 = vector.broadcast %784 : vector<8x1xf32> to vector<8x32xf32>
    %786 = arith.subf %776, %785 : vector<8x32xf32>
    %787 = arith.mulf %786, %786 : vector<8x32xf32>
    %cst_333 = arith.constant dense<0.000000e+00> : vector<8xf32>
    %788 = vector.multi_reduction <add>, %787, %cst_333 [1] : vector<8x32xf32> to vector<8xf32>
    %789 = vector.shape_cast %788 : vector<8xf32> to vector<8x1xf32>
    %cst_334 = arith.constant 3.200000e+01 : f32
    %790 = vector.broadcast %cst_334 : f32 to vector<8x1xf32>
    %791 = arith.divf %789, %790 : vector<8x1xf32>
    %cst_335 = arith.constant 9.99999974E-6 : f32
    %792 = vector.broadcast %cst_335 : f32 to vector<8x1xf32>
    %793 = arith.addf %791, %792 : vector<8x1xf32>
    %794 = math.rsqrt %793 : vector<8x1xf32>
    %795 = vector.broadcast %794 : vector<8x1xf32> to vector<8x32xf32>
    %796 = arith.mulf %786, %795 : vector<8x32xf32>
    %797 = vector.broadcast %778 : vector<1x32xf32> to vector<8x32xf32>
    %798 = arith.mulf %796, %797 : vector<8x32xf32>
    %799 = vector.broadcast %780 : vector<1x32xf32> to vector<8x32xf32>
    %800 = arith.addf %798, %799 : vector<8x32xf32>
    %c0_336 = arith.constant 0 : index
    %c0_337 = arith.constant 0 : index
    %c0_338 = arith.constant 0 : index
    %801 = vector.load %arg24[%c0_336, %c0_337, %c0_338] : memref<1x8x32xf32, #tpu.memory_space<vmem>>, vector<1x8x32xf32>
    %802 = vector.shape_cast %801 : vector<1x8x32xf32> to vector<8x32xf32>
    %803 = vector.shape_cast %800 : vector<8x32xf32> to vector<1x8x32xf32>
    tpu.vector_store %arg24[%c0_336, %c0_337, %c0_338], %803 {strides = array<i32>} : memref<1x8x32xf32, #tpu.memory_space<vmem>>, vector<1x8x32xf32>,
    return
  }
  func.func @transform_0(%arg0: i32) -> (i32, i32, i32) {
    %c0_i32 = arith.constant 0 : i32
    %c0_i32_0 = arith.constant 0 : i32
    %c0_i32_1 = arith.constant 0 : i32
    return %arg0, %c0_i32, %c0_i32_0 : i32, i32, i32
  }
  func.func @transform_1(%arg0: i32) -> (i32, i32, i32) {
    %c0_i32 = arith.constant 0 : i32
    %c0_i32_0 = arith.constant 0 : i32
    %c0_i32_1 = arith.constant 0 : i32
    return %arg0, %c0_i32, %c0_i32_0 : i32, i32, i32
  }
  func.func @transform_2(%arg0: i32) -> (i32, i32, i32) {
    %c0_i32 = arith.constant 0 : i32
    %c0_i32_0 = arith.constant 0 : i32
    %c0_i32_1 = arith.constant 0 : i32
    return %arg0, %c0_i32, %c0_i32_0 : i32, i32, i32
  }
  func.func @transform_3(%arg0: i32) -> (i32, i32) {
    %c0_i32 = arith.constant 0 : i32
    %c0_i32_0 = arith.constant 0 : i32
    %c0_i32_1 = arith.constant 0 : i32
    return %c0_i32, %c0_i32_0 : i32, i32
  }
  func.func @transform_4(%arg0: i32) -> (i32, i32) {
    %c0_i32 = arith.constant 0 : i32
    %c0_i32_0 = arith.constant 0 : i32
    %c0_i32_1 = arith.constant 0 : i32
    return %c0_i32, %c0_i32_0 : i32, i32
  }
  func.func @transform_5(%arg0: i32) -> (i32, i32) {
    %c0_i32 = arith.constant 0 : i32
    %c0_i32_0 = arith.constant 0 : i32
    %c0_i32_1 = arith.constant 0 : i32
    return %c0_i32, %c0_i32_0 : i32, i32
  }
  func.func @transform_6(%arg0: i32) -> (i32, i32) {
    %c0_i32 = arith.constant 0 : i32
    %c0_i32_0 = arith.constant 0 : i32
    %c0_i32_1 = arith.constant 0 : i32
    return %c0_i32, %c0_i32_0 : i32, i32
  }
  func.func @transform_7(%arg0: i32) -> (i32, i32) {
    %c0_i32 = arith.constant 0 : i32
    %c0_i32_0 = arith.constant 0 : i32
    %c0_i32_1 = arith.constant 0 : i32
    return %c0_i32, %c0_i32_0 : i32, i32
  }
  func.func @transform_8(%arg0: i32) -> (i32, i32) {
    %c0_i32 = arith.constant 0 : i32
    %c0_i32_0 = arith.constant 0 : i32
    %c0_i32_1 = arith.constant 0 : i32
    return %c0_i32, %c0_i32_0 : i32, i32
  }
  func.func @transform_9(%arg0: i32) -> (i32, i32, i32) {
    %c0_i32 = arith.constant 0 : i32
    %c0_i32_0 = arith.constant 0 : i32
    %c0_i32_1 = arith.constant 0 : i32
    %c0_i32_2 = arith.constant 0 : i32
    return %c0_i32, %c0_i32_0, %c0_i32_1 : i32, i32, i32
  }
  func.func @transform_10(%arg0: i32) -> (i32, i32, i32) {
    %c0_i32 = arith.constant 0 : i32
    %c0_i32_0 = arith.constant 0 : i32
    %c0_i32_1 = arith.constant 0 : i32
    %c0_i32_2 = arith.constant 0 : i32
    return %c0_i32, %c0_i32_0, %c0_i32_1 : i32, i32, i32
  }
  func.func @transform_11(%arg0: i32) -> (i32, i32, i32, i32) {
    %c0_i32 = arith.constant 0 : i32
    %c0_i32_0 = arith.constant 0 : i32
    %c0_i32_1 = arith.constant 0 : i32
    %c0_i32_2 = arith.constant 0 : i32
    %c0_i32_3 = arith.constant 0 : i32
    return %c0_i32, %c0_i32_0, %c0_i32_1, %c0_i32_2 : i32, i32, i32, i32
  }
  func.func @transform_12(%arg0: i32) -> (i32, i32, i32, i32) {
    %c0_i32 = arith.constant 0 : i32
    %c0_i32_0 = arith.constant 0 : i32
    %c0_i32_1 = arith.constant 0 : i32
    %c0_i32_2 = arith.constant 0 : i32
    %c0_i32_3 = arith.constant 0 : i32
    return %c0_i32, %c0_i32_0, %c0_i32_1, %c0_i32_2 : i32, i32, i32, i32
  }
  func.func @transform_13(%arg0: i32) -> (i32, i32, i32, i32) {
    %c0_i32 = arith.constant 0 : i32
    %c0_i32_0 = arith.constant 0 : i32
    %c0_i32_1 = arith.constant 0 : i32
    %c0_i32_2 = arith.constant 0 : i32
    %c0_i32_3 = arith.constant 0 : i32
    return %c0_i32, %c0_i32_0, %c0_i32_1, %c0_i32_2 : i32, i32, i32, i32
  }
  func.func @transform_14(%arg0: i32) -> (i32, i32, i32, i32) {
    %c0_i32 = arith.constant 0 : i32
    %c0_i32_0 = arith.constant 0 : i32
    %c0_i32_1 = arith.constant 0 : i32
    %c0_i32_2 = arith.constant 0 : i32
    %c0_i32_3 = arith.constant 0 : i32
    return %c0_i32, %c0_i32_0, %c0_i32_1, %c0_i32_2 : i32, i32, i32, i32
  }
  func.func @transform_15(%arg0: i32) -> (i32, i32, i32, i32) {
    %c0_i32 = arith.constant 0 : i32
    %c0_i32_0 = arith.constant 0 : i32
    %c0_i32_1 = arith.constant 0 : i32
    %c0_i32_2 = arith.constant 0 : i32
    %c0_i32_3 = arith.constant 0 : i32
    return %c0_i32, %c0_i32_0, %c0_i32_1, %c0_i32_2 : i32, i32, i32, i32
  }
  func.func @transform_16(%arg0: i32) -> (i32, i32, i32, i32) {
    %c0_i32 = arith.constant 0 : i32
    %c0_i32_0 = arith.constant 0 : i32
    %c0_i32_1 = arith.constant 0 : i32
    %c0_i32_2 = arith.constant 0 : i32
    %c0_i32_3 = arith.constant 0 : i32
    return %c0_i32, %c0_i32_0, %c0_i32_1, %c0_i32_2 : i32, i32, i32, i32
  }
  func.func @transform_17(%arg0: i32) -> (i32, i32, i32, i32) {
    %c0_i32 = arith.constant 0 : i32
    %c0_i32_0 = arith.constant 0 : i32
    %c0_i32_1 = arith.constant 0 : i32
    %c0_i32_2 = arith.constant 0 : i32
    %c0_i32_3 = arith.constant 0 : i32
    return %c0_i32, %c0_i32_0, %c0_i32_1, %c0_i32_2 : i32, i32, i32, i32
  }
  func.func @transform_18(%arg0: i32) -> (i32, i32, i32) {
    %c0_i32 = arith.constant 0 : i32
    %c0_i32_0 = arith.constant 0 : i32
    %c0_i32_1 = arith.constant 0 : i32
    %c0_i32_2 = arith.constant 0 : i32
    return %c0_i32, %c0_i32_0, %c0_i32_1 : i32, i32, i32
  }
  func.func @transform_19(%arg0: i32) -> (i32, i32, i32) {
    %c0_i32 = arith.constant 0 : i32
    %c0_i32_0 = arith.constant 0 : i32
    %c0_i32_1 = arith.constant 0 : i32
    %c0_i32_2 = arith.constant 0 : i32
    return %c0_i32, %c0_i32_0, %c0_i32_1 : i32, i32, i32
  }
  func.func @transform_20(%arg0: i32) -> (i32, i32, i32) {
    %c0_i32 = arith.constant 0 : i32
    %c0_i32_0 = arith.constant 0 : i32
    %c0_i32_1 = arith.constant 0 : i32
    %c0_i32_2 = arith.constant 0 : i32
    return %c0_i32, %c0_i32_0, %c0_i32_1 : i32, i32, i32
  }
  func.func @transform_21(%arg0: i32) -> (i32, i32, i32) {
    %c0_i32 = arith.constant 0 : i32
    %c0_i32_0 = arith.constant 0 : i32
    %c0_i32_1 = arith.constant 0 : i32
    %c0_i32_2 = arith.constant 0 : i32
    return %c0_i32, %c0_i32_0, %c0_i32_1 : i32, i32, i32
  }
  func.func @transform_22(%arg0: i32) -> (i32, i32, i32) {
    %c0_i32 = arith.constant 0 : i32
    %c0_i32_0 = arith.constant 0 : i32
    %c0_i32_1 = arith.constant 0 : i32
    %c0_i32_2 = arith.constant 0 : i32
    return %c0_i32, %c0_i32_0, %c0_i32_1 : i32, i32, i32
  }
  func.func @transform_23(%arg0: i32) -> (i32, i32, i32) {
    %c0_i32 = arith.constant 0 : i32
    %c0_i32_0 = arith.constant 0 : i32
    %c0_i32_1 = arith.constant 0 : i32
    return %arg0, %c0_i32, %c0_i32_0 : i32, i32, i32
  }
}

</mosaic_0001>

<bundles_post_ra>
// kernel: svad_vlm_forward.1
= control target key start
LH: loop header
LB: loop body
LE: loop exit
PB: predicated region body
PF: predicated region fallthrough
CT: control target
= control target key end

     0   :  { %s11206_s0 = inlined_call_operand.vmem [shape: f32[2,5,192], index: 0, kind: input, shape index: {}]   ;;  %s11207_s1 = inlined_call_operand.vmem [shape: s32[2,8,1], index: 1, kind: input, shape index: {}]   ;;  %s11208_s2 = inlined_call_operand.vmem [shape: f32[2,1,8], index: 2, kind: input, shape index: {}]   ;;  %s11209_s3 = inlined_call_operand.vmem [shape: f32[192,32], index: 3, kind: input, shape index: {}]   ;;  %s11210_s4 = inlined_call_operand.vmem [shape: f32[5,32], index: 4, kind: input, shape index: {}]   ;;  %s11211_s5 = inlined_call_operand.vmem [shape: f32[9,32], index: 5, kind: input, shape index: {}]   ;;  %s11212_s6 = inlined_call_operand.vmem [shape: f32[9,5], index: 6, kind: input, shape index: {}]   ;;  %s11213_s7 = inlined_call_operand.vmem [shape: f32[64,32], index: 7, kind: input, shape index: {}]   ;;  %s11214_s8 = inlined_call_operand.vmem [shape: f32[8,32], index: 8, kind: input, shape index: {}]   ;;  %s11215_s9 = inlined_call_operand.vmem [shape: f32[7,1,32], index: 9, kind: input, shape index: {}]   ;;  %s11216_s10 = inlined_call_operand.vmem [shape: f32[7,1,32], index: 10, kind: input, shape index: {}]   ;;  %s11217_s11 = inlined_call_operand.vmem [shape: f32[3,4,32,8], index: 11, kind: input, shape index: {}]   ;;  %s11218_s12 = inlined_call_operand.vmem [shape: f32[3,4,1,8], index: 12, kind: input, shape index: {}]   ;;  %s11219_s13 = inlined_call_operand.vmem [shape: f32[3,4,32,8], index: 13, kind: input, shape index: {}]   ;;  %s11220_s14 = inlined_call_operand.vmem [shape: f32[3,4,1,8], index: 14, kind: input, shape index: {}]   ;;  %s11221_s15 = inlined_call_operand.vmem [shape: f32[3,4,32,8], index: 15, kind: input, shape index: {}]   ;;  %s11222_s16 = inlined_call_operand.vmem [shape: f32[3,4,1,8], index: 16, kind: input, shape index: {}]   ;;  %s11223_s17 = inlined_call_operand.vmem [shape: f32[3,4,8,32], index: 17, kind: input, shape index: {}]   ;;  %s11224_s18 = inlined_call_operand.vmem [shape: f32[3,1,32], index: 18, kind: input, shape index: {}]   ;;  %s11225_s19 = inlined_call_operand.vmem [shape: f32[2,32,128], index: 19, kind: input, shape index: {}]   ;;  %s11226_s20 = inlined_call_operand.vmem [shape: f32[2,1,128], index: 20, kind: input, shape index: {}]   ;;  %s11227_s21 = inlined_call_operand.vmem [shape: f32[2,128,32], index: 21, kind: input, shape index: {}]   ;;  %s11228_s22 = inlined_call_operand.vmem [shape: f32[2,1,32], index: 22, kind: input, shape index: {}]   ;;  %s11229_s23 = inlined_call_operand.hbm [shape: f32[2,8,32], index: 23, kind: output, shape index: {}]  }
   0x1   :  { %11242 = sst [smem:[#allocation11_spill]] %s11206_s0 }
   0x2   :  { %11243 = sst [smem:[#allocation12_spill]] %s11207_s1 }
   0x3   :  { %11244 = sst [smem:[#allocation13_spill]] %s11208_s2 }
   0x4   :  { %11245 = sst [smem:[#allocation14_spill]] %s11209_s3 }
   0x5   :  { %11246 = sst [smem:[#allocation15_spill]] %s11210_s4 }
   0x6   :  { %11247 = sst [smem:[#allocation16_spill]] %s11211_s5 }
   0x7   :  { %11248 = sst [smem:[#allocation17_spill]] %s11212_s6 }
   0x8   :  { %11249 = sst [smem:[#allocation18_spill]] %s11213_s7 }
   0x9   :  { %11250 = sst [smem:[#allocation19_spill]] %s11214_s8 }
   0xa   :  { %11251 = sst [smem:[#allocation20_spill]] %s11217_s11 }
   0xb   :  { %11252 = sst [smem:[#allocation21_spill]] %s11218_s12 }
   0xc   :  { %11253 = sst [smem:[#allocation22_spill]] %s11229_s23 }
   0xd   :  { %28 = vsyncpa [#allocation3], 0 }
   0xe   :  { %30 = vsyncpa [#allocation3 + $0x1], 0  ;;  %s9671_s4 = smov 0   ;;  %s9673_s30 = smov 0  }
   0xf   :  { %s9675_s24 = smov 0   ;;  %s9677_s25 = smov 0  }
  0x10 LB: > { %11254 = sst [smem:[#allocation5_spill]] %s9530_s4  ;;  %s9692_s5 = sadd.s32 4294967295, %s9542_s25   ;;  %s9542_s25 = sphi %s9677_s25, %s11284_s25   ;;  %s9538_s24 = sphi %s9675_s24, %s11286_s24   ;;  %s9534_s30 = sphi %s9673_s30, %s11288_s30   ;;  %s9530_s4 = sphi %s9671_s4, %s11287_s4  }
  0x11   : > { %11255 = sst [smem:[#allocation6_spill]] %s9538_s24  ;;  %s7618_s1 = sadd.s32 4294967294, %s9542_s25  }
  0x12   : > { %11256 = sst [smem:[#allocation7_spill]] %s9542_s25  ;;  %s9696_s26 = sadd.s32 1, %s9542_s25  }
  0x13   : > { %11257 = sst [smem:[#allocation8_spill]] %s9696_s26  ;;  %s541_s2 = sadd.s32 1, %s9538_s24 }
  0x14   : > { %s538_s6 = ssub.s32 %s9542_s25, %s9696_s26  ;;  %p551_p0 = scmp.ne.s32.totalorder %s9538_s24, %s9534_s30 }
  0x15   : > { %p539_p1 = scmp.eq.s32.totalorder %s538_s6, 0  ;;  %p552_p2 = scmp.eq.s32.totalorder %s9692_s5, 1 }
  0x16   : > { %p557_p3 = scmp.ne.s32.totalorder %s9534_s30, %s9530_s4  ;;  %p558_p4 = scmp.eq.s32.totalorder %s7618_s1, 1 }
  0x17   : > { %s9707_s27 = scalar_select %p539_p1, %s9538_s24, %s541_s2  }
  0x18   : > { %p9709_p5 = por %p552_p2, %p551_p0  ;;  %p9713_p6 = por %p558_p4, %p557_p3 }
  0x19   : > { %11258 = sst [smem:[#allocation9_spill]] %s9707_s27  ;;  %p7621_p7 = scmp.ge.s32.totalorder %s9542_s25, 1 }
  0x1a   : > { %s11260_s28 = scalar_select %p9713_p6, 1, 0 }
  0x1b   : > { %p657_p8 = scmp.lt.s32.totalorder %s9542_s25, 3 }
  0x1c   : > { %11261 = sst [smem:[#allocation10_spill]] %s11260_s28 }
  0x1d   : > { %p658_p9 = pnand %p7621_p7, %p657_p8 }
  0x1e   : > { %s11262_s0 = sld [smem:[#allocation14_spill]] (!%p658_p9)  ;;  %p728_p10 = scmp.lt.s32.totalorder (!%p658_p9), %s9692_s5, 1  ;;  %v9544_v3 = vmov (!%p658_p9), 0.0|0.0   ;;  %vm767_vm0 = vcmask (!%p658_p9), 523264   ;;  %vm843_vm1 = vcmask (!%p658_p9), 258048   ;;  %v916_v52 = vld [vmem:[%s11221_s15 + $0x20] sm:$0xff] (!%p658_p9) }
  0x1f   : > { %661 = sbr.rel (%p658_p9) target bundleno = 13518 (0x34ce), region = 112  ;;  %8996 = vmatprep.subr.bf16.mxu0 (!%p658_p9), %v9544_v3  ;;  %9032 = vmatprep.subr.bf16.mxu1 (!%p658_p9), %v9544_v3  ;;  %s11263_s28 = sld [smem:[#allocation11_spill]] (!%p658_p9)  ;;  %v917_v53 = vld [vmem:[%s11221_s15 + $0x28] sm:$0xff] (!%p658_p9)  ;;  %v918_v58 = vld [vmem:[%s11221_s15 + $0x30] sm:$0xff] (!%p658_p9)  ;;  %v919_v59 = vld [vmem:[%s11221_s15 + $0x38] sm:$0xff] (!%p658_p9)  ;;  %vm9545_vm2 = vmmov (!%p658_p9), 0  }
  0x20   : > { %s11264_s23 = sld [smem:[#allocation15_spill]] (!%p658_p9)  ;;  %s11265_s11 = sld [smem:[#allocation20_spill]] (!%p658_p9)  ;;  %v9063_v54 = vpack.c.bf16 (!%p658_p9), %v917_v53, %v916_v52  ;;  %v9066_v60 = vpack.c.bf16 (!%p658_p9), %v919_v59, %v918_v58  ;;  %v9546_v61 = vmov (!%p658_p9), 0.0   ;;  %vm950_vm3 = vcmask (!%p658_p9), 261120   ;;  %v896_v58 = vld [vmem:[%s11219_s13 + $0x20] sm:$0xff] (!%p658_p9)  ;;  %v897_v59 = vld [vmem:[%s11219_s13 + $0x28] sm:$0xff] (!%p658_p9) }
  0x21   : > { %8296 = vmatprep.mubr.msk.f32.mxu1 (!%p658_p9), %vm9545_vm2, %v9546_v61  ;;  %vm1269_vm4 = vcmask (!%p658_p9), 1044480   ;;  %vm1176_vm5 = vcmask (!%p658_p9), 64512   ;;  %s11266_s12 = sld [smem:[#allocation21_spill]] (!%p658_p9)  ;;  %vm1254_vm6 = vcmask (!%p658_p9), 36864   ;;  %vm1265_vm7 = vcmask (!%p658_p9), 39936   ;;  %s11271_s26 = sld [smem:[#allocation18_spill]] (!%p658_p9) }
  0x22   : > { %s11272_s8 = sld [smem:[#allocation19_spill]] (!%p658_p9)  ;;  %s11274_s24 = sld [smem:[#allocation16_spill]] (!%p658_p9)  ;;  %vm10733_vm13 = vmpackc.low (!%p658_p9), %vm1176_vm5, %vm1176_vm5  ;;  %vm5683_vm14 = vcmask (!%p658_p9), 1040384   ;;  %vm9549_vm15 = vmmov (!%p658_p9), 1  }
  0x23   : > { %s725_s25 = sand.u32 (!%p658_p9), 1, %s9534_s30  }
  0x24   : > { %v742_v0 = vld [vmem:[%s11262_s0] sm:$0xff] (!%p658_p9)  ;;  %v743_v1 = vld [vmem:[%s11262_s0 + $0x8] sm:$0xff] (!%p658_p9)  ;;  %v744_v2 = vld [vmem:[%s11262_s0 + $0x10] sm:$0xff] (!%p658_p9) }
  0x25   : > { %v8997_v4 = vpack.c.bf16 (!%p658_p9), %v743_v1, %v742_v0  ;;  %v745_v5 = vld [vmem:[%s11262_s0 + $0x18] sm:$0xff] (!%p658_p9)  ;;  %v746_v7 = vld [vmem:[%s11262_s0 + $0x20] sm:$0xff] (!%p658_p9)  ;;  %v747_v8 = vld [vmem:[%s11262_s0 + $0x28] sm:$0xff] (!%p658_p9) }
  0x26   : > { %s9735_s29 = scalar_select %p728_p10, %s9692_s5, 1  ;;  %v9000_v6 = vpack.c.bf16 %v745_v5, %v744_v2  ;;  %v9003_v9 = vpack.c.bf16 %v747_v8, %v746_v7  ;;  %v748_v10 = vld [vmem:[%s11262_s0 + $0x30] sm:$0xff]  ;;  %v749_v11 = vld [vmem:[%s11262_s0 + $0x38] sm:$0xff]  ;;  %v750_v14 = vld [vmem:[%s11262_s0 + $0x40] sm:$0xff] }
  0x27   : > { %8998 = vmatpush1.bf16.msra.mxu0 %v8997_v4  ;;  %v9006_v13 = vpack.c.bf16 %v749_v11, %v748_v10  ;;  %v751_v15 = vld [vmem:[%s11262_s0 + $0x48] sm:$0xff]  ;;  %v752_v17 = vld [vmem:[%s11262_s0 + $0x50] sm:$0xff]  ;;  %v753_v18 = vld [vmem:[%s11262_s0 + $0x58] sm:$0xff] }
  0x28   : > { %8999 = vmatprep.subr.bf16.mxu0 %v9544_v3  ;;  %s7963_s6 = sshll.u32 %s9735_s29, 4  ;;  %v9009_v16 = vpack.c.bf16 %v751_v15, %v750_v14  ;;  %v9012_v19 = vpack.c.bf16 %v753_v18, %v752_v17  ;;  %v754_v20 = vld [vmem:[%s11262_s0 + $0x60] sm:$0xff]  ;;  %v755_v21 = vld [vmem:[%s11262_s0 + $0x68] sm:$0xff]  ;;  %v756_v23 = vld [vmem:[%s11262_s0 + $0x70] sm:$0xff]  ;;  %s11275_s27 = smov %s11274_s24 }
  0x29   : > { %s9748_s4 = scalar_lea.vmem %s11263_s28, %s7963_s6  ;;  %v9015_v22 = vpack.c.bf16 %v755_v21, %v754_v20  ;;  %v757_v24 = vld [vmem:[%s11262_s0 + $0x78] sm:$0xff]  ;;  %v758_v26 = vld [vmem:[%s11262_s0 + $0x80] sm:$0xff]  ;;  %v759_v27 = vld [vmem:[%s11262_s0 + $0x88] sm:$0xff]  ;;  %s11267_s28 = sld [smem:[#allocation12_spill]] }
  0x2a   : > { %v741_v12 = vld [vmem:[%s9748_s4 + $0x8] sm:$0x1f]  ;;  %v9018_v25 = vpack.c.bf16 %v757_v24, %v756_v23  ;;  %v9021_v28 = vpack.c.bf16 %v759_v27, %v758_v26  ;;  %v760_v29 = vld [vmem:[%s11262_s0 + $0x90] sm:$0xff]  ;;  %v761_v30 = vld [vmem:[%s11262_s0 + $0x98] sm:$0xff]  ;;  %s11268_s6 = sld [smem:[#allocation13_spill]] }
  0x2b   : > { %9001 = vmatpush1.bf16.msra.mxu0 %v9000_v6  ;;  %7626 = vmatprep.mubr.msk.f32.mxu0 %vm767_vm0, %v741_v12  ;;  %v9024_v31 = vpack.c.bf16 %v761_v30, %v760_v29  ;;  %v762_v32 = vld [vmem:[%s11262_s0 + $0xa0] sm:$0xff]  ;;  %v763_v33 = vld [vmem:[%s11262_s0 + $0xa8] sm:$0xff]  ;;  %v764_v35 = vld [vmem:[%s11262_s0 + $0xb0] sm:$0xff] }
  0x2c   : > { %9002 = vmatprep.subr.bf16.mxu0 %v9544_v3  ;;  %v9027_v34 = vpack.c.bf16 %v763_v33, %v762_v32  ;;  %v765_v36 = vld [vmem:[%s11262_s0 + $0xb8] sm:$0xff]  ;;  %v740_v38 = vld [vmem:[%s9748_s4] sm:$0x1f]  ;;  %v873_v50 = vld [vmem:[%s11265_s11 + $0x8] sm:$0xff]  ;;  %s7525_s0 = scalar_lea.sflag [#allocation3], %s725_s25 }
  0x2d   : > { %v9030_v37 = vpack.c.bf16 %v765_v36, %v764_v35  ;;  %v766_v39 = vld [vmem:[%s11264_s23] sm:$0x1f]  ;;  %v874_v55 = vld [vmem:[%s11265_s11 + $0x10] sm:$0xff]  ;;  %v875_v56 = vld [vmem:[%s11265_s11 + $0x18] sm:$0xff]  ;;  %s7625_s23 = sshll.u32 %s9735_s29, 3 }
  0x2e   : > { %v872_v49 = vld [vmem:[%s11265_s11] sm:$0xff]  ;;  %v9036_v57 = vpack.c.bf16 %v875_v56, %v874_v55  ;;  %v893_v6 = vld [vmem:[%s11219_s13 + $0x8] sm:$0xff]  ;;  %v894_v11 = vld [vmem:[%s11219_s13 + $0x10] sm:$0xff] }
  0x2f   : > { %9004 = vmatpush1.bf16.msra.mxu0 %v9003_v9  ;;  %v9033_v51 = vpack.c.bf16 %v873_v50, %v872_v49  ;;  %v7627_v2 = vld [vmem:[%s11215_s9] ss:$0 sm:$0xff]  ;;  %v895_v12 = vld [vmem:[%s11219_s13 + $0x18] sm:$0xff]  ;;  %v913_v15 = vld [vmem:[%s11221_s15 + $0x8] sm:$0xff]  ;;  %s736_s1 = scalar_lea.vmem %s11267_s28, %s7625_s23  ;;  %s7622_s23 = sshll.u32 %s725_s25, 3 }
  0x30   : > { %9005 = vmatprep.subr.bf16.mxu0 %v9544_v3  ;;  %v892_v5 = vld [vmem:[%s11219_s13] sm:$0xff]  ;;  %v914_v17 = vld [vmem:[%s11221_s15 + $0x10] sm:$0xff]  ;;  %v915_v18 = vld [vmem:[%s11221_s15 + $0x18] sm:$0xff]  ;;  %s739_s4 = scalar_lea.vmem %s11268_s6, %s9735_s29  ;;  %s11273_s29 = sld [smem:[#allocation17_spill]] }
  0x31   : > { %9034 = vmatpush3.bf16.msra.mxu1 %v9033_v51  ;;  %v7628_v7 = vld [vmem:[%s11216_s10] ss:$0 sm:$0xff]  ;;  %v9039_v9 = vpack.c.bf16 %v893_v6, %v892_v5  ;;  %v7645_v20 = vld [vmem:[%s11222_s16 + $0x1] ss:$0 sm:$0xff]  ;;  %v877_v49 = vld [vmem:[%s11265_s11 + $0x28] sm:$0xff]  ;;  %s727_s2 = scalar_lea.vmem [#allocation2], %s7622_s23 }
  0x32   : > { %9035 = vmatprep.subr.bf16.mxu1 %v9544_v3  ;;  %v912_v14 = vld [vmem:[%s11221_s15] sm:$0xff]  ;;  %v878_v55 = vld [vmem:[%s11265_s11 + $0x30] sm:$0xff]  ;;  %v879_v56 = vld [vmem:[%s11265_s11 + $0x38] sm:$0xff]  ;;  %s7538_s6 = sshll.u32 %s727_s2, 4  ;;  %s11165_s6 = int_to_ptr.vmem [resolvable:$true] %s7538_s6 }
  0x33   : > { %9007 = vmatpush1.bf16.msra.mxu0 %v9006_v13  ;;  %v9042_v13 = vpack.c.bf16 %v895_v12, %v894_v11  ;;  %v7632_v26 = vld [vmem:[%s11220_s14] ss:$0 sm:$0xff]  ;;  %v7643_v6 = vld [vmem:[%s11220_s14 + $0x1] ss:$0 sm:$0xff] }
  0x34   : > { %9008 = vmatprep.subr.bf16.mxu0 %v9544_v3  ;;  %v7634_v32 = vld [vmem:[%s11222_s16] ss:$0 sm:$0xff] }
  0x35   : > { %9037 = vmatpush3.bf16.msra.mxu1 %v9036_v57  ;;  %v9054_v57 = vpack.c.bf16 %v879_v56, %v878_v55  ;;  %v7654_v56 = vld [vmem:[%s11220_s14 + $0x2] ss:$0 sm:$0xff] }
  0x36   : > { %9038 = vmatprep.subr.bf16.mxu1 %v9544_v3 }
  0x37   : > { %9010 = vmatpush1.bf16.msra.mxu0 %v9009_v16  ;;  %v9045_v16 = vpack.c.bf16 %v913_v15, %v912_v14 }
  0x38   : > { %9011 = vmatprep.subr.bf16.mxu0 %v9544_v3 }
  0x3b   : > { %9013 = vmatpush1.bf16.msra.mxu0 %v9012_v19  ;;  %v9048_v19 = vpack.c.bf16 %v915_v18, %v914_v17 }
  0x3c   : > { %9014 = vmatprep.subr.bf16.mxu0 %v9544_v3 }
  0x3f   : > { %9016 = vmatpush1.bf16.msra.mxu0 %v9015_v22 }
  0x40   : > { %9017 = vmatprep.subr.bf16.mxu0 %v9544_v3 }
  0x43   : > { %9019 = vmatpush1.bf16.msra.mxu0 %v9018_v25 }
  0x44   : > { %9020 = vmatprep.subr.bf16.mxu0 %v9544_v3 }
  0x47   : > { %9022 = vmatpush1.bf16.msra.mxu0 %v9021_v28  ;;  %v7630_v28 = vld [vmem:[%s11266_s12] ss:$0 sm:$0xff] }
  0x48   : > { %9023 = vmatprep.subr.bf16.mxu0 %v9544_v3 }
  0x4b   : > { %9025 = vmatpush1.bf16.msra.mxu0 %v9024_v31 }
  0x4c   : > { %9026 = vmatprep.subr.bf16.mxu0 %v9544_v3 }
  0x4f   : > { %9028 = vmatpush1.bf16.msra.mxu0 %v9027_v34 }
  0x50   : > { %9029 = vmatprep.subr.bf16.mxu0 %v9544_v3 }
  0x53   : > { %9031 = vmatpush1.bf16.msra.mxu0 %v9030_v37 }
  0x54   : > { %9062 = vmatprep.subr.bf16.mxu0 %v9544_v3 }
  0x56   : > { %836 = vmatmul.mubr.f32.vlgmr.msra.gmra.mrb[0].mxu0 %v740_v38 }
  0x57   : > { %9064 = vmatpush3.bf16.msra.mxu0 %v9063_v54  ;;  %8366 = vmatprep.mubr.msk.f32.mxu0 %vm9545_vm2, %v9546_v61 }
  0x58   : > { %9065 = vmatprep.subr.bf16.mxu0 %v9544_v3 }
  0x5b   : > { %9067 = vmatpush3.bf16.msra.mxu0 %v9066_v60  ;;  %v9057_v60 = vpack.c.bf16 %v897_v59, %v896_v58  ;;  %v7652_v58 = vld [vmem:[%s11266_s12 + $0x2] ss:$0 sm:$0xff] }
  0x5c   : > { %8374 = vmatprep.subr.mxu0 %v9546_v61 }
 0x129   : > { %v837_v40 = vpop.f32.mrb[0].mxu0 }
 0x12a   : > { %v9821_v41 = vadd.f32 %v837_v40, %v766_v39  ;;  %v839_v42 = vpop.f32.mrb[1].mxu0 }
 0x12c   : > { %v844_v43 = vsel %vm843_vm1, %v9821_v41, 0.0 }
 0x12d   : > { %845 = vadd.xlane.f32.xlu0 %v844_v43 }
 0x1ba   : > { %v846_v44 = vpop.xlane.xlu0 %845 }
 0x1bb   : > { %v848_v45 = vmul.f32 0.03125, %v846_v44 }
 0x1bd   : > { %v849_v46 = vsub.f32 %v9821_v41, %v848_v45 }
 0x1bf   : > { %v850_v47 = vmul.f32 %v849_v46, %v849_v46 }
 0x1c1   : > { %v851_v48 = vsel %vm843_vm1, %v850_v47, 0.0 }
 0x1c2   : > { %852 = vadd.xlane.f32.xlu0 %v851_v48  ;;  %v876_v48 = vld [vmem:[%s11265_s11 + $0x20] sm:$0xff] }
 0x1c3   : > { %v9051_v52 = vpack.c.bf16 %v877_v49, %v876_v48 }
 0x24f   : > { %v853_v62 = vpop.xlane.xlu0 %852 }
 0x250   : > { %v854_v63 = vmul.f32 0.03125, %v853_v62  ;;  %v898_v62 = vld [vmem:[%s11219_s13 + $0x30] sm:$0xff] }
 0x252   : > { %v855_v0 = vadd.f32 1e-05, %v854_v63  ;;  %v899_v63 = vld [vmem:[%s11219_s13 + $0x38] sm:$0xff] }
 0x254   : > { %9414 = vrsqrt.f32 %v855_v0  ;;  %v9060_v0 = vpack.c.bf16 %v899_v63, %v898_v62  ;;  %v7656_v62 = vld [vmem:[%s11222_s16 + $0x2] ss:$0 sm:$0xff] }
 0x25e   : > { %v9415_v1 = vpop.eup %9414 }
 0x25f   : > { %v857_v4 = vmul.f32 %v9415_v1, %v849_v46  ;;  %v932_v46 = vld [vmem:[%s11223_s17] sm:$0xff] }
 0x261   : > { %v864_v8 = vmul.f32 %v7627_v2, %v857_v4 }
 0x263   : > { %v9871_v10 = vadd.f32 %v7628_v7, %v864_v8  ;;  %v7641_v8 = vld [vmem:[%s11266_s12 + $0x1] ss:$0 sm:$0xff] }
 0x265   : > { %8297 = vmatmul.mubr.msk.f32.vlgmr.msra.gmra.mrb[0].mxu1 %vm950_vm3, %v9871_v10  ;;  %8367 = vmatmul.mubr.msk.f32.vlgmr.msra.gmra.mrb[2].mxu0 %vm950_vm3, %v9871_v10 }
 0x266   : > { %9040 = vmatpush3.bf16.msra.mxu1 %v9039_v9  ;;  %8307 = vmatprep.mubr.msk.f32.mxu1 %vm9545_vm2, %v9546_v61 }
 0x267   : > { %9041 = vmatprep.subr.bf16.mxu1 %v9544_v3  ;;  %8376 = vmatprep.mubr.msk.f32.mxu0 %vm9545_vm2, %v9546_v61 }
 0x26a   : > { %9043 = vmatpush3.bf16.msra.mxu1 %v9042_v13 }
 0x26b   : > { %9044 = vmatprep.subr.bf16.mxu1 %v9544_v3 }
 0x26d   : > { %8308 = vmatmul.mubr.msk.f32.vlgmr.msra.gmra.mrb[2].mxu1 %vm950_vm3, %v9871_v10 }
 0x26e   : > { %9046 = vmatpush3.bf16.msra.mxu1 %v9045_v16  ;;  %8318 = vmatprep.mubr.msk.f32.mxu1 %vm9545_vm2, %v9546_v61 }
 0x26f   : > { %9047 = vmatprep.subr.bf16.mxu1 %v9544_v3 }
 0x272   : > { %9049 = vmatpush3.bf16.msra.mxu1 %v9048_v19 }
 0x273   : > { %8321 = vmatprep.subr.mxu1 %v9546_v61 }
 0x275   : > { %8319 = vmatmul.mubr.msk.f32.vlgmr.msra.gmra.mrb[4].mxu1 %vm950_vm3, %v9871_v10 }
 0x276   : > { %8323 = vmatprep.mubr.msk.f32.mxu1 %vm9545_vm2, %v9546_v61 }
 0x338   : > { %v1020_v21 = vpop.f32.mrb[0].mxu1  ;;  %v1642_v22 = vpop.f32.mrb[2].mxu0 }
 0x339   : > { %v1643_v23 = vadd.f32 %v7645_v20, %v1642_v22  ;;  %v8298_v24 = vpop.f32.mrb[1].mxu1  ;;  %v8368_v25 = vpop.f32.mrb[3].mxu0  ;;  %v1021_v31 = vadd.f32 %v7630_v28, %v1020_v21  ;;  %v880_v20 = vld [vmem:[%s11265_s11 + $0x40] sm:$0xff]  ;;  %v881_v21 = vld [vmem:[%s11265_s11 + $0x48] sm:$0xff] }
 0x33a   : > { %v9069_v22 = vpack.c.bf16 %v881_v21, %v880_v20  ;;  %v883_v24 = vld [vmem:[%s11265_s11 + $0x58] sm:$0xff]  ;;  %v920_v28 = vld [vmem:[%s11221_s15 + $0x40] sm:$0xff]  ;;  %v926_v21 = vld [vmem:[%s11221_s15 + $0x70] sm:$0xff] }
 0x33b   : > { %8375 = vmatpush3.msk.msra.mxu0 %vm1269_vm4, %v1643_v23  ;;  %v882_v23 = vld [vmem:[%s11265_s11 + $0x50] sm:$0xff] }
 0x33c   : > { %9068 = vmatprep.subr.bf16.mxu0 %v9544_v3 }
 0x340   : > { %v1096_v27 = vpop.f32.mrb[2].mxu1 }
 0x341   : > { %v1097_v29 = vadd.f32 %v7632_v26, %v1096_v27  ;;  %v8309_v30 = vpop.f32.mrb[3].mxu1  ;;  %v9072_v27 = vpack.c.bf16 %v883_v24, %v882_v23  ;;  %v934_v24 = vld [vmem:[%s11223_s17 + $0x10] sm:$0xff] }
 0x343   : > { %8322 = vmatpush3.xpose.msk.msra.mxu1 %vm1176_vm5, %v1097_v29  ;;  %v921_v29 = vld [vmem:[%s11221_s15 + $0x48] sm:$0xff] }
 0x344   : > { %8326 = vmatprep.subr.mxu1 %v9546_v61  ;;  %v9081_v30 = vpack.c.bf16 %v921_v29, %v920_v28 }
 0x346   : > { %8324 = vmatmul.mubr.msk.f32.vlgmr.msra.gmra.mrb[6].mxu1 %vm1176_vm5, %v1021_v31  ;;  %v922_v31 = vld [vmem:[%s11221_s15 + $0x50] sm:$0xff] }
 0x347   : > { %8328 = vmatprep.mubr.msk.f32.mxu1 %vm9545_vm2, %v9546_v61 }
 0x348   : > { %v1172_v33 = vpop.f32.mrb[4].mxu1 }
 0x349   : > { %v1173_v34 = vadd.f32 %v7634_v32, %v1172_v33  ;;  %v8320_v35 = vpop.f32.mrb[5].mxu1  ;;  %v923_v32 = vld [vmem:[%s11221_s15 + $0x58] sm:$0xff] }
 0x34a   : > { %v9084_v33 = vpack.c.bf16 %v923_v32, %v922_v31 }
 0x34b   : > { %8327 = vmatpush3.msk.msra.mxu1 %vm1269_vm4, %v1173_v34  ;;  %v933_v34 = vld [vmem:[%s11223_s17 + $0x8] sm:$0xff] }
 0x34c   : > { %8331 = vmatprep.subr.mxu1 %v9546_v61 }
 0x419   : > { %v1249_v36 = vpop.f32.mrb[6].mxu1 }
 0x41a   : > { %v1253_v37 = vmul.f32 0.35355338, %v1249_v36  ;;  %v8325_v38 = vpop.f32.mrb[7].mxu1  ;;  %v900_v36 = vld [vmem:[%s11219_s13 + $0x40] sm:$0xff] }
 0x41c   : > { %v1255_v39 = vsel %vm1254_vm6, %v1253_v37, -inf }
 0x41d   : > { %1256 = vmax.xlane.f32.xlu1 %v1255_v39 }
 0x4aa   : > { %v1257_v40 = vpop.xlane.xlu1 %1256 }
 0x4ab   : > { %v1258_v42 = vsub.f32 %v1253_v37, %v1257_v40  ;;  %v901_v37 = vld [vmem:[%s11219_s13 + $0x48] sm:$0xff] }
 0x4ac   : > { %v9075_v40 = vpack.c.bf16 %v901_v37, %v900_v36 }
 0x4ad   : > { %v1259_v43 = vmul.f32 1.442695, %v1258_v42 }
 0x4af   : > { %9416 = vpow2.f32 %v1259_v43 }
 0x4b9   : > { %v9417_v44 = vpop.eup %9416 }
 0x4ba   : > { %8329 = vmatmul.mubr.msk.f32.vlgmr.msra.gmra.mrb[8].mxu1 %vm1265_vm7, %v9417_v44  ;;  %v1261_v45 = vsel %vm1254_vm6, %v9417_v44, 0.0  ;;  %v902_v44 = vld [vmem:[%s11219_s13 + $0x50] sm:$0xff] }
 0x4bb   : > { %1262 = vadd.xlane.f32.xlu1 %v1261_v45  ;;  %8333 = vmatprep.mubr.msk.f32.mxu1 %vm9545_vm2, %v9546_v61  ;;  %v903_v45 = vld [vmem:[%s11219_s13 + $0x58] sm:$0xff] }
 0x4bc   : > { %8332 = vmatpush3.msra.mxu1 %v932_v46  ;;  %v9078_v46 = vpack.c.bf16 %v903_v45, %v902_v44  ;;  %v7665_v44 = vld [vmem:[%s11220_s14 + $0x3] ss:$0 sm:$0xff] }
 0x4bd   : > { %9050 = vmatprep.subr.bf16.mxu1 %v9544_v3 }
 0x548   : > { %v1263_v47 = vpop.xlane.xlu1 %1262 }
 0x549   : > { %9418 = vrcp.f32 %v1263_v47 }
 0x553   : > { %v9419_v50 = vpop.eup %9418 }
 0x58d   : > { %v1339_v51 = vpop.f32.mrb[8].mxu1 }
 0x58e   : > { %v1343_v53 = vmul.f32 %v9419_v50, %v1339_v51  ;;  %v8330_v54 = vpop.f32.mrb[9].mxu1  ;;  %v7629_v51 = vld [vmem:[%s11224_s18] ss:$0 sm:$0xff] }
 0x590   : > { %8334 = vmatmul.mubr.msk.f32.vlgmr.msra.gmra.mrb[10].mxu1 %vm1176_vm5, %v1343_v53 }
 0x591   : > { %9052 = vmatpush3.bf16.msra.mxu1 %v9051_v52  ;;  %8344 = vmatprep.mubr.msk.f32.mxu1 %vm9545_vm2, %v9546_v61 }
 0x592   : > { %9053 = vmatprep.subr.bf16.mxu1 %v9544_v3 }
 0x595   : > { %9055 = vmatpush3.bf16.msra.mxu1 %v9054_v57 }
 0x596   : > { %9056 = vmatprep.subr.bf16.mxu1 %v9544_v3 }
 0x598   : > { %8345 = vmatmul.mubr.msk.f32.vlgmr.msra.gmra.mrb[12].mxu1 %vm950_vm3, %v9871_v10 }
 0x599   : > { %9058 = vmatpush3.bf16.msra.mxu1 %v9057_v60  ;;  %8355 = vmatprep.mubr.msk.f32.mxu1 %vm9545_vm2, %v9546_v61 }
 0x59a   : > { %9059 = vmatprep.subr.bf16.mxu1 %v9544_v3 }
 0x59d   : > { %9061 = vmatpush3.bf16.msra.mxu1 %v9060_v0 }
 0x59e   : > { %8369 = vmatprep.subr.mxu1 %v9546_v61 }
 0x5a0   : > { %8356 = vmatmul.mubr.msk.f32.vlgmr.msra.gmra.mrb[14].mxu1 %vm950_vm3, %v9871_v10 }
 0x5a1   : > { %8371 = vmatprep.mubr.msk.f32.mxu1 %vm9545_vm2, %v9546_v61 }
 0x663   : > { %v9980_v1 = vpop.f32.mrb[10].mxu1 }
 0x664   : > { %v8335_v2 = vpop.f32.mrb[11].mxu1  ;;  %v1417_v52 = vadd.f32 %v7629_v51, %v9980_v1 }
 0x66b   : > { %v1490_v4 = vpop.f32.mrb[12].mxu1 }
 0x66c   : > { %v8346_v5 = vpop.f32.mrb[13].mxu1  ;;  %v1491_v12 = vadd.f32 %v7641_v8, %v1490_v4 }
 0x673   : > { %v1566_v7 = vpop.f32.mrb[14].mxu1 }
 0x674   : > { %v1567_v9 = vadd.f32 %v7643_v6, %v1566_v7  ;;  %v8357_v11 = vpop.f32.mrb[15].mxu1 }
 0x675   : > { %v885_v11 = vld [vmem:[%s11265_s11 + $0x68] sm:$0xff] }
 0x676   : > { %8370 = vmatpush3.xpose.msk.msra.mxu1 %vm1176_vm5, %v1567_v9  ;;  %v884_v9 = vld [vmem:[%s11265_s11 + $0x60] sm:$0xff] }
 0x677   : > { %8379 = vmatprep.subr.mxu1 %v9546_v61 }
 0x679   : > { %8372 = vmatmul.mubr.msk.f32.vlgmr.msra.gmra.mrb[16].mxu1 %vm1176_vm5, %v1491_v12  ;;  %v9087_v12 = vpack.c.bf16 %v885_v11, %v884_v9 }
 0x67a   : > { %8381 = vmatprep.mubr.msk.f32.mxu1 %vm9545_vm2, %v9546_v61  ;;  %8380 = vmatpush3.msra.mxu1 %v933_v34  ;;  %v907_v34 = vld [vmem:[%s11219_s13 + $0x78] sm:$0xff] }
 0x67b   : > { %9074 = vmatprep.subr.bf16.mxu1 %v9544_v3 }
 0x74c   : > { %v1718_v13 = vpop.f32.mrb[16].mxu1 }
 0x74d   : > { %v1722_v14 = vmul.f32 0.35355338, %v1718_v13  ;;  %v8373_v15 = vpop.f32.mrb[17].mxu1  ;;  %v886_v13 = vld [vmem:[%s11265_s11 + $0x70] sm:$0xff] }
 0x74f   : > { %v1723_v16 = vsel %vm1254_vm6, %v1722_v14, -inf }
 0x750   : > { %1724 = vmax.xlane.f32.xlu0 %v1723_v16 }
 0x7dd   : > { %v1725_v17 = vpop.xlane.xlu0 %1724 }
 0x7de   : > { %v1726_v18 = vsub.f32 %v1722_v14, %v1725_v17  ;;  %v887_v14 = vld [vmem:[%s11265_s11 + $0x78] sm:$0xff] }
 0x7df   : > { %v9090_v17 = vpack.c.bf16 %v887_v14, %v886_v13 }
 0x7e0   : > { %v1727_v19 = vmul.f32 1.442695, %v1726_v18  ;;  %v924_v18 = vld [vmem:[%s11221_s15 + $0x60] sm:$0xff] }
 0x7e2   : > { %9420 = vpow2.f32 %v1727_v19  ;;  %v925_v19 = vld [vmem:[%s11221_s15 + $0x68] sm:$0xff] }
 0x7e3   : > { %v9099_v20 = vpack.c.bf16 %v925_v19, %v924_v18  ;;  %v2851_v18 = vld [vmem:[%s11225_s19 + $0x18] sm:$0xff] }
 0x7ec   : > { %v9421_v25 = vpop.eup %9420 }
 0x7ed   : > { %8377 = vmatmul.mubr.msk.f32.vlgmr.msra.gmra.mrb[4].mxu0 %vm1265_vm7, %v9421_v25  ;;  %v1729_v26 = vsel %vm1254_vm6, %v9421_v25, 0.0 }
 0x7ee   : > { %9070 = vmatpush3.bf16.msra.mxu0 %v9069_v22  ;;  %1730 = vadd.xlane.f32.xlu1 %v1729_v26  ;;  %v927_v22 = vld [vmem:[%s11221_s15 + $0x78] sm:$0xff]  ;;  %v904_v26 = vld [vmem:[%s11219_s13 + $0x60] sm:$0xff] }
 0x7ef   : > { %9071 = vmatprep.subr.bf16.mxu0 %v9544_v3  ;;  %8392 = vmatprep.mubr.msk.f32.mxu0 %vm9545_vm2, %v9546_v61  ;;  %v9102_v23 = vpack.c.bf16 %v927_v22, %v926_v21  ;;  %v2854_v21 = vld [vmem:[%s11227_s21 + $0x8] sm:$0xff]  ;;  %v9547_v22 = vmov 0  }
 0x7f0   : > { %9413 = vset.pattern.permute.xlu0 %v9547_v22 }
 0x7f2   : > { %9073 = vmatpush3.bf16.msra.mxu0 %v9072_v27  ;;  %v905_v27 = vld [vmem:[%s11219_s13 + $0x68] sm:$0xff] }
 0x7f3   : > { %9080 = vmatprep.subr.bf16.mxu0 %v9544_v3 }
 0x7f5   : > { %8393 = vmatmul.mubr.msk.f32.vlgmr.msra.gmra.mrb[6].mxu0 %vm950_vm3, %v9871_v10 }
 0x7f6   : > { %9082 = vmatpush3.bf16.msra.mxu0 %v9081_v30  ;;  %8414 = vmatprep.mubr.msk.f32.mxu0 %vm9545_vm2, %v9546_v61  ;;  %v9093_v30 = vpack.c.bf16 %v905_v27, %v904_v26 }
 0x7f7   : > { %9083 = vmatprep.subr.bf16.mxu0 %v9544_v3 }
 0x7fa   : > { %9085 = vmatpush3.bf16.msra.mxu0 %v9084_v33  ;;  %v906_v33 = vld [vmem:[%s11219_s13 + $0x70] sm:$0xff] }
 0x7fb   : > { %8427 = vmatprep.subr.mxu0 %v9546_v61 }
 0x7fd   : > { %8415 = vmatmul.mubr.msk.f32.vlgmr.msra.gmra.mrb[8].mxu0 %vm950_vm3, %v9871_v10 }
 0x7fe   : > { %8429 = vmatprep.mubr.msk.f32.mxu0 %vm9545_vm2, %v9546_v61  ;;  %8428 = vmatpush3.msra.mxu0 %v934_v24  ;;  %v3156_v24 = vld [vmem:[%s736_s1] sm:$0xff]  ;;  %s7960_s1 = sshll.u32 %s9692_s5, 7  ;;  %s9550_s5 = smov [#allocation2]  }
 0x7ff   : > { %9092 = vmatprep.subr.bf16.mxu0 %v9544_v3  ;;  %s9484_s23 = sshll.u32 %s9550_s5, 4  ;;  %s9485_s23 = int_to_ptr.vmem [resolvable:$false] %s9484_s23 }
 0x800   : > { %s9486_s3 = scalar_lea.vmem %s9485_s23, 256  ;;  %p9487_p0 = scmp.lt.s32.totalorder %s11165_s6, %s9485_s23 }
 0x87b   : > { %v1731_v35 = vpop.xlane.xlu1 %1730 }
 0x87c   : > { %9422 = vrcp.f32 %v1731_v35  ;;  %v9096_v35 = vpack.c.bf16 %v907_v34, %v906_v33  ;;  %v2855_v34 = vld [vmem:[%s11227_s21 + $0x10] sm:$0xff] }
 0x886   : > { %v9423_v38 = vpop.eup %9422 }
 0x8c0   : > { %v1805_v39 = vpop.f32.mrb[4].mxu0 }
 0x8c1   : > { %v1809_v42 = vmul.f32 %v9423_v38, %v1805_v39  ;;  %v8378_v43 = vpop.f32.mrb[5].mxu0 }
 0x8c3   : > { %8382 = vmatmul.mubr.msk.f32.vlgmr.msra.gmra.mrb[18].mxu1 %vm1176_vm5, %v1809_v42 }
 0x8c4   : > { %9076 = vmatpush3.bf16.msra.mxu1 %v9075_v40  ;;  %8403 = vmatprep.mubr.msk.f32.mxu1 %vm9545_vm2, %v9546_v61 }
 0x8c5   : > { %9077 = vmatprep.subr.bf16.mxu1 %v9544_v3 }
 0x8c8   : > { %v1956_v47 = vpop.f32.mrb[6].mxu0  ;;  %9079 = vmatpush3.bf16.msra.mxu1 %v9078_v46  ;;  %v7663_v46 = vld [vmem:[%s11266_s12 + $0x3] ss:$0 sm:$0xff] }
 0x8c9   : > { %v8394_v48 = vpop.f32.mrb[7].mxu0  ;;  %8417 = vmatprep.subr.mxu1 %v9546_v61  ;;  %v1957_v63 = vadd.f32 %v7652_v58, %v1956_v47 }
 0x8ca   : > { %v7667_v48 = vld [vmem:[%s11222_s16 + $0x3] ss:$0 sm:$0xff] }
 0x8cb   : > { %8404 = vmatmul.mubr.msk.f32.vlgmr.msra.gmra.mrb[20].mxu1 %vm950_vm3, %v9871_v10 }
 0x8cc   : > { %8419 = vmatprep.mubr.msk.f32.mxu1 %vm9545_vm2, %v9546_v61 }
 0x8d0   : > { %v2108_v49 = vpop.f32.mrb[8].mxu0 }
 0x8d1   : > { %v8416_v50 = vpop.f32.mrb[9].mxu0  ;;  %v2109_v0 = vadd.f32 %v7656_v62, %v2108_v49 }
 0x996   : > { %v1879_v53 = vpop.f32.mrb[18].mxu1 }
 0x997   : > { %v10063_v54 = vadd.f32 %v1879_v53, %v1417_v52  ;;  %v8383_v55 = vpop.f32.mrb[19].mxu1 }
 0x99e   : > { %v2032_v57 = vpop.f32.mrb[20].mxu1 }
 0x99f   : > { %v2033_v59 = vadd.f32 %v7654_v56, %v2032_v57  ;;  %v8405_v60 = vpop.f32.mrb[21].mxu1 }
 0x9a0   : > { %v935_v60 = vld [vmem:[%s11223_s17 + $0x18] sm:$0xff] }
 0x9a1   : > { %8418 = vmatpush3.xpose.msk.msra.mxu1 %vm1176_vm5, %v2033_v59 }
 0x9a2   : > { %8422 = vmatprep.subr.mxu1 %v9546_v61 }
 0x9a4   : > { %8420 = vmatmul.mubr.msk.f32.vlgmr.msra.gmra.mrb[22].mxu1 %vm1176_vm5, %v1957_v63 }
 0x9a5   : > { %8423 = vmatpush3.msk.msra.mxu1 %vm1269_vm4, %v2109_v0  ;;  %8424 = vmatprep.mubr.msk.f32.mxu1 %vm9545_vm2, %v9546_v61 }
 0x9a6   : > { %9086 = vmatprep.subr.bf16.mxu1 %v9544_v3 }
 0xa77   : > { %v2184_v1 = vpop.f32.mrb[22].mxu1 }
 0xa78   : > { %v2188_v2 = vmul.f32 0.35355338, %v2184_v1  ;;  %v8421_v4 = vpop.f32.mrb[23].mxu1 }
 0xa7a   : > { %v2189_v5 = vsel %vm1254_vm6, %v2188_v2, -inf }
 0xa7b   : > { %2190 = vmax.xlane.f32.xlu0 %v2189_v5 }
 0xb08   : > { %v2191_v6 = vpop.xlane.xlu0 %2190 }
 0xb09   : > { %v2192_v7 = vsub.f32 %v2188_v2, %v2191_v6 }
 0xb0b   : > { %v2193_v8 = vmul.f32 1.442695, %v2192_v7 }
 0xb0d   : > { %9424 = vpow2.f32 %v2193_v8 }
 0xb17   : > { %v9425_v15 = vpop.eup %9424 }
 0xb18   : > { %8425 = vmatmul.mubr.msk.f32.vlgmr.msra.gmra.mrb[24].mxu1 %vm1265_vm7, %v9425_v15  ;;  %v2195_v16 = vsel %vm1254_vm6, %v9425_v15, 0.0  ;;  %v2848_v15 = vld [vmem:[%s11225_s19] sm:$0xff] }
 0xb19   : > { %9088 = vmatpush3.bf16.msra.mxu1 %v9087_v12  ;;  %2196 = vadd.xlane.f32.xlu1 %v2195_v16 }
 0xb1a   : > { %9089 = vmatprep.subr.bf16.mxu1 %v9544_v3  ;;  %8440 = vmatprep.mubr.msk.f32.mxu1 %vm9545_vm2, %v9546_v61 }
 0xb1d   : > { %9091 = vmatpush3.bf16.msra.mxu1 %v9090_v17  ;;  %v2850_v17 = vld [vmem:[%s11225_s19 + $0x10] sm:$0xff] }
 0xb1e   : > { %9098 = vmatprep.subr.bf16.mxu1 %v9544_v3  ;;  %v9108_v19 = vpack.c.bf16 %v2851_v18, %v2850_v17  ;;  %v3167_v18 = vld [vmem:[%s11271_s26 + $0x10] sm:$0xff] }
 0xb20   : > { %8441 = vmatmul.mubr.msk.f32.vlgmr.msra.gmra.mrb[26].mxu1 %vm950_vm3, %v9871_v10 }
 0xb21   : > { %9100 = vmatpush3.bf16.msra.mxu1 %v9099_v20  ;;  %8462 = vmatprep.mubr.msk.f32.mxu1 %vm9545_vm2, %v9546_v61  ;;  %v2853_v20 = vld [vmem:[%s11227_s21] sm:$0xff] }
 0xb22   : > { %9101 = vmatprep.subr.bf16.mxu1 %v9544_v3 }
 0xb25   : > { %9103 = vmatpush3.bf16.msra.mxu1 %v9102_v23  ;;  %v9111_v23 = vpack.c.bf16 %v2854_v21, %v2853_v20  ;;  %v3169_v21 = vld [vmem:[%s11271_s26 + $0x20] sm:$0xff] }
 0xb26   : > { %8475 = vmatprep.subr.mxu1 %v9546_v61 }
 0xb28   : > { %8463 = vmatmul.mubr.msk.f32.vlgmr.msra.gmra.mrb[28].mxu1 %vm950_vm3, %v9871_v10 }
 0xb29   : > { %8477 = vmatprep.mubr.msk.f32.mxu1 %vm9545_vm2, %v9546_v61  ;;  %8476 = vmatpush3.msra.mxu1 %v935_v60 }
 0xb2a   : > { %9110 = vmatprep.subr.bf16.mxu1 %v9544_v3 }
 0xba6   : > { %v2197_v25 = vpop.xlane.xlu1 %2196 }
 0xba7   : > { %9426 = vrcp.f32 %v2197_v25 }
 0xbb1   : > { %v9427_v28 = vpop.eup %9426 }
 0xbeb   : > { %v2271_v29 = vpop.f32.mrb[24].mxu1 }
 0xbec   : > { %v2275_v31 = vmul.f32 %v9427_v28, %v2271_v29  ;;  %v8426_v32 = vpop.f32.mrb[25].mxu1  ;;  %v7676_v29 = vld [vmem:[%s11215_s9 + $0x1] ss:$0 sm:$0xff] }
 0xbee   : > { %8430 = vmatmul.mubr.msk.f32.vlgmr.msra.gmra.mrb[10].mxu0 %vm1176_vm5, %v2275_v31  ;;  %v7677_v31 = vld [vmem:[%s11216_s10 + $0x1] ss:$0 sm:$0xff] }
 0xbef   : > { %9094 = vmatpush3.bf16.msra.mxu0 %v9093_v30  ;;  %8451 = vmatprep.mubr.msk.f32.mxu0 %vm9545_vm2, %v9546_v61 }
 0xbf0   : > { %9095 = vmatprep.subr.bf16.mxu0 %v9544_v3 }
 0xbf3   : > { %v2422_v36 = vpop.f32.mrb[26].mxu1  ;;  %9097 = vmatpush3.bf16.msra.mxu0 %v9096_v35  ;;  %v2856_v35 = vld [vmem:[%s11227_s21 + $0x18] sm:$0xff] }
 0xbf4   : > { %v8442_v37 = vpop.f32.mrb[27].mxu1  ;;  %8465 = vmatprep.subr.mxu0 %v9546_v61  ;;  %v2423_v49 = vadd.f32 %v7663_v46, %v2422_v36  ;;  %v9114_v36 = vpack.c.bf16 %v2856_v35, %v2855_v34  ;;  %v3173_v35 = vld [vmem:[%s11272_s8] sm:$0xff] }
 0xbf5   : > { %v2857_v37 = vld [vmem:[%s11227_s21 + $0x20] sm:$0xff] }
 0xbf6   : > { %8452 = vmatmul.mubr.msk.f32.vlgmr.msra.gmra.mrb[12].mxu0 %vm950_vm3, %v9871_v10 }
 0xbf7   : > { %8467 = vmatprep.mubr.msk.f32.mxu0 %vm9545_vm2, %v9546_v61 }
 0xbfb   : > { %v2574_v38 = vpop.f32.mrb[28].mxu1 }
 0xbfc   : > { %v8464_v39 = vpop.f32.mrb[29].mxu1  ;;  %v2575_v50 = vadd.f32 %v7667_v48, %v2574_v38  ;;  %v2858_v38 = vld [vmem:[%s11227_s21 + $0x28] sm:$0xff] }
 0xbfd   : > { %v9117_v39 = vpack.c.bf16 %v2858_v38, %v2857_v37 }
 0xcc1   : > { %v2345_v40 = vpop.f32.mrb[10].mxu0 }
 0xcc2   : > { %v2349_v42 = vadd.f32 %v2345_v40, %v10063_v54  ;;  %v8431_v43 = vpop.f32.mrb[11].mxu0  ;;  %v2859_v40 = vld [vmem:[%s11227_s21 + $0x30] sm:$0xff] }
 0xcc9   : > { %v2498_v45 = vpop.f32.mrb[12].mxu0 }
 0xcca   : > { %v2499_v47 = vadd.f32 %v7665_v44, %v2498_v45  ;;  %v8453_v10 = vpop.f32.mrb[13].mxu0  ;;  %v2861_v44 = vld [vmem:[%s11227_s21 + $0x40] sm:$0xff]  ;;  %v2862_v45 = vld [vmem:[%s11227_s21 + $0x48] sm:$0xff] }
 0xccb   : > { %v9123_v46 = vpack.c.bf16 %v2862_v45, %v2861_v44  ;;  %v2864_v10 = vld [vmem:[%s11227_s21 + $0x58] sm:$0xff] }
 0xccc   : > { %8466 = vmatpush3.xpose.msk.msra.mxu0 %vm1176_vm5, %v2499_v47  ;;  %v2863_v47 = vld [vmem:[%s11227_s21 + $0x50] sm:$0xff] }
 0xccd   : > { %8470 = vmatprep.subr.mxu0 %v9546_v61  ;;  %v9126_v48 = vpack.c.bf16 %v2864_v10, %v2863_v47 }
 0xccf   : > { %8468 = vmatmul.mubr.msk.f32.vlgmr.msra.gmra.mrb[14].mxu0 %vm1176_vm5, %v2423_v49  ;;  %v2865_v49 = vld [vmem:[%s11227_s21 + $0x60] sm:$0xff] }
 0xcd0   : > { %8471 = vmatpush3.msk.msra.mxu0 %vm1269_vm4, %v2575_v50  ;;  %8472 = vmatprep.mubr.msk.f32.mxu0 %vm9545_vm2, %v9546_v61  ;;  %v2866_v50 = vld [vmem:[%s11227_s21 + $0x68] sm:$0xff] }
 0xcd1   : > { %9104 = vmatprep.subr.bf16.mxu0 %v9544_v3 }
 0xda2   : > { %v2650_v51 = vpop.f32.mrb[14].mxu0 }
 0xda3   : > { %v2654_v52 = vmul.f32 0.35355338, %v2650_v51  ;;  %v8469_v53 = vpop.f32.mrb[15].mxu0  ;;  %v9129_v51 = vpack.c.bf16 %v2866_v50, %v2865_v49  ;;  %v3068_v49 = vld [vmem:[%s11273_s29] sm:$0xff] }
 0xda4   : > { %v2868_v53 = vld [vmem:[%s11227_s21 + $0x78] sm:$0xff]  ;;  %v7714_v50 = vld [vmem:[%s11219_s13 + $0x80] sm:$0xff] }
 0xda5   : > { %v2655_v54 = vsel %vm1254_vm6, %v2654_v52, -inf }
 0xda6   : > { %2656 = vmax.xlane.f32.xlu0 %v2655_v54 }
 0xe33   : > { %v2657_v55 = vpop.xlane.xlu0 %2656 }
 0xe34   : > { %v2658_v56 = vsub.f32 %v2654_v52, %v2657_v55  ;;  %v2867_v52 = vld [vmem:[%s11227_s21 + $0x70] sm:$0xff]  ;;  %v3157_v55 = vlaneseq }
 0xe35   : > { %v9132_v54 = vpack.c.bf16 %v2868_v53, %v2867_v52  ;;  %v7716_v53 = vld [vmem:[%s11219_s13 + $0x90] sm:$0xff] }
 0xe36   : > { %v2659_v57 = vmul.f32 1.442695, %v2658_v56  ;;  %v3250_v56 = vld [vmem:[%s739_s4] sm:$0x1] }
 0xe37   : > { %vm3251_vm8 = vcmp.gt.f32.partialorder %v3250_v56, 0.5 }
 0xe38   : > { %9428 = vpow2.f32 %v2659_v57  ;;  %v3248_v57 = vshrl.u32 %v3157_v55, 7 }
 0xe42   : > { %v9429_v58 = vpop.eup %9428 }
 0xe43   : > { %8473 = vmatmul.mubr.msk.f32.vlgmr.msra.gmra.mrb[16].mxu0 %vm1265_vm7, %v9429_v58  ;;  %v2661_v59 = vsel %vm1254_vm6, %v9429_v58, 0.0  ;;  %v3255_v58 = vsub.s32 0, %v3248_v57 }
 0xe44   : > { %2662 = vadd.xlane.f32.xlu1 %v2661_v59  ;;  %8488 = vmatprep.mubr.msk.f32.mxu0 %vm9545_vm2, %v9546_v61  ;;  %v3252_v59 = vsel %vm3251_vm8, 1, %v9547_v22  ;;  %v3170_v22 = vld [vmem:[%s11271_s26 + $0x28] sm:$0xff] }
 0xe45   : > { %v3256_v60 = vrot.slane %v3252_v59, %v3255_v58 }
 0xe47   : > { %vm3257_vm9 = vcmp.eq.s32.totalorder %v3256_v60, 1 }
 0xed1   : > { %v2663_v62 = vpop.xlane.xlu1 %2662 }
 0xed2   : > { %9430 = vrcp.f32 %v2663_v62  ;;  %v3158_v62 = vand.u32 127, %v3157_v55 }
 0xed4   : > { %vm3249_vm10 = vcmp.le.s32.totalorder %v3158_v62, %v3248_v57 }
 0xed5   : > { %vm10267_vm11 = vmand %vm3249_vm10, %vm3257_vm9 }
 0xedc   : > { %v9431_v63 = vpop.eup %9430 }
 0xf16   : > { %v2737_v0 = vpop.f32.mrb[16].mxu0 }
 0xf17   : > { %v2741_v1 = vmul.f32 %v9431_v63, %v2737_v0  ;;  %v8474_v2 = vpop.f32.mrb[17].mxu0  ;;  %v7678_v0 = vld [vmem:[%s11226_s20] ss:$0 sm:$0xff]  ;;  %v7699_v63 = vld [vmem:[%s11265_s11 + $0xa8] sm:$0xff] }
 0xf19   : > { %8478 = vmatmul.mubr.msk.f32.vlgmr.msra.gmra.mrb[30].mxu1 %vm1176_vm5, %v2741_v1 }
 0xf1a   : > { %8523 = vmatprep.mubr.msk.f32.mxu1 %vm9545_vm2, %v9546_v61  ;;  %9112 = vmatpush3.bf16.msra.mxu1 %v9111_v23  ;;  %v9141_v23 = vpack.c.bf16 %v3170_v22, %v3169_v21 }
 0xf1b   : > { %9113 = vmatprep.subr.bf16.mxu1 %v9544_v3 }
 0xf1e   : > { %9115 = vmatpush3.bf16.msra.mxu1 %v9114_v36 }
 0xf1f   : > { %9116 = vmatprep.subr.bf16.mxu1 %v9544_v3 }
 0xf22   : > { %9118 = vmatpush3.bf16.msra.mxu1 %v9117_v39 }
 0xf23   : > { %9119 = vmatprep.subr.bf16.mxu1 %v9544_v3 }
 0xfec   : > { %v2811_v4 = vpop.f32.mrb[30].mxu1 }
 0xfed   : > { %v2815_v5 = vadd.f32 %v2811_v4, %v2349_v42  ;;  %v8479_v6 = vpop.f32.mrb[31].mxu1  ;;  %v2860_v42 = vld [vmem:[%s11227_s21 + $0x38] sm:$0xff] }
 0xfee   : > { %v9120_v43 = vpack.c.bf16 %v2860_v42, %v2859_v40 }
 0xfef   : > { %v10177_v7 = vadd.f32 %v2815_v5, %v9821_v41  ;;  %v2849_v41 = vld [vmem:[%s11225_s19 + $0x8] sm:$0xff] }
 0xff0   : > { %v9105_v16 = vpack.c.bf16 %v2849_v41, %v2848_v15  ;;  %9121 = vmatpush3.bf16.msra.mxu1 %v9120_v43  ;;  %v3166_v15 = vld [vmem:[%s11271_s26 + $0x8] sm:$0xff] }
 0xff1   : > { %v2821_v8 = vsel %vm843_vm1, %v10177_v7, 0.0  ;;  %9122 = vmatprep.subr.bf16.mxu1 %v9544_v3 }
 0xff2   : > { %2822 = vadd.xlane.f32.xlu0 %v2821_v8  ;;  %9106 = vmatpush3.bf16.msra.mxu0 %v9105_v16 }
 0xff3   : > { %9107 = vmatprep.subr.bf16.mxu0 %v9544_v3 }
 0xff4   : > { %9124 = vmatpush3.bf16.msra.mxu1 %v9123_v46 }
 0xff5   : > { %9125 = vmatprep.subr.bf16.mxu1 %v9544_v3 }
 0xff6   : > { %9109 = vmatpush3.bf16.msra.mxu0 %v9108_v19  ;;  %v3168_v19 = vld [vmem:[%s11271_s26 + $0x18] sm:$0xff] }
 0xff7   : > { %v9138_v20 = vpack.c.bf16 %v3168_v19, %v3167_v18  ;;  %v7734_v18 = vld [vmem:[%s11221_s15 + $0x80] sm:$0xff]  ;;  %v7735_v19 = vld [vmem:[%s11221_s15 + $0x88] sm:$0xff] }
 0xff8   : > { %9127 = vmatpush3.bf16.msra.mxu1 %v9126_v48  ;;  %v9159_v22 = vpack.c.bf16 %v7735_v19, %v7734_v18 }
 0xff9   : > { %9128 = vmatprep.subr.bf16.mxu1 %v9544_v3 }
 0xffc   : > { %9130 = vmatpush3.bf16.msra.mxu1 %v9129_v51  ;;  %v7715_v51 = vld [vmem:[%s11219_s13 + $0x88] sm:$0xff] }
 0xffd   : > { %9131 = vmatprep.subr.bf16.mxu1 %v9544_v3  ;;  %v9153_v52 = vpack.c.bf16 %v7715_v51, %v7714_v50  ;;  %v7698_v51 = vld [vmem:[%s11265_s11 + $0xa0] sm:$0xff] }
0x1000   : > { %9133 = vmatpush3.bf16.msra.mxu1 %v9132_v54  ;;  %v7717_v54 = vld [vmem:[%s11219_s13 + $0x98] sm:$0xff] }
0x1001   : > { %9134 = vmatprep.subr.bf16.mxu1 %v9544_v3  ;;  %v9156_v55 = vpack.c.bf16 %v7717_v54, %v7716_v53  ;;  %v7700_v53 = vld [vmem:[%s11265_s11 + $0xb0] sm:$0xff]  ;;  %v7701_v54 = vld [vmem:[%s11265_s11 + $0xb8] sm:$0xff] }
0x1008   : > { %3160 = vperm.xlu0 %9413, %v3156_v24   ;;  %v3171_v24 = vld [vmem:[%s11271_s26 + $0x30] sm:$0xff] }
0x107f   : > { %v2823_v9 = vpop.xlane.xlu0 %2822 }
0x1080   : > { %v2824_v11 = vmul.f32 0.03125, %v2823_v9 }
0x1082   : > { %v2825_v12 = vsub.f32 %v10177_v7, %v2824_v11 }
0x1084   : > { %v2826_v13 = vmul.f32 %v2825_v12, %v2825_v12 }
0x1086   : > { %v2827_v14 = vsel %vm843_vm1, %v2826_v13, 0.0 }
0x1087   : > { %2828 = vadd.xlane.f32.xlu1 %v2827_v14  ;;  %v3165_v14 = vld [vmem:[%s11271_s26] sm:$0xff] }
0x1088   : > { %v9135_v16 = vpack.c.bf16 %v3166_v15, %v3165_v14  ;;  %v7697_v14 = vld [vmem:[%s11265_s11 + $0x98] sm:$0xff] }
0x1114   : > { %v2829_v25 = vpop.xlane.xlu1 %2828 }
0x1115   : > { %v2830_v26 = vmul.f32 0.03125, %v2829_v25  ;;  %v3172_v25 = vld [vmem:[%s11271_s26 + $0x38] sm:$0xff] }
0x1117   : > { %v2831_v27 = vadd.f32 1e-05, %v2830_v26  ;;  %v3161_v26 = vpop.permute.xlu0 %3160 }
0x1118   : > { %vm3162_vm12 = vcmp.eq.s32.totalorder %v3158_v62, %v3161_v26 }
0x1119   : > { %9432 = vrsqrt.f32 %v2831_v27  ;;  %v9144_v27 = vpack.c.bf16 %v3172_v25, %v3171_v24  ;;  %v7736_v24 = vld [vmem:[%s11221_s15 + $0x90] sm:$0xff]  ;;  %v7737_v25 = vld [vmem:[%s11221_s15 + $0x98] sm:$0xff] }
0x111a   : > { %v9162_v26 = vpack.c.bf16 %v7737_v25, %v7736_v24  ;;  %v7770_v25 = vld [vmem:[%s11266_s12 + $0x5] ss:$0 sm:$0xff] }
0x1123   : > { %v9433_v28 = vpop.eup %9432 }
0x1124   : > { %v2833_v30 = vmul.f32 %v9433_v28, %v2825_v12  ;;  %v7688_v28 = vsel %vm3162_vm12, 1.0, %v9546_v61 }
0x1126   : > { %v2840_v32 = vmul.f32 %v7676_v29, %v2833_v30  ;;  %v7680_v29 = vld [vmem:[%s11228_s22] ss:$0 sm:$0xff] }
0x1128   : > { %v2847_v33 = vadd.f32 %v7677_v31, %v2840_v32 }
0x112a   : > { %8489 = vmatmul.mubr.msk.f32.vlgmr.msra.gmra.mrb[18].mxu0 %vm950_vm3, %v2847_v33 }
0x112b   : > { %8528 = vmatprep.mubr.msk.f32.mxu0 %vm1265_vm7, %v3068_v49 }
0x11fd   : > { %v2945_v1 = vpop.f32.mrb[18].mxu0 }
0x11fe   : > { %v2946_v2 = vadd.f32 %v7678_v0, %v2945_v1  ;;  %v8490_v4 = vpop.f32.mrb[19].mxu0  ;;  %v7683_v0 = vld [vmem:[%s11215_s9 + $0x2] ss:$0 sm:$0xff] }
0x11ff   : > { %v7684_v4 = vld [vmem:[%s11216_s10 + $0x2] ss:$0 sm:$0xff] }
0x1200   : > { %v2949_v5 = vmul.f32 %v2946_v2, %v2946_v2 }
0x1202   : > { %v2950_v6 = vmul.f32 %v2949_v5, %v2946_v2 }
0x1204   : > { %v2951_v8 = vmul.f32 0.044715, %v2950_v6  ;;  %v7694_v6 = vld [vmem:[%s11265_s11 + $0x80] sm:$0xff] }
0x1206   : > { %v2952_v9 = vadd.f32 %v2951_v8, %v2946_v2  ;;  %v7695_v8 = vld [vmem:[%s11265_s11 + $0x88] sm:$0xff] }
0x1208   : > { %v2953_v11 = vmul.f32 0.7978846, %v2952_v9 }
0x120a   : > { %9434 = vtanh.f32 %v2953_v11  ;;  %v3069_v11 = vld [vmem:[%s11273_s29 + $0x8] sm:$0x1] }
0x1214   : > { %v9435_v12 = vpop.eup %9434 }
0x1215   : > { %v2955_v13 = vadd.f32 1.0, %v9435_v12  ;;  %v9147_v12 = vpack.c.bf16 %v7695_v8, %v7694_v6  ;;  %v7719_v6 = vld [vmem:[%s11219_s13 + $0xa8] sm:$0xff] }
0x1217   : > { %v2956_v41 = vmul.f32 0.5, %v2955_v13  ;;  %v7696_v13 = vld [vmem:[%s11265_s11 + $0x90] sm:$0xff] }
0x1218   : > { %v9150_v15 = vpack.c.bf16 %v7697_v14, %v7696_v13  ;;  %v7720_v14 = vld [vmem:[%s11219_s13 + $0xb0] sm:$0xff] }
0x1219   : > { %v2957_v17 = vmul.f32 %v2956_v41, %v2946_v2 }
0x121b   : > { %8524 = vmatmul.mubr.f32.vlgmr.msra.gmra.mrb[32].mxu1 %v2957_v17 }
0x121c   : > { %9136 = vmatpush3.bf16.msra.mxu1 %v9135_v16  ;;  %8547 = vmatprep.mubr.msk.f32.mxu1 %vm9545_vm2, %v9546_v61  ;;  %v7692_v16 = vld [vmem:[%s11215_s9 + $0x3] ss:$0 sm:$0xff] }
0x121d   : > { %9137 = vmatprep.subr.bf16.mxu1 %v9544_v3 }
0x1220   : > { %9139 = vmatpush3.bf16.msra.mxu1 %v9138_v20  ;;  %v7693_v20 = vld [vmem:[%s11216_s10 + $0x3] ss:$0 sm:$0xff] }
0x1221   : > { %9140 = vmatprep.subr.bf16.mxu1 %v9544_v3 }
0x1224   : > { %9142 = vmatpush3.bf16.msra.mxu1 %v9141_v23 }
0x1225   : > { %9143 = vmatprep.subr.bf16.mxu1 %v9544_v3 }
0x1228   : > { %9145 = vmatpush3.bf16.msra.mxu1 %v9144_v27 }
0x1229   : > { %9152 = vmatprep.subr.bf16.mxu1 %v9544_v3 }
0x122b   : > { %8548 = vmatmul.mubr.msk.f32.vlgmr.msra.gmra.mrb[34].mxu1 %vm767_vm0, %v7688_v28  ;;  %vm10793_vm0 = vmpackc.low %vm5683_vm14, %vm9549_vm15 }
0x122c   : > { %8569 = vmatprep.mubr.msk.f32.mxu1 %vm9545_vm2, %v9546_v61  ;;  %9154 = vmatpush3.bf16.msra.mxu1 %v9153_v52  ;;  %v9165_v52 = vpack.c.bf16 %v7699_v63, %v7698_v51  ;;  %v7743_v51 = vld [vmem:[%s11221_s15 + $0xc8] sm:$0xff] }
0x122d   : > { %9155 = vmatprep.subr.bf16.mxu1 %v9544_v3 }
0x1230   : > { %9157 = vmatpush3.bf16.msra.mxu1 %v9156_v55 }
0x1231   : > { %8583 = vmatprep.subr.mxu1 %v9546_v61 }
0x12ee   : > { %v3030_v30 = vpop.f32.mrb[32].mxu1 }
0x12ef   : > { %v3031_v31 = vadd.f32 %v7680_v29, %v3030_v30  ;;  %v8525_v32 = vpop.f32.mrb[33].mxu1  ;;  %v7762_v29 = vld [vmem:[%s11220_s14 + $0x4] ss:$0 sm:$0xff] }
0x12f0   : > { %v7760_v32 = vld [vmem:[%s11266_s12 + $0x4] ss:$0 sm:$0xff] }
0x12f1   : > { %v3034_v33 = vadd.f32 %v3031_v31, %v10177_v7 }
0x12f3   : > { %v3039_v34 = vsel %vm843_vm1, %v3034_v33, 0.0 }
0x12f4   : > { %3040 = vadd.xlane.f32.xlu1 %v3039_v34 }
0x12fe   : > { %v3243_v36 = vpop.f32.mrb[34].mxu1 }
0x12ff   : > { %v10316_v37 = vadd.f32 %v3243_v36, %v3173_v35  ;;  %v8549_v38 = vpop.f32.mrb[35].mxu1 }
0x1300   : > { %v7764_v38 = vld [vmem:[%s11222_s16 + $0x4] ss:$0 sm:$0xff] }
0x1301   : > { %v3264_v39 = vsel %vm950_vm3, %v10316_v37, 0.0 }
0x1302   : > { %3265 = vadd.xlane.f32.xlu1 %v3264_v39 }
0x1381   : > { %v3041_v40 = vpop.xlane.xlu1 %3040 }
0x1382   : > { %v3042_v42 = vmul.f32 0.03125, %v3041_v40 }
0x1384   : > { %v3043_v43 = vsub.f32 %v3034_v33, %v3042_v42 }
0x1386   : > { %v3044_v44 = vmul.f32 %v3043_v43, %v3043_v43 }
0x1388   : > { %v3045_v7 = vsel %vm843_vm1, %v3044_v44, 0.0  ;;  %v9548_v44 = vmov -1e+09   ;;  %vm5669_vm1 = vcmask 72704  }
0x1389   : > { %3046 = vadd.xlane.f32.xlu1 %v3045_v7  ;;  %v10425_v7 = vsel %vm10267_vm11, 0.0, %v9548_v44  ;;  %v7703_v44 = vld [vmem:[%s11265_s11 + $0xc8] sm:$0xff] }
0x138f   : > { %v3266_v45 = vpop.xlane.xlu1 %3265 }
0x1390   : > { %v3267_v46 = vmul.f32 0.03125, %v3266_v45 }
0x1392   : > { %v3268_v47 = vsub.f32 %v10316_v37, %v3267_v46 }
0x1394   : > { %v3269_v10 = vmul.f32 %v3268_v47, %v3268_v47 }
0x1396   : > { %v3270_v48 = vsel %vm950_vm3, %v3269_v10, 0.0 }
0x1397   : > { %3271 = vadd.xlane.f32.xlu1 %v3270_v48 }
0x1416   : > { %v3047_v56 = vpop.xlane.xlu1 %3046 }
0x1417   : > { %v3048_v57 = vmul.f32 0.03125, %v3047_v56 }
0x1419   : > { %v3049_v58 = vadd.f32 1e-05, %v3048_v57  ;;  %v9168_v57 = vpack.c.bf16 %v7701_v54, %v7700_v53  ;;  %v7745_v53 = vld [vmem:[%s11221_s15 + $0xd8] sm:$0xff] }
0x141b   : > { %9436 = vrsqrt.f32 %v3049_v58  ;;  %v7738_v58 = vld [vmem:[%s11221_s15 + $0xa0] sm:$0xff] }
0x1424   : > { %v3272_v59 = vpop.xlane.xlu1 %3271 }
0x1425   : > { %v9437_v60 = vpop.eup %9436  ;;  %v3273_v62 = vmul.f32 0.03125, %v3272_v59  ;;  %v7739_v59 = vld [vmem:[%s11221_s15 + $0xa8] sm:$0xff] }
0x1426   : > { %v3051_v1 = vmul.f32 %v9437_v60, %v3043_v43  ;;  %v9177_v60 = vpack.c.bf16 %v7739_v59, %v7738_v58  ;;  %v7723_v58 = vld [vmem:[%s11219_s13 + $0xc8] sm:$0xff] }
0x1427   : > { %v3274_v2 = vadd.f32 1e-05, %v3273_v62  ;;  %v7740_v62 = vld [vmem:[%s11221_s15 + $0xb0] sm:$0xff] }
0x1428   : > { %v3058_v5 = vmul.f32 %v7683_v0, %v3051_v1  ;;  %v7741_v0 = vld [vmem:[%s11221_s15 + $0xb8] sm:$0xff] }
0x1429   : > { %9438 = vrsqrt.f32 %v3274_v2  ;;  %v9180_v1 = vpack.c.bf16 %v7741_v0, %v7740_v62  ;;  %v7754_v2 = vld [vmem:[%s11223_s17 + $0x20] sm:$0xff] }
0x142a   : > { %v3065_v9 = vadd.f32 %v7684_v4, %v3058_v5  ;;  %v7718_v5 = vld [vmem:[%s11219_s13 + $0xa0] sm:$0xff] }
0x142c   : > { %8526 = vmatprep.subr.msk.mxu0 %vm1269_vm4, %v3065_v9 }
0x142d   : > { %8527 = vmatpush3.msk.msra.mxu0 %vm1269_vm4, %v3065_v9 }
0x142e   : > { %9146 = vmatprep.subr.bf16.mxu0 %v9544_v3  ;;  %8529 = vmatmul.mubr.msk.f32.vlgmr.msra.gmra.mrb[20].mxu0 %vm1265_vm7, %v3069_v11  ;;  %v9171_v11 = vpack.c.bf16 %v7719_v6, %v7718_v5 }
0x142f   : > { %9148 = vmatpush3.bf16.msra.mxu0 %v9147_v12  ;;  %8558 = vmatprep.mubr.msk.f32.mxu0 %vm9545_vm2, %v9546_v61 }
0x1430   : > { %9149 = vmatprep.subr.bf16.mxu0 %v9544_v3 }
0x1433   : > { %v9439_v41 = vpop.eup %9438  ;;  %9151 = vmatpush3.bf16.msra.mxu0 %v9150_v15  ;;  %v7721_v15 = vld [vmem:[%s11219_s13 + $0xb8] sm:$0xff] }
0x1434   : > { %v3276_v17 = vmul.f32 %v9439_v41, %v3268_v47  ;;  %9158 = vmatprep.subr.bf16.mxu0 %v9544_v3  ;;  %v9174_v41 = vpack.c.bf16 %v7721_v15, %v7720_v14 }
0x1436   : > { %v3283_v21 = vmul.f32 %v7692_v16, %v3276_v17 }
0x1438   : > { %v10382_v23 = vadd.f32 %v7693_v20, %v3283_v21 }
0x143a   : > { %8559 = vmatmul.mubr.msk.f32.vlgmr.msra.gmra.mrb[22].mxu0 %vm950_vm3, %v10382_v23  ;;  %8570 = vmatmul.mubr.msk.f32.vlgmr.msra.gmra.mrb[36].mxu1 %vm950_vm3, %v10382_v23 }
0x143b   : > { %9160 = vmatpush3.bf16.msra.mxu0 %v9159_v22  ;;  %8580 = vmatprep.mubr.msk.f32.mxu0 %vm9545_vm2, %v9546_v61  ;;  %v7772_v22 = vld [vmem:[%s11220_s14 + $0x5] ss:$0 sm:$0xff] }
0x143c   : > { %9161 = vmatprep.subr.bf16.mxu0 %v9544_v3  ;;  %8585 = vmatprep.mubr.msk.f32.mxu1 %vm9545_vm2, %v9546_v61 }
0x143f   : > { %9163 = vmatpush3.bf16.msra.mxu0 %v9162_v26 }
0x1440   : > { %8588 = vmatprep.subr.mxu0 %v9546_v61 }
0x1442   : > { %8581 = vmatmul.mubr.msk.f32.vlgmr.msra.gmra.mrb[24].mxu0 %vm950_vm3, %v10382_v23 }
0x1443   : > { %8590 = vmatprep.mubr.msk.f32.mxu0 %vm9545_vm2, %v9546_v61 }
0x1501   : > { %v10404_v27 = vpop.f32.mrb[20].mxu0 }
0x1502   : > { %v10406_v28 = vpop.f32.mrb[21].mxu0 }
0x150d   : > { %v3446_v30 = vpop.f32.mrb[22].mxu0  ;;  %v3522_v31 = vpop.f32.mrb[36].mxu1 }
0x150e   : > { %v3523_v33 = vadd.f32 %v7762_v29, %v3522_v31  ;;  %v8560_v34 = vpop.f32.mrb[23].mxu0  ;;  %v8571_v35 = vpop.f32.mrb[37].mxu1  ;;  %v3447_v36 = vadd.f32 %v7760_v32, %v3446_v30  ;;  %v7774_v30 = vld [vmem:[%s11222_s16 + $0x5] ss:$0 sm:$0xff] }
0x1510   : > { %8584 = vmatpush3.xpose.msk.msra.mxu1 %vm1176_vm5, %v3523_v33 }
0x1511   : > { %8593 = vmatprep.subr.mxu1 %v9546_v61 }
0x1513   : > { %8586 = vmatmul.mubr.msk.f32.vlgmr.msra.gmra.mrb[38].mxu1 %vm1176_vm5, %v3447_v36 }
0x1514   : > { %8595 = vmatprep.mubr.msk.f32.mxu1 %vm9545_vm2, %v9546_v61  ;;  %8594 = vmatpush3.msra.mxu1 %v7754_v2  ;;  %v7724_v2 = vld [vmem:[%s11219_s13 + $0xd0] sm:$0xff] }
0x1515   : > { %v3598_v39 = vpop.f32.mrb[24].mxu0  ;;  %9170 = vmatprep.subr.bf16.mxu1 %v9544_v3 }
0x1516   : > { %v3599_v40 = vadd.f32 %v7764_v38, %v3598_v39  ;;  %v8582_v42 = vpop.f32.mrb[25].mxu0 }
0x1518   : > { %8589 = vmatpush3.msra.mxu0 %v3599_v40 }
0x1519   : > { %9164 = vmatprep.subr.bf16.mxu0 %v9544_v3 }
0x15e6   : > { %v3674_v43 = vpop.f32.mrb[38].mxu1 }
0x15e7   : > { %v3678_v45 = vmul.f32 0.35355338, %v3674_v43  ;;  %v8587_v46 = vpop.f32.mrb[39].mxu1  ;;  %v7702_v43 = vld [vmem:[%s11265_s11 + $0xc0] sm:$0xff] }
0x15e8   : > { %v7704_v46 = vld [vmem:[%s11265_s11 + $0xd0] sm:$0xff] }
0x15e9   : > { %v3679_v47 = vadd.f32 %v3678_v45, %v10425_v7  ;;  %v9183_v45 = vpack.c.bf16 %v7703_v44, %v7702_v43 }
0x15eb   : > { %v3680_v10 = vsel %vm1176_vm5, %v3679_v47, -inf }
0x15ec   : > { %3681 = vmax.xlane.f32.xlu1 %v3680_v10 }
0x1679   : > { %v3682_v48 = vpop.xlane.xlu1 %3681 }
0x167a   : > { %v3683_v49 = vsub.f32 %v3679_v47, %v3682_v48  ;;  %v7705_v47 = vld [vmem:[%s11265_s11 + $0xd8] sm:$0xff] }
0x167c   : > { %v3684_v50 = vmul.f32 1.442695, %v3683_v49  ;;  %v9186_v49 = vpack.c.bf16 %v7705_v47, %v7704_v46  ;;  %v7747_v46 = vld [vmem:[%s11221_s15 + $0xe8] sm:$0xff] }
0x167e   : > { %9440 = vpow2.f32 %v3684_v50  ;;  %v7742_v50 = vld [vmem:[%s11221_s15 + $0xc0] sm:$0xff] }
0x167f   : > { %v9195_v63 = vpack.c.bf16 %v7743_v51, %v7742_v50  ;;  %v7756_v50 = vld [vmem:[%s11223_s17 + $0x30] sm:$0xff] }
0x1688   : > { %v9441_v55 = vpop.eup %9440 }
0x1689   : > { %8591 = vmatmul.mubr.msk.f32.vlgmr.msra.gmra.mrb[26].mxu0 %vm1176_vm5, %v9441_v55  ;;  %v3686_v56 = vsel %vm1176_vm5, %v9441_v55, 0.0  ;;  %v7755_v55 = vld [vmem:[%s11223_s17 + $0x28] sm:$0xff] }
0x168a   : > { %9166 = vmatpush3.bf16.msra.mxu0 %v9165_v52  ;;  %3687 = vadd.xlane.f32.xlu1 %v3686_v56  ;;  %v7744_v52 = vld [vmem:[%s11221_s15 + $0xd0] sm:$0xff] }
0x168b   : > { %9167 = vmatprep.subr.bf16.mxu0 %v9544_v3  ;;  %8606 = vmatprep.mubr.msk.f32.mxu0 %vm9545_vm2, %v9546_v61  ;;  %v9198_v54 = vpack.c.bf16 %v7745_v53, %v7744_v52  ;;  %v7727_v52 = vld [vmem:[%s11219_s13 + $0xe8] sm:$0xff] }
0x168e   : > { %9169 = vmatpush3.bf16.msra.mxu0 %v9168_v57  ;;  %v7722_v57 = vld [vmem:[%s11219_s13 + $0xc0] sm:$0xff] }
0x168f   : > { %9176 = vmatprep.subr.bf16.mxu0 %v9544_v3  ;;  %v9189_v62 = vpack.c.bf16 %v7723_v58, %v7722_v57  ;;  %v7728_v58 = vld [vmem:[%s11219_s13 + $0xf0] sm:$0xff] }
0x1691   : > { %8607 = vmatmul.mubr.msk.f32.vlgmr.msra.gmra.mrb[28].mxu0 %vm950_vm3, %v10382_v23 }
0x1692   : > { %9178 = vmatpush3.bf16.msra.mxu0 %v9177_v60  ;;  %8628 = vmatprep.mubr.msk.f32.mxu0 %vm9545_vm2, %v9546_v61 }
0x1693   : > { %9179 = vmatprep.subr.bf16.mxu0 %v9544_v3 }
0x1696   : > { %9181 = vmatpush3.bf16.msra.mxu0 %v9180_v1 }
0x1697   : > { %8641 = vmatprep.subr.mxu0 %v9546_v61 }
0x1699   : > { %8629 = vmatmul.mubr.msk.f32.vlgmr.msra.gmra.mrb[30].mxu0 %vm950_vm3, %v10382_v23 }
0x169a   : > { %8643 = vmatprep.mubr.msk.f32.mxu0 %vm9545_vm2, %v9546_v61  ;;  %8642 = vmatpush3.msra.mxu0 %v7755_v55 }
0x169b   : > { %9188 = vmatprep.subr.bf16.mxu0 %v9544_v3 }
0x1717   : > { %v3688_v4 = vpop.xlane.xlu1 %3687 }
0x1718   : > { %9442 = vrcp.f32 %v3688_v4  ;;  %v7725_v4 = vld [vmem:[%s11219_s13 + $0xd8] sm:$0xff] }
0x1719   : > { %v9192_v5 = vpack.c.bf16 %v7725_v4, %v7724_v2 }
0x1722   : > { %v9443_v8 = vpop.eup %9442 }
0x175c   : > { %v3759_v9 = vpop.f32.mrb[26].mxu0 }
0x175d   : > { %v3763_v12 = vmul.f32 %v9443_v8, %v3759_v9  ;;  %v8592_v13 = vpop.f32.mrb[27].mxu0 }
0x175f   : > { %8596 = vmatmul.mubr.msk.f32.vlgmr.msra.gmra.mrb[40].mxu1 %vm1176_vm5, %v3763_v12  ;;  %v7759_v12 = vld [vmem:[%s11224_s18 + $0x1] ss:$0 sm:$0xff] }
0x1760   : > { %9172 = vmatpush3.bf16.msra.mxu1 %v9171_v11  ;;  %8617 = vmatprep.mubr.msk.f32.mxu1 %vm9545_vm2, %v9546_v61 }
0x1761   : > { %9173 = vmatprep.subr.bf16.mxu1 %v9544_v3 }
0x1764   : > { %v3910_v16 = vpop.f32.mrb[28].mxu0  ;;  %9175 = vmatpush3.bf16.msra.mxu1 %v9174_v41 }
0x1765   : > { %v8608_v17 = vpop.f32.mrb[29].mxu0  ;;  %8631 = vmatprep.subr.mxu1 %v9546_v61  ;;  %v3911_v31 = vadd.f32 %v7770_v25, %v3910_v16  ;;  %v7782_v16 = vld [vmem:[%s11220_s14 + $0x6] ss:$0 sm:$0xff] }
0x1767   : > { %8618 = vmatmul.mubr.msk.f32.vlgmr.msra.gmra.mrb[42].mxu1 %vm950_vm3, %v10382_v23 }
0x1768   : > { %8633 = vmatprep.mubr.msk.f32.mxu1 %vm9545_vm2, %v9546_v61 }
0x176c   : > { %v4062_v18 = vpop.f32.mrb[30].mxu0 }
0x176d   : > { %v8630_v19 = vpop.f32.mrb[31].mxu0  ;;  %v4063_v32 = vadd.f32 %v7774_v30, %v4062_v18  ;;  %v7780_v18 = vld [vmem:[%s11266_s12 + $0x6] ss:$0 sm:$0xff] }
0x1832   : > { %v10494_v20 = vpop.f32.mrb[40].mxu1 }
0x1833   : > { %v8597_v21 = vpop.f32.mrb[41].mxu1  ;;  %v3837_v13 = vadd.f32 %v7759_v12, %v10494_v20 }
0x183a   : > { %v3986_v24 = vpop.f32.mrb[42].mxu1 }
0x183b   : > { %v3987_v26 = vadd.f32 %v7772_v22, %v3986_v24  ;;  %v8619_v29 = vpop.f32.mrb[43].mxu1  ;;  %v7784_v22 = vld [vmem:[%s11222_s16 + $0x6] ss:$0 sm:$0xff] }
0x183d   : > { %8632 = vmatpush3.xpose.msk.msra.mxu1 %vm1176_vm5, %v3987_v26 }
0x183e   : > { %8636 = vmatprep.subr.mxu1 %v9546_v61 }
0x1840   : > { %8634 = vmatmul.mubr.msk.f32.vlgmr.msra.gmra.mrb[44].mxu1 %vm1176_vm5, %v3911_v31 }
0x1841   : > { %8637 = vmatpush3.msra.mxu1 %v4063_v32  ;;  %8638 = vmatprep.mubr.msk.f32.mxu1 %vm9545_vm2, %v9546_v61 }
0x1842   : > { %9182 = vmatprep.subr.bf16.mxu1 %v9544_v3 }
0x1913   : > { %v4138_v33 = vpop.f32.mrb[44].mxu1 }
0x1914   : > { %v4142_v34 = vmul.f32 0.35355338, %v4138_v33  ;;  %v8635_v35 = vpop.f32.mrb[45].mxu1 }
0x1915   : > { %v7706_v35 = vld [vmem:[%s11265_s11 + $0xe0] sm:$0xff] }
0x1916   : > { %v4143_v36 = vadd.f32 %v4142_v34, %v10425_v7 }
0x1918   : > { %v4144_v38 = vsel %vm1176_vm5, %v4143_v36, -inf }
0x1919   : > { %4145 = vmax.xlane.f32.xlu1 %v4144_v38 }
0x19a6   : > { %v4146_v39 = vpop.xlane.xlu1 %4145 }
0x19a7   : > { %v4147_v40 = vsub.f32 %v4143_v36, %v4146_v39  ;;  %v7707_v36 = vld [vmem:[%s11265_s11 + $0xe8] sm:$0xff]  ;;  %v7708_v39 = vld [vmem:[%s11265_s11 + $0xf0] sm:$0xff] }
0x19a8   : > { %v9201_v38 = vpack.c.bf16 %v7707_v36, %v7706_v35 }
0x19a9   : > { %v4148_v42 = vmul.f32 1.442695, %v4147_v40  ;;  %v7709_v40 = vld [vmem:[%s11265_s11 + $0xf8] sm:$0xff] }
0x19aa   : > { %v9204_v44 = vpack.c.bf16 %v7709_v40, %v7708_v39 }
0x19ab   : > { %9444 = vpow2.f32 %v4148_v42 }
0x19b5   : > { %v9445_v10 = vpop.eup %9444 }
0x19b6   : > { %8639 = vmatmul.mubr.msk.f32.vlgmr.msra.gmra.mrb[46].mxu1 %vm1176_vm5, %v9445_v10  ;;  %v4150_v48 = vsel %vm1176_vm5, %v9445_v10, 0.0  ;;  %v7748_v10 = vld [vmem:[%s11221_s15 + $0xf0] sm:$0xff] }
0x19b7   : > { %9184 = vmatpush3.bf16.msra.mxu1 %v9183_v45  ;;  %4151 = vadd.xlane.f32.xlu1 %v4150_v48  ;;  %v7746_v45 = vld [vmem:[%s11221_s15 + $0xe0] sm:$0xff]  ;;  %v7749_v48 = vld [vmem:[%s11221_s15 + $0xf8] sm:$0xff] }
0x19b8   : > { %9185 = vmatprep.subr.bf16.mxu1 %v9544_v3  ;;  %8654 = vmatprep.mubr.msk.f32.mxu1 %vm9545_vm2, %v9546_v61  ;;  %v9213_v47 = vpack.c.bf16 %v7747_v46, %v7746_v45 }
0x19bb   : > { %9187 = vmatpush3.bf16.msra.mxu1 %v9186_v49  ;;  %v9216_v49 = vpack.c.bf16 %v7749_v48, %v7748_v10 }
0x19bc   : > { %9194 = vmatprep.subr.bf16.mxu1 %v9544_v3 }
0x19be   : > { %8655 = vmatmul.mubr.msk.f32.vlgmr.msra.gmra.mrb[48].mxu1 %vm950_vm3, %v10382_v23 }
0x19bf   : > { %9196 = vmatpush3.bf16.msra.mxu1 %v9195_v63  ;;  %8676 = vmatprep.mubr.msk.f32.mxu1 %vm9545_vm2, %v9546_v61  ;;  %v7726_v63 = vld [vmem:[%s11219_s13 + $0xe0] sm:$0xff] }
0x19c0   : > { %9197 = vmatprep.subr.bf16.mxu1 %v9544_v3  ;;  %v9207_v55 = vpack.c.bf16 %v7727_v52, %v7726_v63 }
0x19c3   : > { %9199 = vmatpush3.bf16.msra.mxu1 %v9198_v54 }
0x19c4   : > { %8689 = vmatprep.subr.mxu1 %v9546_v61 }
0x19c6   : > { %8677 = vmatmul.mubr.msk.f32.vlgmr.msra.gmra.mrb[50].mxu1 %vm950_vm3, %v10382_v23 }
0x19c7   : > { %8691 = vmatprep.mubr.msk.f32.mxu1 %vm9545_vm2, %v9546_v61  ;;  %8690 = vmatpush3.msra.mxu1 %v7756_v50 }
0x19c8   : > { %9206 = vmatprep.subr.bf16.mxu1 %v9544_v3 }
0x1a44   : > { %v4152_v56 = vpop.xlane.xlu1 %4151 }
0x1a45   : > { %9446 = vrcp.f32 %v4152_v56 }
0x1a4f   : > { %v9447_v59 = vpop.eup %9446 }
0x1a89   : > { %v4223_v60 = vpop.f32.mrb[46].mxu1 }
0x1a8a   : > { %v4227_v0 = vmul.f32 %v9447_v59, %v4223_v60  ;;  %v8640_v1 = vpop.f32.mrb[47].mxu1  ;;  %v7729_v59 = vld [vmem:[%s11219_s13 + $0xf8] sm:$0xff] }
0x1a8b   : > { %v9210_v60 = vpack.c.bf16 %v7729_v59, %v7728_v58  ;;  %v7805_v58 = vld [vmem:[%s11265_s11 + $0x108] sm:$0xff] }
0x1a8c   : > { %8644 = vmatmul.mubr.msk.f32.vlgmr.msra.gmra.mrb[32].mxu0 %vm1176_vm5, %v4227_v0 }
0x1a8d   : > { %9190 = vmatpush3.bf16.msra.mxu0 %v9189_v62  ;;  %8665 = vmatprep.mubr.msk.f32.mxu0 %vm9545_vm2, %v9546_v61 }
0x1a8e   : > { %9191 = vmatprep.subr.bf16.mxu0 %v9544_v3 }
0x1a91   : > { %v4374_v6 = vpop.f32.mrb[48].mxu1  ;;  %9193 = vmatpush3.bf16.msra.mxu0 %v9192_v5 }
0x1a92   : > { %v8656_v8 = vpop.f32.mrb[49].mxu1  ;;  %8679 = vmatprep.subr.mxu0 %v9546_v61  ;;  %v4375_v20 = vadd.f32 %v7780_v18, %v4374_v6 }
0x1a93   : > { %v7792_v8 = vld [vmem:[%s11220_s14 + $0x7] ss:$0 sm:$0xff] }
0x1a94   : > { %8666 = vmatmul.mubr.msk.f32.vlgmr.msra.gmra.mrb[34].mxu0 %vm950_vm3, %v10382_v23 }
0x1a95   : > { %8681 = vmatprep.mubr.msk.f32.mxu0 %vm9545_vm2, %v9546_v61 }
0x1a99   : > { %v4526_v9 = vpop.f32.mrb[50].mxu1 }
0x1a9a   : > { %v8678_v11 = vpop.f32.mrb[51].mxu1  ;;  %v4527_v24 = vadd.f32 %v7784_v22, %v4526_v9 }
0x1a9b   : > { %v7790_v11 = vld [vmem:[%s11266_s12 + $0x7] ss:$0 sm:$0xff] }
0x1b5f   : > { %v4297_v14 = vpop.f32.mrb[32].mxu0 }
0x1b60   : > { %v10582_v15 = vadd.f32 %v4297_v14, %v3837_v13  ;;  %v8645_v41 = vpop.f32.mrb[33].mxu0  ;;  %v7794_v13 = vld [vmem:[%s11222_s16 + $0x7] ss:$0 sm:$0xff] }
0x1b67   : > { %v4450_v17 = vpop.f32.mrb[34].mxu0 }
0x1b68   : > { %v4451_v19 = vadd.f32 %v7782_v16, %v4450_v17  ;;  %v8667_v21 = vpop.f32.mrb[35].mxu0 }
0x1b6a   : > { %8680 = vmatpush3.xpose.msk.msra.mxu0 %vm1176_vm5, %v4451_v19 }
0x1b6b   : > { %8684 = vmatprep.subr.mxu0 %v9546_v61 }
0x1b6d   : > { %8682 = vmatmul.mubr.msk.f32.vlgmr.msra.gmra.mrb[36].mxu0 %vm1176_vm5, %v4375_v20 }
0x1b6e   : > { %8685 = vmatpush3.msra.mxu0 %v4527_v24  ;;  %8686 = vmatprep.mubr.msk.f32.mxu0 %vm9545_vm2, %v9546_v61 }
0x1b6f   : > { %9200 = vmatprep.subr.bf16.mxu0 %v9544_v3 }
0x1c40   : > { %v4602_v25 = vpop.f32.mrb[36].mxu0 }
0x1c41   : > { %v4606_v26 = vmul.f32 0.35355338, %v4602_v25  ;;  %v8683_v29 = vpop.f32.mrb[37].mxu0 }
0x1c42   : > { %v7757_v29 = vld [vmem:[%s11223_s17 + $0x38] sm:$0xff] }
0x1c43   : > { %v4607_v30 = vadd.f32 %v4606_v26, %v10425_v7  ;;  %v7825_v26 = vld [vmem:[%s11219_s13 + $0x108] sm:$0xff] }
0x1c45   : > { %v4608_v31 = vsel %vm1176_vm5, %v4607_v30, -inf }
0x1c46   : > { %4609 = vmax.xlane.f32.xlu1 %v4608_v31 }
0x1cd3   : > { %v4610_v32 = vpop.xlane.xlu1 %4609 }
0x1cd4   : > { %v4611_v33 = vsub.f32 %v4607_v30, %v4610_v32  ;;  %v7826_v32 = vld [vmem:[%s11219_s13 + $0x110] sm:$0xff] }
0x1cd6   : > { %v4612_v34 = vmul.f32 1.442695, %v4611_v33  ;;  %v7827_v33 = vld [vmem:[%s11219_s13 + $0x118] sm:$0xff] }
0x1cd7   : > { %v9228_v40 = vpack.c.bf16 %v7827_v33, %v7826_v32 }
0x1cd8   : > { %9448 = vpow2.f32 %v4612_v34  ;;  %v3066_v34 = vld [vmem:[%s11274_s24] sm:$0xff]  ;;  %s9480_s24 = scalar_lea.vmem %s11165_s6, 128 }
0x1cd9   : > { %p9481_p11 = scmp.ne.s32.totalorder %s11165_s6, %s9480_s24  ;;  %p9488_p1 = scmp.lt.s32.totalorder %s9486_s3, %s9480_s24 }
0x1cdb   : > { %p9482_p12 = pnand %p9481_p11, %p9709_p5  ;;  %p9489_p2 = por %p9488_p1, %p9487_p0 }
0x1cdd   : > { %p9483_p13 = pneg %p9482_p12 }
0x1cdf   : > { %p9490_p3 = pnand %p9489_p2, %p9483_p13 }
0x1ce2   : > { %v9449_v42 = vpop.eup %9448 }
0x1ce3   : > { %8687 = vmatmul.mubr.msk.f32.vlgmr.msra.gmra.mrb[38].mxu0 %vm1176_vm5, %v9449_v42  ;;  %v4614_v43 = vsel %vm1176_vm5, %v9449_v42, 0.0  ;;  %v10707_v42 = vadd.f32 %v10406_v28, %v3066_v34 }
0x1ce4   : > { %9202 = vmatpush3.bf16.msra.mxu0 %v9201_v38  ;;  %4615 = vadd.xlane.f32.xlu1 %v4614_v43  ;;  %v3067_v43 = vld [vmem:[%s11275_s27 + $0x8] sm:$0x1] }
0x1ce5   : > { %9203 = vmatprep.subr.bf16.mxu0 %v9544_v3  ;;  %8702 = vmatprep.mubr.msk.f32.mxu0 %vm9545_vm2, %v9546_v61 }
0x1ce8   : > { %9205 = vmatpush3.bf16.msra.mxu0 %v9204_v44  ;;  %v10716_v44 = vadd.f32 %v10404_v27, %v3067_v43  ;;  %v7872_v27 = vld [vmem:[%s11220_s14 + $0x8] ss:$0 sm:$0xff]  ;;  %v7810_v43 = vld [vmem:[%s11265_s11 + $0x130] sm:$0xff] }
0x1ce9   : > { %9212 = vmatprep.subr.bf16.mxu0 %v9544_v3 }
0x1ceb   : > { %8703 = vmatmul.mubr.msk.f32.vlgmr.msra.gmra.mrb[40].mxu0 %vm950_vm3, %v10382_v23 }
0x1cec   : > { %9214 = vmatpush3.bf16.msra.mxu0 %v9213_v47  ;;  %8724 = vmatprep.mubr.msk.f32.mxu0 %vm9545_vm2, %v9546_v61 }
0x1ced   : > { %9215 = vmatprep.subr.bf16.mxu0 %v9544_v3 }
0x1cf0   : > { %9217 = vmatpush3.bf16.msra.mxu0 %v9216_v49 }
0x1cf1   : > { %8737 = vmatprep.subr.mxu0 %v9546_v61 }
0x1cf3   : > { %8725 = vmatmul.mubr.msk.f32.vlgmr.msra.gmra.mrb[42].mxu0 %vm950_vm3, %v10382_v23 }
0x1cf4   : > { %8739 = vmatprep.mubr.msk.f32.mxu0 %vm9545_vm2, %v9546_v61  ;;  %8738 = vmatpush3.msra.mxu0 %v7757_v29 }
0x1d71   : > { %v4616_v51 = vpop.xlane.xlu1 %4615 }
0x1d72   : > { %9450 = vrcp.f32 %v4616_v51 }
0x1d7c   : > { %v9451_v53 = vpop.eup %9450 }
0x1db6   : > { %v4687_v54 = vpop.f32.mrb[38].mxu0 }
0x1db7   : > { %v4691_v56 = vmul.f32 %v9451_v53, %v4687_v54  ;;  %v8688_v57 = vpop.f32.mrb[39].mxu0 }
0x1db8   : > { %v7804_v57 = vld [vmem:[%s11265_s11 + $0x100] sm:$0xff] }
0x1db9   : > { %8692 = vmatmul.mubr.msk.f32.vlgmr.msra.gmra.mrb[52].mxu1 %vm1176_vm5, %v4691_v56  ;;  %v9219_v59 = vpack.c.bf16 %v7805_v58, %v7804_v57  ;;  %v7830_v57 = vld [vmem:[%s11219_s13 + $0x130] sm:$0xff]  ;;  %v7831_v58 = vld [vmem:[%s11219_s13 + $0x138] sm:$0xff] }
0x1dba   : > { %9208 = vmatpush3.bf16.msra.mxu1 %v9207_v55  ;;  %8713 = vmatprep.mubr.msk.f32.mxu1 %vm9545_vm2, %v9546_v61 }
0x1dbb   : > { %9209 = vmatprep.subr.bf16.mxu1 %v9544_v3 }
0x1dbe   : > { %v4838_v62 = vpop.f32.mrb[40].mxu0  ;;  %9211 = vmatpush3.bf16.msra.mxu1 %v9210_v60  ;;  %v7806_v60 = vld [vmem:[%s11265_s11 + $0x110] sm:$0xff] }
0x1dbf   : > { %v8704_v0 = vpop.f32.mrb[41].mxu0  ;;  %8727 = vmatprep.subr.mxu1 %v9546_v61  ;;  %v4839_v14 = vadd.f32 %v7790_v11, %v4838_v62  ;;  %v7807_v62 = vld [vmem:[%s11265_s11 + $0x118] sm:$0xff]  ;;  %v7802_v11 = vld [vmem:[%s11215_s9 + $0x4] ss:$0 sm:$0xff] }
0x1dc0   : > { %v7844_v0 = vld [vmem:[%s11221_s15 + $0x100] sm:$0xff] }
0x1dc1   : > { %8714 = vmatmul.mubr.msk.f32.vlgmr.msra.gmra.mrb[54].mxu1 %vm950_vm3, %v10382_v23 }
0x1dc2   : > { %8729 = vmatprep.mubr.msk.f32.mxu1 %vm9545_vm2, %v9546_v61 }
0x1dc6   : > { %v4990_v1 = vpop.f32.mrb[42].mxu0 }
0x1dc7   : > { %v8726_v2 = vpop.f32.mrb[43].mxu0 }
0x1dc8   : > { %v7845_v2 = vld [vmem:[%s11221_s15 + $0x108] sm:$0xff] }
0x1e8c   : > { %v4761_v4 = vpop.f32.mrb[52].mxu1 }
0x1e8d   : > { %v4765_v5 = vadd.f32 %v4761_v4, %v10582_v15  ;;  %v8693_v6 = vpop.f32.mrb[53].mxu1  ;;  %v4991_v15 = vadd.f32 %v7794_v13, %v4990_v1  ;;  %v9222_v1 = vpack.c.bf16 %v7807_v62, %v7806_v60  ;;  %v9232_v4 = vpack.c.bf16 %v7845_v2, %v7844_v0  ;;  %v7846_v13 = vld [vmem:[%s11221_s15 + $0x110] sm:$0xff] }
0x1e94   : > { %v4914_v9 = vpop.f32.mrb[54].mxu1 }
0x1e95   : > { %v4915_v12 = vadd.f32 %v7792_v8, %v4914_v9  ;;  %v8715_v23 = vpop.f32.mrb[55].mxu1 }
0x1e96   : > { %v7803_v23 = vld [vmem:[%s11216_s10 + $0x4] ss:$0 sm:$0xff] }
0x1e97   : > { %8728 = vmatpush3.xpose.msk.msra.mxu1 %vm1176_vm5, %v4915_v12 }
0x1e98   : > { %8732 = vmatprep.subr.mxu1 %v9546_v61 }
0x1e9a   : > { %8730 = vmatmul.mubr.msk.f32.vlgmr.msra.gmra.mrb[56].mxu1 %vm1176_vm5, %v4839_v14  ;;  %v7847_v14 = vld [vmem:[%s11221_s15 + $0x118] sm:$0xff] }
0x1e9b   : > { %8733 = vmatpush3.msra.mxu1 %v4991_v15  ;;  %8734 = vmatprep.mubr.msk.f32.mxu1 %vm9545_vm2, %v9546_v61 }
0x1e9c   : > { %9218 = vmatprep.subr.bf16.mxu1 %v9544_v3 }
0x1f6d   : > { %v5066_v41 = vpop.f32.mrb[56].mxu1 }
0x1f6e   : > { %v5070_v16 = vmul.f32 0.35355338, %v5066_v41  ;;  %v8731_v17 = vpop.f32.mrb[57].mxu1 }
0x1f6f   : > { %v7870_v17 = vld [vmem:[%s11266_s12 + $0x8] ss:$0 sm:$0xff] }
0x1f70   : > { %v5071_v18 = vadd.f32 %v5070_v16, %v10425_v7  ;;  %v7824_v7 = vld [vmem:[%s11219_s13 + $0x100] sm:$0xff]  ;;  %v9236_v16 = vpack.c.bf16 %v7847_v14, %v7846_v13  ;;  %v7886_v14 = vld [vmem:[%s11220_s14 + $0x9] ss:$0 sm:$0xff] }
0x1f71   : > { %v9224_v30 = vpack.c.bf16 %v7825_v26, %v7824_v7  ;;  %v7912_v26 = vld [vmem:[%s11266_s12 + $0xb] ss:$0 sm:$0xff] }
0x1f72   : > { %v5072_v19 = vsel %vm1176_vm5, %v5071_v18, -inf }
0x1f73   : > { %5073 = vmax.xlane.f32.xlu1 %v5072_v19  ;;  %9225 = vmatprep.subr.bf16.mxu0 %v9224_v30 }
0x2000   : > { %v5074_v21 = vpop.xlane.xlu1 %5073 }
0x2001   : > { %v5075_v22 = vsub.f32 %v5071_v18, %v5074_v21 }
0x2003   : > { %v5076_v20 = vmul.f32 1.442695, %v5075_v22  ;;  %v7875_v22 = vld [vmem:[%s11222_s16 + $0x8] ss:$0 sm:$0xff] }
0x2005   : > { %9452 = vpow2.f32 %v5076_v20 }
0x200f   : > { %v9453_v24 = vpop.eup %9452 }
0x2010   : > { %8735 = vmatmul.mubr.msk.f32.vlgmr.msra.gmra.mrb[58].mxu1 %vm1176_vm5, %v9453_v24  ;;  %v5078_v25 = vsel %vm1176_vm5, %v9453_v24, 0.0 }
0x2011   : > { %5079 = vadd.xlane.f32.xlu0 %v5078_v25  ;;  %8750 = vmatprep.mubr.msk.f32.mxu1 %vm9545_vm2, %v9546_v61 }
0x2012   : > { %9220 = vmatpush3.bf16.msra.mxu1 %v9219_v59 }
0x2013   : > { %9221 = vmatprep.subr.bf16.mxu1 %v9544_v3 }
0x2016   : > { %9223 = vmatpush3.bf16.msra.mxu1 %v9222_v1  ;;  %v9258_v1 = vpack.c.bf16 %v7831_v58, %v7830_v57 }
0x2017   : > { %9233 = vmatprep.subr.bf16.mxu1 %v9232_v4 }
0x209e   : > { %v5080_v31 = vpop.xlane.xlu0 %5079 }
0x209f   : > { %9454 = vrcp.f32 %v5080_v31 }
0x20a9   : > { %v9455_v35 = vpop.eup %9454 }
0x20e3   : > { %v5151_v36 = vpop.f32.mrb[58].mxu1 }
0x20e4   : > { %v5155_v38 = vmul.f32 %v9455_v35, %v5151_v36  ;;  %v8736_v39 = vpop.f32.mrb[59].mxu1 }
0x20e5   : > { %v7809_v39 = vld [vmem:[%s11265_s11 + $0x128] sm:$0xff] }
0x20e6   : > { %8740 = vmatmul.mubr.msk.f32.vlgmr.msra.gmra.mrb[44].mxu0 %vm1176_vm5, %v5155_v38  ;;  %v7808_v38 = vld [vmem:[%s11265_s11 + $0x120] sm:$0xff] }
0x20e7   : > { %9227 = vmatpush3.bf16.msra.mxu0 %v9224_v30  ;;  %8761 = vmatprep.mubr.msk.f32.mxu0 %vm950_vm3, %v10707_v42 }
0x20e8   : > { %9229 = vmatprep.subr.bf16.mxu0 %v9228_v40 }
0x20eb   : > { %9231 = vmatpush3.bf16.msra.mxu0 %v9228_v40  ;;  %v9249_v40 = vpack.c.bf16 %v7809_v39, %v7808_v38  ;;  %v7852_v39 = vld [vmem:[%s11221_s15 + $0x140] sm:$0xff] }
0x20ec   : > { %9240 = vmatprep.subr.bf16.mxu0 %v9544_v3 }
0x20ee   : > { %8762 = vmatmul.mubr.msk.f32.vlgmr.msra.gmra.mrb[46].mxu0 %vm950_vm3, %v10716_v44 }
0x20ef   : > { %8779 = vmatprep.mubr.msk.f32.mxu0 %vm9545_vm2, %v9546_v61 }
0x21b9   : > { %v5225_v28 = vpop.f32.mrb[44].mxu0 }
0x21ba   : > { %v5229_v45 = vadd.f32 %v5225_v28, %v4765_v5  ;;  %v8741_v46 = vpop.f32.mrb[45].mxu0  ;;  %v7811_v28 = vld [vmem:[%s11265_s11 + $0x138] sm:$0xff] }
0x21bb   : > { %v7848_v46 = vld [vmem:[%s11221_s15 + $0x120] sm:$0xff] }
0x21bc   : > { %v10724_v47 = vadd.f32 %v5229_v45, %v10316_v37 }
0x21be   : > { %v5235_v10 = vsel %vm950_vm3, %v10724_v47, 0.0 }
0x21bf   : > { %5236 = vadd.xlane.f32.xlu1 %v5235_v10  ;;  %v7849_v10 = vld [vmem:[%s11221_s15 + $0x128] sm:$0xff] }
0x21c1   : > { %v8763_v48 = vpop.f32.mrb[46].mxu0 }
0x21c2   : > { %v5505_v49 = vadd.f32 %v8763_v48, %v7872_v27  ;;  %v5499_v50 = vpop.f32.mrb[47].mxu0  ;;  %v9252_v48 = vpack.c.bf16 %v7811_v28, %v7810_v43 }
0x21c3   : > { %v5500_v51 = vadd.f32 %v7872_v27, %v5499_v50  ;;  %v7850_v50 = vld [vmem:[%s11221_s15 + $0x130] sm:$0xff] }
0x21c5   : > { %v9241_v37 = vpack.c.bf16 %v5505_v49, %v5500_v51  ;;  %v9262_v49 = vpack.c.bf16 %v7849_v10, %v7848_v46  ;;  %v7851_v51 = vld [vmem:[%s11221_s15 + $0x138] sm:$0xff]  ;;  %v7854_v46 = vld [vmem:[%s11221_s15 + $0x150] sm:$0xff] }
0x21c6   : > { %v7855_v10 = vld [vmem:[%s11221_s15 + $0x158] sm:$0xff] }
0x21c7   : > { %9243 = vmatpush3.bf16.xpose.msk.msra.mxu0 %vm10733_vm13, %v9241_v37  ;;  %v9266_v37 = vpack.c.bf16 %v7851_v51, %v7850_v50  ;;  %v7865_v50 = vld [vmem:[%s11223_s17 + $0x48] sm:$0xff] }
0x21c8   : > { %8789 = vmatprep.subr.mxu0 %v9546_v61 }
0x224c   : > { %v5237_v52 = vpop.xlane.xlu1 %5236 }
0x224d   : > { %v5238_v53 = vmul.f32 0.03125, %v5237_v52  ;;  %v7828_v52 = vld [vmem:[%s11219_s13 + $0x120] sm:$0xff] }
0x224f   : > { %v5239_v54 = vsub.f32 %v10724_v47, %v5238_v53  ;;  %v7829_v53 = vld [vmem:[%s11219_s13 + $0x128] sm:$0xff] }
0x2251   : > { %v5240_v55 = vmul.f32 %v5239_v54, %v5239_v54 }
0x2253   : > { %v5241_v56 = vsel %vm950_vm3, %v5240_v55, 0.0  ;;  %v9254_v55 = vpack.c.bf16 %v7829_v53, %v7828_v52  ;;  %v7834_v52 = vld [vmem:[%s11219_s13 + $0x150] sm:$0xff]  ;;  %v7835_v53 = vld [vmem:[%s11219_s13 + $0x158] sm:$0xff] }
0x2254   : > { %5242 = vadd.xlane.f32.xlu1 %v5241_v56  ;;  %v9288_v58 = vpack.c.bf16 %v7835_v53, %v7834_v52 }
0x22e1   : > { %v5243_v5 = vpop.xlane.xlu1 %5242 }
0x22e2   : > { %v5244_v6 = vmul.f32 0.03125, %v5243_v5  ;;  %v7889_v5 = vld [vmem:[%s11222_s16 + $0x9] ss:$0 sm:$0xff] }
0x22e4   : > { %v5245_v8 = vadd.f32 1e-05, %v5244_v6 }
0x22e6   : > { %9456 = vrsqrt.f32 %v5245_v8 }
0x22f0   : > { %v9457_v9 = vpop.eup %9456 }
0x22f1   : > { %v5247_v12 = vmul.f32 %v9457_v9, %v5239_v54  ;;  %v7864_v54 = vld [vmem:[%s11223_s17 + $0x40] sm:$0xff] }
0x22f3   : > { %v5254_v15 = vmul.f32 %v7802_v11, %v5247_v12 }
0x22f5   : > { %v10773_v41 = vadd.f32 %v7803_v23, %v5254_v15 }
0x22f7   : > { %8751 = vmatmul.mubr.msk.f32.vlgmr.msra.gmra.mrb[60].mxu1 %vm950_vm3, %v10773_v41 }
0x22f8   : > { %9235 = vmatpush3.bf16.msra.mxu1 %v9232_v4  ;;  %8772 = vmatprep.mubr.msk.f32.mxu1 %vm950_vm3, %v10707_v42 }
0x22f9   : > { %9237 = vmatprep.subr.bf16.mxu1 %v9236_v16 }
0x22fc   : > { %9239 = vmatpush3.bf16.msra.mxu1 %v9236_v16 }
0x22fd   : > { %9244 = vmatprep.subr.bf16.mxu1 %v9544_v3 }
0x22ff   : > { %8773 = vmatmul.mubr.msk.f32.vlgmr.msra.gmra.mrb[62].mxu1 %vm950_vm3, %v10716_v44 }
0x2300   : > { %8786 = vmatprep.mubr.msk.f32.mxu1 %vm9545_vm2, %v9546_v61 }
0x23ca   : > { %v5417_v18 = vpop.f32.mrb[60].mxu1 }
0x23cb   : > { %v5418_v19 = vadd.f32 %v7870_v17, %v5417_v18  ;;  %v8752_v21 = vpop.f32.mrb[61].mxu1 }
0x23cc   : > { %v7884_v21 = vld [vmem:[%s11266_s12 + $0x9] ss:$0 sm:$0xff] }
0x23cd   : > { %8780 = vmatmul.mubr.msk.f32.vlgmr.msra.gmra.mrb[48].mxu0 %vm1176_vm5, %v5418_v19 }
0x23ce   : > { %8791 = vmatprep.mubr.msk.f32.mxu0 %vm9545_vm2, %v9546_v61  ;;  %8790 = vmatpush3.msra.mxu0 %v7864_v54 }
0x23cf   : > { %9255 = vmatprep.subr.bf16.mxu0 %v9254_v55 }
0x23d2   : > { %v8774_v20 = vpop.f32.mrb[62].mxu1 }
0x23d3   : > { %v5586_v24 = vadd.f32 %v8774_v20, %v7875_v22  ;;  %v5580_v25 = vpop.f32.mrb[63].mxu1 }
0x23d4   : > { %v5581_v7 = vadd.f32 %v7875_v22, %v5580_v25 }
0x23d6   : > { %v9245_v29 = vpack.c.bf16 %v5586_v24, %v5581_v7 }
0x23d8   : > { %9247 = vmatpush3.bf16.msk.msra.mxu1 %vm10793_vm0, %v9245_v29 }
0x23d9   : > { %9248 = vmatprep.subr.bf16.mxu1 %v9544_v3 }
0x24a0   : > { %v5664_v30 = vpop.f32.mrb[48].mxu0 }
0x24a1   : > { %v5668_v31 = vmul.f32 0.35355338, %v5664_v30  ;;  %v8781_v32 = vpop.f32.mrb[49].mxu0 }
0x24a2   : > { %v7812_v32 = vld [vmem:[%s11265_s11 + $0x140] sm:$0xff] }
0x24a3   : > { %v5670_v33 = vsel %vm5669_vm1, %v5668_v31, -inf }
0x24a4   : > { %5671 = vmax.xlane.f32.xlu1 %v5670_v33  ;;  %v7813_v33 = vld [vmem:[%s11265_s11 + $0x148] sm:$0xff] }
0x2531   : > { %v5672_v34 = vpop.xlane.xlu1 %5671 }
0x2532   : > { %v5673_v35 = vsub.f32 %v5668_v31, %v5672_v34  ;;  %v9279_v34 = vpack.c.bf16 %v7813_v33, %v7812_v32  ;;  %v7818_v33 = vld [vmem:[%s11265_s11 + $0x170] sm:$0xff] }
0x2534   : > { %v5674_v36 = vmul.f32 1.442695, %v5673_v35  ;;  %v7814_v35 = vld [vmem:[%s11265_s11 + $0x150] sm:$0xff] }
0x2536   : > { %9458 = vpow2.f32 %v5674_v36  ;;  %v7815_v36 = vld [vmem:[%s11265_s11 + $0x158] sm:$0xff] }
0x2537   : > { %v9282_v28 = vpack.c.bf16 %v7815_v36, %v7814_v35  ;;  %v7856_v36 = vld [vmem:[%s11221_s15 + $0x160] sm:$0xff] }
0x2540   : > { %v9459_v45 = vpop.eup %9458 }
0x2541   : > { %8787 = vmatmul.mubr.msk.f32.vlgmr.msra.gmra.mrb[64].mxu1 %vm5669_vm1, %v9459_v45  ;;  %v5676_v27 = vsel %vm5669_vm1, %v9459_v45, 0.0 }
0x2542   : > { %9250 = vmatpush3.bf16.msra.mxu1 %v9249_v40  ;;  %5677 = vadd.xlane.f32.xlu1 %v5676_v27  ;;  %v7853_v40 = vld [vmem:[%s11221_s15 + $0x148] sm:$0xff]  ;;  %v9296_v27 = vpack.c.bf16 %v7855_v10, %v7854_v46  ;;  %v7836_v10 = vld [vmem:[%s11219_s13 + $0x160] sm:$0xff] }
0x2543   : > { %9251 = vmatprep.subr.bf16.mxu1 %v9544_v3  ;;  %8802 = vmatprep.mubr.msk.f32.mxu1 %vm9545_vm2, %v9546_v61  ;;  %v9292_v45 = vpack.c.bf16 %v7853_v40, %v7852_v39 }
0x2546   : > { %9253 = vmatpush3.bf16.msra.mxu1 %v9252_v48  ;;  %v7832_v48 = vld [vmem:[%s11219_s13 + $0x140] sm:$0xff] }
0x2547   : > { %9263 = vmatprep.subr.bf16.mxu1 %v9262_v49 }
0x2549   : > { %8803 = vmatmul.mubr.msk.f32.vlgmr.msra.gmra.mrb[66].mxu1 %vm950_vm3, %v10773_v41 }
0x254a   : > { %9265 = vmatpush3.bf16.msra.mxu1 %v9262_v49  ;;  %8824 = vmatprep.mubr.msk.f32.mxu1 %vm950_vm3, %v10707_v42  ;;  %v7833_v49 = vld [vmem:[%s11219_s13 + $0x148] sm:$0xff] }
0x254b   : > { %9267 = vmatprep.subr.bf16.mxu1 %v9266_v37  ;;  %v9284_v51 = vpack.c.bf16 %v7833_v49, %v7832_v48 }
0x254e   : > { %9269 = vmatpush3.bf16.msra.mxu1 %v9266_v37 }
0x254f   : > { %9274 = vmatprep.subr.bf16.mxu1 %v9544_v3 }
0x2551   : > { %8825 = vmatmul.mubr.msk.f32.vlgmr.msra.gmra.mrb[68].mxu1 %vm950_vm3, %v10716_v44 }
0x2552   : > { %8838 = vmatprep.mubr.msk.f32.mxu1 %vm9545_vm2, %v9546_v61 }
0x25cf   : > { %v5678_v56 = vpop.xlane.xlu1 %5677 }
0x25d0   : > { %9460 = vrcp.f32 %v5678_v56 }
0x25da   : > { %v9461_v59 = vpop.eup %9460 }
0x2614   : > { %v5753_v60 = vpop.f32.mrb[64].mxu1 }
0x2615   : > { %v5757_v62 = vmul.f32 %v9461_v59, %v5753_v60  ;;  %v8788_v0 = vpop.f32.mrb[65].mxu1 }
0x2617   : > { %8792 = vmatmul.mubr.msk.f32.vlgmr.msra.gmra.mrb[50].mxu0 %vm1176_vm5, %v5757_v62  ;;  %v7903_v62 = vld [vmem:[%s11222_s16 + $0xa] ss:$0 sm:$0xff] }
0x2618   : > { %9257 = vmatpush3.bf16.msra.mxu0 %v9254_v55  ;;  %8813 = vmatprep.mubr.msk.f32.mxu0 %vm950_vm3, %v10707_v42 }
0x2619   : > { %9259 = vmatprep.subr.bf16.mxu0 %v9258_v1 }
0x261c   : > { %v5904_v2 = vpop.f32.mrb[66].mxu1  ;;  %9261 = vmatpush3.bf16.msra.mxu0 %v9258_v1 }
0x261d   : > { %v8804_v4 = vpop.f32.mrb[67].mxu1  ;;  %9270 = vmatprep.subr.bf16.mxu0 %v9544_v3  ;;  %v5905_v22 = vadd.f32 %v7884_v21, %v5904_v2 }
0x261f   : > { %8814 = vmatmul.mubr.msk.f32.vlgmr.msra.gmra.mrb[52].mxu0 %vm950_vm3, %v10716_v44 }
0x2620   : > { %8831 = vmatprep.mubr.msk.f32.mxu0 %vm9545_vm2, %v9546_v61 }
0x2624   : > { %v8826_v6 = vpop.f32.mrb[68].mxu1 }
0x2625   : > { %v6067_v8 = vadd.f32 %v8826_v6, %v7889_v5  ;;  %v6061_v9 = vpop.f32.mrb[69].mxu1  ;;  %v7869_v6 = vld [vmem:[%s11224_s18 + $0x2] ss:$0 sm:$0xff] }
0x2626   : > { %v6062_v11 = vadd.f32 %v7889_v5, %v6061_v9 }
0x2628   : > { %v9275_v12 = vpack.c.bf16 %v6067_v8, %v6062_v11 }
0x262a   : > { %9277 = vmatpush3.bf16.msk.msra.mxu1 %vm10793_vm0, %v9275_v12 }
0x262b   : > { %9278 = vmatprep.subr.bf16.mxu1 %v9544_v3 }
0x26ea   : > { %v10868_v23 = vpop.f32.mrb[50].mxu0 }
0x26eb   : > { %v8793_v13 = vpop.f32.mrb[51].mxu0  ;;  %v5831_v8 = vadd.f32 %v7869_v6, %v10868_v23  ;;  %v7898_v23 = vld [vmem:[%s11266_s12 + $0xa] ss:$0 sm:$0xff] }
0x26ec   : > { %v7900_v13 = vld [vmem:[%s11220_s14 + $0xa] ss:$0 sm:$0xff] }
0x26f2   : > { %v8815_v15 = vpop.f32.mrb[52].mxu0 }
0x26f3   : > { %v5986_v16 = vadd.f32 %v8815_v15, %v7886_v14  ;;  %v5980_v17 = vpop.f32.mrb[53].mxu0 }
0x26f4   : > { %v5981_v18 = vadd.f32 %v7886_v14, %v5980_v17 }
0x26f6   : > { %v9271_v19 = vpack.c.bf16 %v5986_v16, %v5981_v18 }
0x26f8   : > { %9273 = vmatpush3.bf16.xpose.msk.msra.mxu0 %vm10733_vm13, %v9271_v19 }
0x26f9   : > { %8841 = vmatprep.subr.mxu0 %v9546_v61 }
0x26ff   : > { %8832 = vmatmul.mubr.msk.f32.vlgmr.msra.gmra.mrb[54].mxu0 %vm1176_vm5, %v5905_v22 }
0x2700   : > { %8843 = vmatprep.mubr.msk.f32.mxu0 %vm9545_vm2, %v9546_v61  ;;  %8842 = vmatpush3.msra.mxu0 %v7865_v50  ;;  %v7838_v50 = vld [vmem:[%s11219_s13 + $0x170] sm:$0xff] }
0x2701   : > { %9285 = vmatprep.subr.bf16.mxu0 %v9284_v51 }
0x27d2   : > { %v6145_v20 = vpop.f32.mrb[54].mxu0 }
0x27d3   : > { %v6149_v24 = vmul.f32 0.35355338, %v6145_v20  ;;  %v8833_v25 = vpop.f32.mrb[55].mxu0 }
0x27d5   : > { %v6150_v7 = vsel %vm5669_vm1, %v6149_v24, -inf }
0x27d6   : > { %6151 = vmax.xlane.f32.xlu1 %v6150_v7 }
0x2863   : > { %v6152_v29 = vpop.xlane.xlu1 %6151 }
0x2864   : > { %v6153_v30 = vsub.f32 %v6149_v24, %v6152_v29 }
0x2866   : > { %v6154_v31 = vmul.f32 1.442695, %v6153_v30  ;;  %v7816_v30 = vld [vmem:[%s11265_s11 + $0x160] sm:$0xff] }
0x2868   : > { %9462 = vpow2.f32 %v6154_v31  ;;  %v7817_v31 = vld [vmem:[%s11265_s11 + $0x168] sm:$0xff] }
0x2869   : > { %v9309_v32 = vpack.c.bf16 %v7817_v31, %v7816_v30 }
0x2872   : > { %v9463_v38 = vpop.eup %9462 }
0x2873   : > { %8839 = vmatmul.mubr.msk.f32.vlgmr.msra.gmra.mrb[70].mxu1 %vm5669_vm1, %v9463_v38  ;;  %v6156_v43 = vsel %vm5669_vm1, %v9463_v38, 0.0  ;;  %v7857_v38 = vld [vmem:[%s11221_s15 + $0x168] sm:$0xff] }
0x2874   : > { %9280 = vmatpush3.bf16.msra.mxu1 %v9279_v34  ;;  %6157 = vadd.xlane.f32.xlu1 %v6156_v43  ;;  %v7819_v34 = vld [vmem:[%s11265_s11 + $0x178] sm:$0xff]  ;;  %v9322_v43 = vpack.c.bf16 %v7857_v38, %v7856_v36  ;;  %s11280_s11 = sld [smem:[#allocation22_spill]] }
0x2875   : > { %9281 = vmatprep.subr.bf16.mxu1 %v9544_v3  ;;  %8854 = vmatprep.mubr.msk.f32.mxu1 %vm9545_vm2, %v9546_v61  ;;  %v9312_v40 = vpack.c.bf16 %v7819_v34, %v7818_v33 }
0x2878   : > { %9283 = vmatpush3.bf16.msra.mxu1 %v9282_v28  ;;  %v7858_v28 = vld [vmem:[%s11221_s15 + $0x170] sm:$0xff] }
0x2879   : > { %9293 = vmatprep.subr.bf16.mxu1 %v9292_v45 }
0x287a   : > { %s11163_s12 = scalar_lea.hbm %s11280_s11, %s7960_s1 }
0x287b   : > { %8855 = vmatmul.mubr.msk.f32.vlgmr.msra.gmra.mrb[72].mxu1 %vm950_vm3, %v10773_v41 }
0x287c   : > { %9295 = vmatpush3.bf16.msra.mxu1 %v9292_v45  ;;  %8876 = vmatprep.mubr.msk.f32.mxu1 %vm950_vm3, %v10707_v42  ;;  %v7859_v45 = vld [vmem:[%s11221_s15 + $0x178] sm:$0xff] }
0x287d   : > { %9297 = vmatprep.subr.bf16.mxu1 %v9296_v27  ;;  %v9326_v46 = vpack.c.bf16 %v7859_v45, %v7858_v28  ;;  %v7933_v28 = vld [vmem:[%s11225_s19 + $0x38] sm:$0xff] }
0x2880   : > { %9299 = vmatpush3.bf16.msra.mxu1 %v9296_v27  ;;  %v7866_v27 = vld [vmem:[%s11223_s17 + $0x50] sm:$0xff] }
0x2881   : > { %9304 = vmatprep.subr.bf16.mxu1 %v9544_v3 }
0x2883   : > { %8877 = vmatmul.mubr.msk.f32.vlgmr.msra.gmra.mrb[74].mxu1 %vm950_vm3, %v10716_v44 }
0x2884   : > { %8890 = vmatprep.mubr.msk.f32.mxu1 %vm9545_vm2, %v9546_v61 }
0x2901   : > { %v6158_v37 = vpop.xlane.xlu1 %6157 }
0x2902   : > { %9464 = vrcp.f32 %v6158_v37 }
0x290c   : > { %v9465_v54 = vpop.eup %9464 }
0x2946   : > { %v6232_v55 = vpop.f32.mrb[70].mxu1 }
0x2947   : > { %v6236_v56 = vmul.f32 %v9465_v54, %v6232_v55  ;;  %v8840_v57 = vpop.f32.mrb[71].mxu1 }
0x2949   : > { %8844 = vmatmul.mubr.msk.f32.vlgmr.msra.gmra.mrb[56].mxu0 %vm1176_vm5, %v6236_v56 }
0x294a   : > { %9287 = vmatpush3.bf16.msra.mxu0 %v9284_v51  ;;  %8865 = vmatprep.mubr.msk.f32.mxu0 %vm950_vm3, %v10707_v42  ;;  %v7839_v51 = vld [vmem:[%s11219_s13 + $0x178] sm:$0xff] }
0x294b   : > { %9289 = vmatprep.subr.bf16.mxu0 %v9288_v58  ;;  %v9318_v55 = vpack.c.bf16 %v7839_v51, %v7838_v50  ;;  %v7928_v51 = vld [vmem:[%s11215_s9 + $0x5] ss:$0 sm:$0xff] }
0x294e   : > { %v6383_v59 = vpop.f32.mrb[72].mxu1  ;;  %9291 = vmatpush3.bf16.msra.mxu0 %v9288_v58  ;;  %v7917_v58 = vld [vmem:[%s11222_s16 + $0xb] ss:$0 sm:$0xff] }
0x294f   : > { %v8856_v60 = vpop.f32.mrb[73].mxu1  ;;  %9300 = vmatprep.subr.bf16.mxu0 %v9544_v3  ;;  %v6384_v19 = vadd.f32 %v7898_v23, %v6383_v59 }
0x2951   : > { %8866 = vmatmul.mubr.msk.f32.vlgmr.msra.gmra.mrb[58].mxu0 %vm950_vm3, %v10716_v44 }
0x2952   : > { %8883 = vmatprep.mubr.msk.f32.mxu0 %vm9545_vm2, %v9546_v61 }
0x2956   : > { %v8878_v0 = vpop.f32.mrb[74].mxu1 }
0x2957   : > { %v6546_v1 = vadd.f32 %v8878_v0, %v7903_v62  ;;  %v6540_v2 = vpop.f32.mrb[75].mxu1 }
0x2958   : > { %v6541_v4 = vadd.f32 %v7903_v62, %v6540_v2 }
0x295a   : > { %v9305_v5 = vpack.c.bf16 %v6546_v1, %v6541_v4  ;;  %v7914_v4 = vld [vmem:[%s11220_s14 + $0xb] ss:$0 sm:$0xff] }
0x295c   : > { %9307 = vmatpush3.bf16.msk.msra.mxu1 %vm10793_vm0, %v9305_v5 }
0x295d   : > { %9308 = vmatprep.subr.bf16.mxu1 %v9544_v3 }
0x2a1c   : > { %v6306_v9 = vpop.f32.mrb[56].mxu0 }
0x2a1d   : > { %v10954_v11 = vadd.f32 %v6306_v9, %v5831_v8  ;;  %v8845_v12 = vpop.f32.mrb[57].mxu0 }
0x2a24   : > { %v8867_v14 = vpop.f32.mrb[58].mxu0 }
0x2a25   : > { %v6465_v15 = vadd.f32 %v8867_v14, %v7900_v13  ;;  %v6459_v16 = vpop.f32.mrb[59].mxu0 }
0x2a26   : > { %v6460_v17 = vadd.f32 %v7900_v13, %v6459_v16 }
0x2a28   : > { %v9301_v18 = vpack.c.bf16 %v6465_v15, %v6460_v17 }
0x2a2a   : > { %9303 = vmatpush3.bf16.xpose.msk.msra.mxu0 %vm10733_vm13, %v9301_v18 }
0x2a2b   : > { %8893 = vmatprep.subr.mxu0 %v9546_v61 }
0x2a31   : > { %8884 = vmatmul.mubr.msk.f32.vlgmr.msra.gmra.mrb[60].mxu0 %vm1176_vm5, %v6384_v19 }
0x2a32   : > { %8895 = vmatprep.mubr.msk.f32.mxu0 %vm9545_vm2, %v9546_v61  ;;  %8894 = vmatpush3.msra.mxu0 %v7866_v27 }
0x2b04   : > { %v6624_v21 = vpop.f32.mrb[60].mxu0 }
0x2b05   : > { %v6628_v22 = vmul.f32 0.35355338, %v6624_v21  ;;  %v8885_v20 = vpop.f32.mrb[61].mxu0  ;;  %v7867_v21 = vld [vmem:[%s11223_s17 + $0x58] sm:$0xff] }
0x2b07   : > { %v6629_v24 = vsel %vm5669_vm1, %v6628_v22, -inf }
0x2b08   : > { %6630 = vmax.xlane.f32.xlu1 %v6629_v24 }
0x2b95   : > { %v6631_v25 = vpop.xlane.xlu1 %6630 }
0x2b96   : > { %v6632_v7 = vsub.f32 %v6628_v22, %v6631_v25 }
0x2b98   : > { %v6633_v29 = vmul.f32 1.442695, %v6632_v7 }
0x2b9a   : > { %9466 = vpow2.f32 %v6633_v29 }
0x2ba4   : > { %v9467_v35 = vpop.eup %9466 }
0x2ba5   : > { %8891 = vmatmul.mubr.msk.f32.vlgmr.msra.gmra.mrb[76].mxu1 %vm5669_vm1, %v9467_v35  ;;  %v6635_v39 = vsel %vm5669_vm1, %v9467_v35, 0.0 }
0x2ba6   : > { %9310 = vmatpush3.bf16.msra.mxu1 %v9309_v32  ;;  %6636 = vadd.xlane.f32.xlu1 %v6635_v39 }
0x2ba7   : > { %9311 = vmatprep.subr.bf16.mxu1 %v9544_v3  ;;  %8906 = vmatprep.mubr.msk.f32.mxu1 %vm9545_vm2, %v9546_v61 }
0x2baa   : > { %9313 = vmatpush3.bf16.msra.mxu1 %v9312_v40 }
0x2bab   : > { %9323 = vmatprep.subr.bf16.mxu1 %v9322_v43 }
0x2bad   : > { %8907 = vmatmul.mubr.msk.f32.vlgmr.msra.gmra.mrb[78].mxu1 %vm950_vm3, %v10773_v41  ;;  %v7837_v41 = vld [vmem:[%s11219_s13 + $0x168] sm:$0xff] }
0x2bae   : > { %9325 = vmatpush3.bf16.msra.mxu1 %v9322_v43  ;;  %8928 = vmatprep.mubr.msk.f32.mxu1 %vm950_vm3, %v10707_v42  ;;  %v9314_v48 = vpack.c.bf16 %v7837_v41, %v7836_v10  ;;  %v7932_v43 = vld [vmem:[%s11225_s19 + $0x30] sm:$0xff]  ;;  %v7936_v10 = vld [vmem:[%s11227_s21 + $0x88] sm:$0xff] }
0x2baf   : > { %9327 = vmatprep.subr.bf16.mxu1 %v9326_v46  ;;  %v9342_v45 = vpack.c.bf16 %v7933_v28, %v7932_v43 }
0x2bb0   : > { %9315 = vmatprep.subr.bf16.mxu0 %v9314_v48 }
0x2bb2   : > { %9329 = vmatpush3.bf16.msra.mxu1 %v9326_v46  ;;  %v7935_v46 = vld [vmem:[%s11227_s21 + $0x80] sm:$0xff] }
0x2bb3   : > { %9334 = vmatprep.subr.bf16.mxu1 %v9544_v3  ;;  %v9345_v41 = vpack.c.bf16 %v7936_v10, %v7935_v46 }
0x2bb5   : > { %8929 = vmatmul.mubr.msk.f32.vlgmr.msra.gmra.mrb[80].mxu1 %vm950_vm3, %v10716_v44 }
0x2bb6   : > { %8942 = vmatprep.mubr.msk.f32.mxu1 %vm9545_vm2, %v9546_v61 }
0x2c33   : > { %v6637_v49 = vpop.xlane.xlu1 %6636 }
0x2c34   : > { %9468 = vrcp.f32 %v6637_v49 }
0x2c3e   : > { %v9469_v37 = vpop.eup %9468 }
0x2c78   : > { %v6711_v52 = vpop.f32.mrb[76].mxu1 }
0x2c79   : > { %v6715_v53 = vmul.f32 %v9469_v37, %v6711_v52  ;;  %v8892_v54 = vpop.f32.mrb[77].mxu1  ;;  %v7929_v52 = vld [vmem:[%s11216_s10 + $0x5] ss:$0 sm:$0xff] }
0x2c7b   : > { %8896 = vmatmul.mubr.msk.f32.vlgmr.msra.gmra.mrb[62].mxu0 %vm1176_vm5, %v6715_v53 }
0x2c7c   : > { %9317 = vmatpush3.bf16.msra.mxu0 %v9314_v48  ;;  %8917 = vmatprep.mubr.msk.f32.mxu0 %vm950_vm3, %v10707_v42 }
0x2c7d   : > { %9319 = vmatprep.subr.bf16.mxu0 %v9318_v55 }
0x2c80   : > { %v6862_v56 = vpop.f32.mrb[78].mxu1  ;;  %9321 = vmatpush3.bf16.msra.mxu0 %v9318_v55  ;;  %v7937_v55 = vld [vmem:[%s11227_s21 + $0x90] sm:$0xff] }
0x2c81   : > { %v8908_v57 = vpop.f32.mrb[79].mxu1  ;;  %9330 = vmatprep.subr.bf16.mxu0 %v9544_v3 }
0x2c83   : > { %8918 = vmatmul.mubr.msk.f32.vlgmr.msra.gmra.mrb[64].mxu0 %vm950_vm3, %v10716_v44 }
0x2c84   : > { %8935 = vmatprep.mubr.msk.f32.mxu0 %vm9545_vm2, %v9546_v61 }
0x2c88   : > { %v8930_v59 = vpop.f32.mrb[80].mxu1 }
0x2c89   : > { %v7025_v60 = vadd.f32 %v8930_v59, %v7917_v58  ;;  %v7019_v62 = vpop.f32.mrb[81].mxu1  ;;  %v7940_v59 = vld [vmem:[%s11227_s21 + $0xa8] sm:$0xff] }
0x2c8a   : > { %v7020_v42 = vadd.f32 %v7917_v58, %v7019_v62  ;;  %v7939_v58 = vld [vmem:[%s11227_s21 + $0xa0] sm:$0xff]  ;;  %v7941_v62 = vld [vmem:[%s11227_s21 + $0xb0] sm:$0xff] }
0x2c8c   : > { %v9335_v0 = vpack.c.bf16 %v7025_v60, %v7020_v42  ;;  %v9351_v60 = vpack.c.bf16 %v7940_v59, %v7939_v58  ;;  %v7942_v42 = vld [vmem:[%s11227_s21 + $0xb8] sm:$0xff] }
0x2c8e   : > { %9337 = vmatpush3.bf16.msk.msra.mxu1 %vm10793_vm0, %v9335_v0  ;;  %v9354_v0 = vpack.c.bf16 %v7942_v42, %v7941_v62 }
0x2c8f   : > { %9338 = vmatprep.subr.bf16.mxu1 %v9544_v3 }
0x2d4e   : > { %v6785_v1 = vpop.f32.mrb[62].mxu0 }
0x2d4f   : > { %v6789_v44 = vadd.f32 %v6785_v1, %v10954_v11  ;;  %v8897_v2 = vpop.f32.mrb[63].mxu0  ;;  %v6863_v11 = vadd.f32 %v7912_v26, %v6862_v56  ;;  %v7938_v56 = vld [vmem:[%s11227_s21 + $0x98] sm:$0xff]  ;;  %v7943_v1 = vld [vmem:[%s11227_s21 + $0xc0] sm:$0xff]  ;;  %v7949_v26 = vld [vmem:[%s11227_s21 + $0xf0] sm:$0xff] }
0x2d50   : > { %v9348_v57 = vpack.c.bf16 %v7938_v56, %v7937_v55 }
0x2d56   : > { %v8919_v5 = vpop.f32.mrb[64].mxu0 }
0x2d57   : > { %v6944_v6 = vadd.f32 %v8919_v5, %v7914_v4  ;;  %v6938_v8 = vpop.f32.mrb[65].mxu0  ;;  %v7946_v5 = vld [vmem:[%s11227_s21 + $0xd8] sm:$0xff] }
0x2d58   : > { %v6939_v9 = vadd.f32 %v7914_v4, %v6938_v8  ;;  %v7945_v4 = vld [vmem:[%s11227_s21 + $0xd0] sm:$0xff]  ;;  %v7947_v8 = vld [vmem:[%s11227_s21 + $0xe0] sm:$0xff] }
0x2d5a   : > { %v9331_v12 = vpack.c.bf16 %v6944_v6, %v6939_v9  ;;  %v9360_v6 = vpack.c.bf16 %v7946_v5, %v7945_v4  ;;  %v7948_v9 = vld [vmem:[%s11227_s21 + $0xe8] sm:$0xff] }
0x2d5c   : > { %9333 = vmatpush3.bf16.xpose.msk.msra.mxu0 %vm10733_vm13, %v9331_v12  ;;  %v9363_v12 = vpack.c.bf16 %v7948_v9, %v7947_v8 }
0x2d5d   : > { %8945 = vmatprep.subr.mxu0 %v9546_v61 }
0x2d63   : > { %8936 = vmatmul.mubr.msk.f32.vlgmr.msra.gmra.mrb[66].mxu0 %vm1176_vm5, %v6863_v11  ;;  %v7950_v11 = vld [vmem:[%s11227_s21 + $0xf8] sm:$0xff] }
0x2d64   : > { %8947 = vmatprep.mubr.msk.f32.mxu0 %vm9545_vm2, %v9546_v61  ;;  %8946 = vmatpush3.msra.mxu0 %v7867_v21 }
0x2d65   : > { %9344 = vmatprep.subr.bf16.mxu0 %v9544_v3 }
0x2e36   : > { %v7103_v13 = vpop.f32.mrb[66].mxu0 }
0x2e37   : > { %v7107_v14 = vmul.f32 0.35355338, %v7103_v13  ;;  %v8937_v15 = vpop.f32.mrb[67].mxu0  ;;  %v9366_v13 = vpack.c.bf16 %v7950_v11, %v7949_v26 }
0x2e39   : > { %v7108_v16 = vsel %vm5669_vm1, %v7107_v14, -inf }
0x2e3a   : > { %7109 = vmax.xlane.f32.xlu0 %v7108_v16 }
0x2ec7   : > { %v7110_v63 = vpop.xlane.xlu0 %7109 }
0x2ec8   : > { %v7111_v17 = vsub.f32 %v7107_v14, %v7110_v63  ;;  %v7952_v14 = vld [vmem:[%s11226_s20 + $0x1] ss:$0 sm:$0xff] }
0x2eca   : > { %v7112_v18 = vmul.f32 1.442695, %v7111_v17 }
0x2ecc   : > { %9470 = vpow2.f32 %v7112_v18 }
0x2ed6   : > { %v9471_v23 = vpop.eup %9470 }
0x2ed7   : > { %8943 = vmatmul.mubr.msk.f32.vlgmr.msra.gmra.mrb[82].mxu1 %vm5669_vm1, %v9471_v23  ;;  %v7114_v19 = vsel %vm5669_vm1, %v9471_v23, 0.0 }
0x2ed8   : > { %7115 = vadd.xlane.f32.xlu1 %v7114_v19  ;;  %8958 = vmatprep.mubr.msk.f32.mxu1 %vm9545_vm2, %v9546_v61 }
0x2f65   : > { %v7116_v22 = vpop.xlane.xlu1 %7115 }
0x2f66   : > { %9472 = vrcp.f32 %v7116_v22 }
0x2f70   : > { %v9473_v20 = vpop.eup %9472 }
0x2faa   : > { %v7190_v24 = vpop.f32.mrb[82].mxu1 }
0x2fab   : > { %v7194_v25 = vmul.f32 %v9473_v20, %v7190_v24  ;;  %v8944_v7 = vpop.f32.mrb[83].mxu1 }
0x2fad   : > { %8948 = vmatmul.mubr.msk.f32.vlgmr.msra.gmra.mrb[68].mxu0 %vm1176_vm5, %v7194_v25 }
0x2fae   : > { %8993 = vmatprep.mubr.msk.f32.mxu0 %vm9545_vm2, %v9546_v61  ;;  %v7930_v61 = vld [vmem:[%s11225_s19 + $0x20] sm:$0xff]  ;;  %9346 = vmatpush3.bf16.msra.mxu0 %v9345_v41 }
0x2faf   : > { %9347 = vmatprep.subr.bf16.mxu0 %v9544_v3 }
0x2fb2   : > { %9349 = vmatpush3.bf16.msra.mxu0 %v9348_v57 }
0x2fb3   : > { %9350 = vmatprep.subr.bf16.mxu0 %v9544_v3 }
0x2fb6   : > { %9352 = vmatpush3.bf16.msra.mxu0 %v9351_v60 }
0x2fb7   : > { %9353 = vmatprep.subr.bf16.mxu0 %v9544_v3 }
0x2fba   : > { %9355 = vmatpush3.bf16.msra.mxu0 %v9354_v0 }
0x2fbb   : > { %9356 = vmatprep.subr.bf16.mxu0 %v9544_v3 }
0x3080   : > { %v7264_v29 = vpop.f32.mrb[68].mxu0 }
0x3081   : > { %v7268_v30 = vadd.f32 %v7264_v29, %v6789_v44  ;;  %v8949_v31 = vpop.f32.mrb[69].mxu0  ;;  %v7944_v44 = vld [vmem:[%s11227_s21 + $0xc8] sm:$0xff] }
0x3082   : > { %v9357_v2 = vpack.c.bf16 %v7944_v44, %v7943_v1 }
0x3083   : > { %v11062_v32 = vadd.f32 %v7268_v30, %v10724_v47  ;;  %v7931_v47 = vld [vmem:[%s11225_s19 + $0x28] sm:$0xff] }
0x3084   : > { %v9339_v40 = vpack.c.bf16 %v7931_v47, %v7930_v61  ;;  %9358 = vmatpush3.bf16.msra.mxu0 %v9357_v2 }
0x3085   : > { %v7274_v33 = vsel %vm950_vm3, %v11062_v32, 0.0  ;;  %9359 = vmatprep.subr.bf16.mxu0 %v9544_v3 }
0x3086   : > { %7275 = vadd.xlane.f32.xlu0 %v7274_v33  ;;  %9340 = vmatpush3.bf16.msra.mxu1 %v9339_v40 }
0x3087   : > { %9341 = vmatprep.subr.bf16.mxu1 %v9544_v3 }
0x3088   : > { %9361 = vmatpush3.bf16.msra.mxu0 %v9360_v6 }
0x3089   : > { %9362 = vmatprep.subr.bf16.mxu0 %v9544_v3 }
0x308a   : > { %9343 = vmatpush3.bf16.msra.mxu1 %v9342_v45  ;;  %v7958_v45 = vld [vmem:[%s11216_s10 + $0x6] ss:$0 sm:$0xff] }
0x308c   : > { %9364 = vmatpush3.bf16.msra.mxu0 %v9363_v12 }
0x308d   : > { %9365 = vmatprep.subr.bf16.mxu0 %v9544_v3  ;;  %v7954_v3 = vld [vmem:[%s11228_s22 + $0x1] ss:$0 sm:$0xff] }
0x3090   : > { %9367 = vmatpush3.bf16.msra.mxu0 %v9366_v13 }
0x3113   : > { %v7276_v34 = vpop.xlane.xlu0 %7275 }
0x3114   : > { %v7277_v35 = vmul.f32 0.03125, %v7276_v34 }
0x3116   : > { %v7278_v36 = vsub.f32 %v11062_v32, %v7277_v35 }
0x3118   : > { %v7279_v38 = vmul.f32 %v7278_v36, %v7278_v36 }
0x311a   : > { %v7280_v39 = vsel %vm950_vm3, %v7279_v38, 0.0 }
0x311b   : > { %7281 = vadd.xlane.f32.xlu1 %v7280_v39 }
0x31a8   : > { %v7282_v27 = vpop.xlane.xlu1 %7281 }
0x31a9   : > { %v7283_v48 = vmul.f32 0.03125, %v7282_v27 }
0x31ab   : > { %v7284_v49 = vadd.f32 1e-05, %v7283_v48 }
0x31ad   : > { %9474 = vrsqrt.f32 %v7284_v49 }
0x31b7   : > { %v9475_v50 = vpop.eup %9474 }
0x31b8   : > { %v7286_v37 = vmul.f32 %v9475_v50, %v7278_v36 }
0x31ba   : > { %v7293_v53 = vmul.f32 %v7928_v51, %v7286_v37 }
0x31bc   : > { %v7300_v54 = vadd.f32 %v7929_v52, %v7293_v53 }
0x31be   : > { %8959 = vmatmul.mubr.msk.f32.vlgmr.msra.gmra.mrb[84].mxu1 %vm950_vm3, %v7300_v54 }
0x3291   : > { %v7402_v15 = vpop.f32.mrb[84].mxu1 }
0x3292   : > { %v7403_v16 = vadd.f32 %v7952_v14, %v7402_v15  ;;  %v8960_v63 = vpop.f32.mrb[85].mxu1 }
0x3294   : > { %v7406_v17 = vmul.f32 %v7403_v16, %v7403_v16 }
0x3296   : > { %v7407_v18 = vmul.f32 %v7406_v17, %v7403_v16 }
0x3298   : > { %v7408_v23 = vmul.f32 0.044715, %v7407_v18 }
0x329a   : > { %v7409_v19 = vadd.f32 %v7408_v23, %v7403_v16 }
0x329c   : > { %v7410_v21 = vmul.f32 0.7978846, %v7409_v19 }
0x329e   : > { %9476 = vtanh.f32 %v7410_v21 }
0x32a8   : > { %v9477_v22 = vpop.eup %9476 }
0x32a9   : > { %v7412_v20 = vadd.f32 1.0, %v9477_v22 }
0x32ab   : > { %v7413_v24 = vmul.f32 0.5, %v7412_v20 }
0x32ad   : > { %v7414_v25 = vmul.f32 %v7413_v24, %v7403_v16 }
0x32af   : > { %8994 = vmatmul.mubr.f32.vlgmr.msra.gmra.mrb[70].mxu0 %v7414_v25 }
0x3382   : > { %v7487_v7 = vpop.f32.mrb[70].mxu0 }
0x3383   : > { %v7488_v29 = vadd.f32 %v7954_v3, %v7487_v7  ;;  %v8995_v30 = vpop.f32.mrb[71].mxu0 }
0x3385   : > { %v7491_v31 = vadd.f32 %v7488_v29, %v11062_v32  ;;  %v7957_v32 = vld [vmem:[%s11215_s9 + $0x6] ss:$0 sm:$0xff] }
0x3387   : > { %v7496_v33 = vsel %vm950_vm3, %v7491_v31, 0.0 }
0x3388   : > { %7497 = vadd.xlane.f32.xlu0 %v7496_v33 }
0x3415   : > { %v7498_v34 = vpop.xlane.xlu0 %7497 }
0x3416   : > { %v7499_v35 = vmul.f32 0.03125, %v7498_v34 }
0x3418   : > { %v7500_v36 = vsub.f32 %v7491_v31, %v7499_v35 }
0x341a   : > { %v7501_v38 = vmul.f32 %v7500_v36, %v7500_v36 }
0x341c   : > { %v7502_v39 = vsel %vm950_vm3, %v7501_v38, 0.0 }
0x341d   : > { %7503 = vadd.xlane.f32.xlu1 %v7502_v39 }
0x34aa   : > { %v7504_v61 = vpop.xlane.xlu1 %7503 }
0x34ab   : > { %v7505_v47 = vmul.f32 0.03125, %v7504_v61 }
0x34ad   : > { %v7506_v40 = vadd.f32 1e-05, %v7505_v47 }
0x34af   : > { %9478 = vrsqrt.f32 %v7506_v40 }
0x34b9   : > { %v9479_v43 = vpop.eup %9478 }
0x34ba   : > { %v7508_v28 = vmul.f32 %v9479_v43, %v7500_v36 }
0x34bc   : > { %v7515_v46 = vmul.f32 %v7957_v32, %v7508_v28 }
0x34be   : > { %v7522_v10 = vadd.f32 %v7958_v45, %v7515_v46 }
0x34c0   : > { %7523 = vst.msk [vmem:[%s727_s2] sm:$0xff] %vm950_vm3, %v7522_v10 }
0x34c1   : > { %9493 = shalt.err (!%p9490_p3)
}
0x34c2   : > { %s9494_s8 = scalar_lea.hbm %s11163_s12, 128  ;;  %s9498_s1 = scalar_lea.hbm %s11280_s11, 256 }
0x34c3   : > { %p9495_p4 = scmp.ne.s32.totalorder %s11163_s12, %s9494_s8  ;;  %p9499_p9 = scmp.lt.u32.totalorder %s11163_s12, %s11280_s11 }
0x34c4   : > { %p9500_p10 = scmp.lt.u32.totalorder %s9498_s1, %s9494_s8  ;;  %p9502_p12 = scmp.lt.u32.totalorder %s9494_s8, %s11163_s12 }
0x34c5   : > { %p9496_p7 = pnand %p9495_p4, %p9709_p5 }
0x34c6   : > { %p9501_p11 = por %p9500_p10, %p9499_p9 }
0x34c7   : > { %p9497_p8 = pneg %p9496_p7 }
0x34c8   : > { %p9503_p13 = por %p9502_p12, %p9501_p11 }
0x34ca   : > { %p9504_p0 = pnand %p9503_p13, %p9497_p8 }
0x34cc   : > { %9507 = shalt.err (!%p9504_p0)
}
0x34cd   : > { %9368 = dma.vmem_to_hbm [thread:$0]  (%p9709_p5), %s11165_s6, 128, %s11163_s12, %s7525_s0  }
0x34ce PF: > { %s11281_s24 = sld [smem:[#allocation7_spill]]  ;;  %s11282_s5 = sld [smem:[#allocation5_spill]] }
0x34d4   : > { %p9374_p1 = scmp.ge.s32.totalorder %s11281_s24, 2  ;;  %s7550_s3 = sand.u32 1, %s11282_s5  }
0x34d5   : > { %s7551_s25 = scalar_lea.sflag [#allocation3], %s7550_s3 }
0x34d6   : > { %p9371_p2 = pnand %p9374_p1, %p9713_p6 }
0x34d8   : > { %9525 = dma.done.wait (!%p9371_p2), %s7551_s25, 128  }
0x34d9   : > { %9527 = vsyncadd (!%p9371_p2), %s7551_s25, 4294967168  ;;  %s11284_s25 = sld [smem:[#allocation8_spill]]  ;;  %s11285_s8 = sld [smem:[#allocation6_spill]] }
0x34da   : > { %s11286_s24 = sld [smem:[#allocation9_spill]]  ;;  %s11287_s4 = smov %s9534_s30 }
0x34df   : > { %p33_p3 = scmp.ge.s32.totalorder %s11284_s25, 4   ;;  %s11288_s30 = smov %s11285_s8 }
0x34e1   :  { %35 = sbr.rel (!%p33_p3) target bundleno = 16 (0x10), region = 185 }
0x34e8   :  { %7556 = vsyncpa [#allocation3], 1 }
0x34e9   :  { %7558 = vsyncpa [#allocation3 + $0x1], 1 }

</bundles_post_ra>
